<compile_context>
chip_gen: v5e
topology: v5e:2x2
jax: 0.10.0
libtpu: 0.0.40
codegen_flags: <defaults>
</compile_context>

<pallas_src>
import functools

import jax
import jax.numpy as jnp
from jax.experimental import pallas as pl
from jax.experimental.pallas import tpu as pltpu


def _sigmoid(x):
    # 1 / (1 + exp(-x)) with the divide routed through the EUP approx
    # reciprocal; the EUP slot is otherwise idle under the MXU pushes.
    return pl.reciprocal(1.0 + jnp.exp(-x), approx=True)


def _blstm_block_kernel(len_ref, xproj_ref, whh_ref, out_ref, h_sc, c_sc, *,
                        H, TT):
    """One (direction, time-block) grid point of the bidirectional LSTM.

    len_ref   : (B, 1)       int32  valid lengths (resident, constant block)
    xproj_ref : (TT, B, 4H)  bf16   x @ W_ih^T + b for this dir / time block
    whh_ref   : (H, 4H)      bf16   recurrent weights for this direction
    out_ref   : (TT, B, H)   f32    hidden outputs (concat-friendly lane half)
    h_sc,c_sc : (B, H)       f32    recurrent state (VMEM scratch, per core)
    """
    d = pl.program_id(0)          # 0 = forward, 1 = backward
    tb = pl.program_id(1)         # time-block index along the grid
    NT = pl.num_programs(1)

    @pl.when(tb == 0)
    def _():
        h_sc[...] = jnp.zeros_like(h_sc)
        c_sc[...] = jnp.zeros_like(c_sc)

    # Global time offset of this block (backward walks blocks in reverse).
    t_base = (tb * (1 - d) + (NT - 1 - tb) * d) * TT

    w_hh = whh_ref[...]           # (H, 4H) bf16, pre-transposed, lane-dense
    lens = len_ref[...]           # (B, 1)  int32

    def step(s, carry):
        h_prev, c_prev = carry
        # Index within the block (backward walks the block in reverse order).
        local = s * (1 - d) + (TT - 1 - s) * d
        t_glob = t_base + local

        gates = xproj_ref[local].astype(jnp.float32) + jnp.dot(
            h_prev.astype(w_hh.dtype), w_hh,
            preferred_element_type=jnp.float32)          # (B, 4H) f32 accum

        # PyTorch gate order: i, f, g, o.
        i = _sigmoid(gates[:, 0 * H:1 * H])
        f = _sigmoid(gates[:, 1 * H:2 * H])
        g = jnp.tanh(gates[:, 2 * H:3 * H])
        o = _sigmoid(gates[:, 3 * H:4 * H])

        c_cand = f * c_prev + i * g
        h_cand = o * jnp.tanh(c_cand)

        # Packed-sequence semantics: freeze state / zero output at padded
        # positions.  Boolean selects instead of float multiply-blends.
        m = t_glob < lens                                # (B, 1) bool
        c_new = jnp.where(m, c_cand, c_prev)
        h_new = jnp.where(m, h_cand, h_prev)
        out_ref[local] = jnp.where(m, h_new, 0.0)
        return h_new, c_new

    h_fin, c_fin = jax.lax.fori_loop(0, TT, step, (h_sc[...], c_sc[...]),
                                     unroll=True)
    h_sc[...] = h_fin
    c_sc[...] = c_fin


def _pick_tt(T):
    """Timesteps per grid step (amortizes per-step Pallas/DMA overhead)."""
    for tt in (32, 16, 8):
        if T >= tt and T % tt == 0:
            return tt
    return T if T < 8 else 8      # pad T up to a multiple of 8 otherwise


def _vmem_limit_bytes(B, H, TT, weight_bufs):
    """Scoped-VMEM request from actual block sizes x actual buffer counts."""
    whh = weight_bufs * H * 4 * H * 2      # bf16 recurrent weights (one dir)
    xin = 2 * TT * B * 4 * H * 2           # bf16 x_proj block, double-buffered
    outb = 2 * TT * B * H * 4              # f32 output block, double-buffered
    state = 2 * B * H * 4                  # h / c scratch
    lens = 2 * 8 * 128 * 4                 # padded (B,1) int32 lengths block
    need = whh + xin + outb + state + lens + (8 << 20)   # + compiler headroom
    try:
        cap = pltpu.get_tpu_info().vmem_capacity_bytes
    except Exception:
        cap = 64 << 20                     # conservative (v7x per-TC VMEM)
    return int(max(16 << 20, min(need, int(cap * 0.8))))


def _blstm_recurrence(x_proj, w_hh_bf16, lengths_col, *, T_pad, B, H, TT):
    """x_proj: (2,T_pad,B,4H) bf16; w_hh_bf16: (2,H,4H) bf16; lengths: (B,1).

    Returns (T_pad, B, 2H) f32 with forward hiddens in [..., :H] and backward
    hiddens in [..., H:] (zeros at padded positions).
    """
    NT = T_pad // TT
    kernel = functools.partial(_blstm_block_kernel, H=H, TT=TT)

    def t_block(d, tb):
        # forward (d=0): tb ; backward (d=1): NT-1-tb
        return tb * (1 - d) + (NT - 1 - tb) * d

    def build(single_buffer_weights):
        if single_buffer_weights:
            # W_hh is constant along the time axis -> double-buffering it is
            # pure VMEM waste (32 MiB at H=2048).  Single-buffer it.
            whh_spec = pl.BlockSpec((None, H, 4 * H), lambda d, tb: (d, 0, 0),
                                    pipeline_mode=pl.Buffered(1))
        else:
            whh_spec = pl.BlockSpec((None, H, 4 * H), lambda d, tb: (d, 0, 0))
        return pl.pallas_call(
            kernel,
            grid=(2, NT),
            in_specs=[
                pl.BlockSpec((B, 1), lambda d, tb: (0, 0)),     # lengths
                pl.BlockSpec((None, TT, B, 4 * H),              # x @ W_ih^T + b
                             lambda d, tb: (d, t_block(d, tb), 0, 0)),
                whh_spec,                                       # W_hh (bf16)
            ],
            out_specs=pl.BlockSpec((TT, B, H),
                                   lambda d, tb: (t_block(d, tb), 0, d)),
            out_shape=jax.ShapeDtypeStruct((T_pad, B, 2 * H), jnp.float32),
            scratch_shapes=[
                pltpu.VMEM((B, H), jnp.float32),   # h state (per core)
                pltpu.VMEM((B, H), jnp.float32),   # c state (per core)
            ],
            compiler_params=pltpu.CompilerParams(
                # direction axis: parallel (v7x megacore: one TC per direction)
                # time axis: arbitrary (sequential recurrence, state in scratch)
                dimension_semantics=("parallel", "arbitrary"),
                vmem_limit_bytes=_vmem_limit_bytes(
                    B, H, TT, weight_bufs=1 if single_buffer_weights else 2)),
        )

    try:
        return build(True)(lengths_col, x_proj, w_hh_bf16)
    except Exception:
        # JAX build without BlockSpec.pipeline_mode / Buffered(1) support:
        # fall back to the default (double-buffered) weight spec.
        return build(False)(lengths_col, x_proj, w_hh_bf16)


def blstm_encoder_forward(emb_batch, lengths, params):
    """emb_batch: (B, T, E) float32; lengths: (B,) int32.

    Returns (B, T, 2*H): padded BLSTM output, zeros at padded positions
    (equivalent to pack_padded_sequence + nn.LSTM(bidirectional=True)
    + pad_packed_sequence, i.e. pack_forward(self.enc_lstm, emb_batch, lengths)).
    """
    B, T, E = emb_batch.shape
    H = params["w_hh"].shape[1]
    assert H % 128 == 0, "hidden size must be a multiple of 128 (lane dim)"

    TT = _pick_tt(T)
    NT = (T + TT - 1) // TT
    T_pad = NT * TT

    # Pad batch to a multiple of 8 (sublane dim) only; padded rows get length 0
    # so they are fully masked, then sliced off.
    Bp = max(8, ((B + 7) // 8) * 8)

    x = emb_batch.astype(jnp.bfloat16)
    if Bp != B or T_pad != T:
        x = jnp.pad(x, ((0, Bp - B), (0, T_pad - T), (0, 0)))
        lengths = jnp.pad(lengths, (0, Bp - B))

    # Hoisted input projection: one big bf16 GEMM (f32 accumulation) for both
    # directions, producing the time-major (dir, T, B, 4H) gate inputs directly
    # (transpose folded into the GEMM output layout); stored in bf16 to halve
    # HBM traffic and the per-step DMA into the recurrent kernel.
    w_ih = params["w_ih"].astype(jnp.bfloat16)                 # (2, E, 4H)
    x_proj = jnp.einsum("bte,deg->dtbg", x, w_ih,
                        preferred_element_type=jnp.float32)
    x_proj = (x_proj + params["b"][:, None, None, :]).astype(jnp.bfloat16)

    w_hh_bf16 = params["w_hh"].astype(jnp.bfloat16)            # (2, H, 4H)
    lengths_col = lengths.astype(jnp.int32).reshape(Bp, 1)     # (Bp, 1)

    out = _blstm_recurrence(x_proj, w_hh_bf16, lengths_col,
                            T_pad=T_pad, B=Bp, H=H, TT=TT)     # (T_pad, Bp, 2H)

    # Concat-friendly layout: forward already in [..., :H], backward in
    # [..., H:]; only a cheap (T,B,.) -> (B,T,.) swap remains.
    return jnp.transpose(out[:T, :B], (1, 0, 2))


# ----------------------------------------------------------------------------
# Pure-JAX reference (same packed-sequence semantics, full f32) and init.
# ----------------------------------------------------------------------------

def _ref_lstm_direction(x_tbe, lengths, w_ih_t, w_hh_t, b, reverse):
    """lax.scan reference; w_ih_t: (E,4H), w_hh_t: (H,4H), b: (4H,)."""
    T, B, _ = x_tbe.shape
    H = w_hh_t.shape[0]

    def step(carry, t):
        h, c = carry
        m = (t < lengths).astype(jnp.float32)[:, None]
        gates = x_tbe[t] @ w_ih_t + h @ w_hh_t + b
        i = jax.nn.sigmoid(gates[:, :H])
        f = jax.nn.sigmoid(gates[:, H:2 * H])
        g = jnp.tanh(gates[:, 2 * H:3 * H])
        o = jax.nn.sigmoid(gates[:, 3 * H:])
        c_cand = f * c + i * g
        h_cand = o * jnp.tanh(c_cand)
        c_new = m * c_cand + (1.0 - m) * c
        h_new = m * h_cand + (1.0 - m) * h
        return (h_new, c_new), h_new * m

    ts = jnp.arange(T)
    order = ts[::-1] if reverse else ts
    init = (jnp.zeros((B, H), jnp.float32), jnp.zeros((B, H), jnp.float32))
    _, outs = jax.lax.scan(step, init, order)
    return outs[::-1] if reverse else outs


def _init_params(key, E, H):
    """nn.LSTM-style U(-1/sqrt(H), 1/sqrt(H)) init, stored pre-transposed:
       w_ih: (2, E, 4H), w_hh: (2, H, 4H), b: (2, 4H) = b_ih + b_hh."""
    k = 1.0 / jnp.sqrt(jnp.float32(H))
    keys = jax.random.split(key, 8)
    u = lambda kk, shape: jax.random.uniform(kk, shape, jnp.float32, -k, k)
    w_ih = jnp.stack([u(keys[0], (4 * H, E)).T, u(keys[4], (4 * H, E)).T])
    w_hh = jnp.stack([u(keys[1], (4 * H, H)).T, u(keys[5], (4 * H, H)).T])
    b = jnp.stack([u(keys[2], (4 * H,)) + u(keys[3], (4 * H,)),
                   u(keys[6], (4 * H,)) + u(keys[7], (4 * H,))])
    return dict(w_ih=w_ih, w_hh=w_hh, b=b)


if __name__ == "__main__":
    # Small stand-ins for embedding_dim / hidden_sizes=2048 (H kept a multiple
    # of 128 so every lane dim is layout-friendly).
    B, T, E, H = 2, 8, 16, 128

    key = jax.random.PRNGKey(0)
    k_x, k_p = jax.random.split(key)
    emb_batch = jax.random.normal(k_x, (B, T, E), jnp.float32)
    lengths = jnp.array([T, 5], dtype=jnp.int32)
    params = _init_params(k_p, E, H)

    out = jax.block_until_ready(blstm_encoder_forward(emb_batch, lengths, params))
    assert out.shape == (B, T, 2 * H)

    # Cross-check against the pure-f32 reference (kernel uses bf16 projection,
    # bf16 W_hh and EUP approx-reciprocal sigmoids, so allow a looser tol).
    x_tbe = jnp.transpose(emb_batch, (1, 0, 2))
    ref_f = _ref_lstm_direction(x_tbe, lengths, params["w_ih"][0],
                                params["w_hh"][0], params["b"][0], reverse=False)
    ref_b = _ref_lstm_direction(x_tbe, lengths, params["w_ih"][1],
                                params["w_hh"][1], params["b"][1], reverse=True)
    ref = jnp.transpose(jnp.concatenate([ref_f, ref_b], axis=-1), (1, 0, 2))
    err = float(jnp.max(jnp.abs(out - ref)))
    assert err < 6e-2, err

    print("KERNEL_OK")
</pallas_src>

<mosaic_0001>
module attributes {stable_mosaic.version = 11 : i64} {
  func.func @_blstm_block_kernel(%arg0: i32, %arg1: i32, %arg2: memref<8x1xi32, #tpu.memory_space<vmem>>, %arg3: memref<1x8x8x512xbf16, #tpu.memory_space<vmem>>, %arg4: memref<1x128x512xbf16, #tpu.memory_space<vmem>>, %arg5: memref<8x8x128xf32, #tpu.memory_space<vmem>>, %arg6: memref<8x128xf32, #tpu.memory_space<vmem>>, %arg7: memref<8x128xf32, #tpu.memory_space<vmem>>) attributes {dimension_semantics = [#tpu.dimension_semantics<parallel>, #tpu.dimension_semantics<arbitrary>], iteration_bounds = array<i64: 2, 1>, scalar_prefetch = 0 : i64, scratch_operands = 2 : i64, tpu.core_type = #tpu.core_type<tc>, window_params = [{pipeline_mode = #tpu.pipeline_mode<synchronous>, transform_indices = @transform_0, window_bounds = array<i64: 8, 1>}, {transform_indices = @transform_1, window_bounds = array<i64: 1, 8, 8, 512>}, {pipeline_mode = #tpu.pipeline_mode<synchronous>, transform_indices = @transform_2, window_bounds = array<i64: 1, 128, 512>}, {transform_indices = @transform_3, window_bounds = array<i64: 8, 8, 128>}]} {
    %c0_i32 = arith.constant 0 : i32
    %0 = arith.cmpi eq, %arg1, %c0_i32 : i32
    %1 = arith.extui %0 : i1 to i32
    %c0_i32_0 = arith.constant 0 : i32
    %2 = arith.cmpi ne, %1, %c0_i32_0 : i32
    scf.if %2 {
      %cst_136 = arith.constant 0.000000e+00 : f32
      %472 = vector.broadcast %cst_136 : f32 to vector<8x128xf32>
      %c0_137 = arith.constant 0 : index
      %c0_138 = arith.constant 0 : index
      %473 = vector.load %arg6[%c0_137, %c0_138] : memref<8x128xf32, #tpu.memory_space<vmem>>, vector<8x128xf32>
      tpu.vector_store %arg6[%c0_137, %c0_138], %472 {strides = array<i32>} : memref<8x128xf32, #tpu.memory_space<vmem>>, vector<8x128xf32>,
      %cst_139 = arith.constant 0.000000e+00 : f32
      %474 = vector.broadcast %cst_139 : f32 to vector<8x128xf32>
      %c0_140 = arith.constant 0 : index
      %c0_141 = arith.constant 0 : index
      %475 = vector.load %arg7[%c0_140, %c0_141] : memref<8x128xf32, #tpu.memory_space<vmem>>, vector<8x128xf32>
      tpu.vector_store %arg7[%c0_140, %c0_141], %474 {strides = array<i32>} : memref<8x128xf32, #tpu.memory_space<vmem>>, vector<8x128xf32>,
    } else {
    }
    %c1_i32 = arith.constant 1 : i32
    %3 = arith.subi %c1_i32, %arg0 : i32
    %4 = arith.muli %arg1, %3 : i32
    %c0_i32_1 = arith.constant 0 : i32
    %5 = arith.subi %c0_i32_1, %arg1 : i32
    %6 = arith.muli %5, %arg0 : i32
    %7 = arith.addi %4, %6 : i32
    %c8_i32 = arith.constant 8 : i32
    %8 = arith.muli %7, %c8_i32 : i32
    %c0 = arith.constant 0 : index
    %c0_2 = arith.constant 0 : index
    %c0_3 = arith.constant 0 : index
    %9 = vector.load %arg4[%c0, %c0_2, %c0_3] : memref<1x128x512xbf16, #tpu.memory_space<vmem>>, vector<1x128x512xbf16>
    %10 = vector.shape_cast %9 : vector<1x128x512xbf16> to vector<128x512xbf16>
    %c0_4 = arith.constant 0 : index
    %c0_5 = arith.constant 0 : index
    %11 = vector.load %arg2[%c0_4, %c0_5] : memref<8x1xi32, #tpu.memory_space<vmem>>, vector<8x1xi32>
    %c0_6 = arith.constant 0 : index
    %c0_7 = arith.constant 0 : index
    %12 = vector.load %arg6[%c0_6, %c0_7] : memref<8x128xf32, #tpu.memory_space<vmem>>, vector<8x128xf32>
    %c0_8 = arith.constant 0 : index
    %c0_9 = arith.constant 0 : index
    %13 = vector.load %arg7[%c0_8, %c0_9] : memref<8x128xf32, #tpu.memory_space<vmem>>, vector<8x128xf32>
    %c0_i32_10 = arith.constant 0 : i32
    %c1_i32_11 = arith.constant 1 : i32
    %14 = arith.subi %c1_i32_11, %arg0 : i32
    %15 = arith.muli %c0_i32_10, %14 : i32
    %c7_i32 = arith.constant 7 : i32
    %16 = arith.subi %c7_i32, %c0_i32_10 : i32
    %17 = arith.muli %16, %arg0 : i32
    %18 = arith.addi %15, %17 : i32
    %19 = arith.addi %8, %18 : i32
    %c0_12 = arith.constant 0 : index
    %20 = arith.index_cast %18 : i32 to index
    %c0_13 = arith.constant 0 : index
    %c0_14 = arith.constant 0 : index
    %21 = vector.load %arg3[%c0_12, %20, %c0_13, %c0_14] : memref<1x8x8x512xbf16, #tpu.memory_space<vmem>>, vector<1x1x8x512xbf16>
    %22 = vector.shape_cast %21 : vector<1x1x8x512xbf16> to vector<8x512xbf16>
    %23 = arith.extf %22 : vector<8x512xbf16> to vector<8x512xf32>
    %24 = arith.truncf %12 : vector<8x128xf32> to vector<8x128xbf16>
    %cst = arith.constant dense<0.000000e+00> : vector<8x512xf32>
    %25 = tpu.matmul %24, %10, %cst {dimension_numbers = #tpu.dot_dimension_numbers<[1], [0], [0], [1], [0, 0, 1, 1], [], []>} : vector<8x128xbf16>, vector<128x512xbf16>, vector<8x512xf32> -> vector<8x512xf32>
    %26 = arith.addf %23, %25 : vector<8x512xf32>
    %27 = vector.extract_strided_slice %26 {offsets = [0, 0], sizes = [8, 128], strides = [1, 1]} : vector<8x512xf32> to vector<8x128xf32>
    %cst_15 = arith.constant 0.000000e+00 : f32
    %28 = vector.broadcast %cst_15 : f32 to vector<8x128xf32>
    %29 = arith.subf %28, %27 : vector<8x128xf32>
    %30 = math.exp %29 : vector<8x128xf32>
    %cst_16 = arith.constant 1.000000e+00 : f32
    %31 = vector.broadcast %cst_16 : f32 to vector<8x128xf32>
    %32 = arith.addf %31, %30 : vector<8x128xf32>
    %33 = tpu.reciprocal %32 {approx = true} : vector<8x128xf32> -> vector<8x128xf32>
    %34 = vector.extract_strided_slice %26 {offsets = [0, 128], sizes = [8, 128], strides = [1, 1]} : vector<8x512xf32> to vector<8x128xf32>
    %cst_17 = arith.constant 0.000000e+00 : f32
    %35 = vector.broadcast %cst_17 : f32 to vector<8x128xf32>
    %36 = arith.subf %35, %34 : vector<8x128xf32>
    %37 = math.exp %36 : vector<8x128xf32>
    %cst_18 = arith.constant 1.000000e+00 : f32
    %38 = vector.broadcast %cst_18 : f32 to vector<8x128xf32>
    %39 = arith.addf %38, %37 : vector<8x128xf32>
    %40 = tpu.reciprocal %39 {approx = true} : vector<8x128xf32> -> vector<8x128xf32>
    %41 = vector.extract_strided_slice %26 {offsets = [0, 256], sizes = [8, 128], strides = [1, 1]} : vector<8x512xf32> to vector<8x128xf32>
    %42 = math.tanh %41 : vector<8x128xf32>
    %43 = vector.extract_strided_slice %26 {offsets = [0, 384], sizes = [8, 128], strides = [1, 1]} : vector<8x512xf32> to vector<8x128xf32>
    %cst_19 = arith.constant 0.000000e+00 : f32
    %44 = vector.broadcast %cst_19 : f32 to vector<8x128xf32>
    %45 = arith.subf %44, %43 : vector<8x128xf32>
    %46 = math.exp %45 : vector<8x128xf32>
    %cst_20 = arith.constant 1.000000e+00 : f32
    %47 = vector.broadcast %cst_20 : f32 to vector<8x128xf32>
    %48 = arith.addf %47, %46 : vector<8x128xf32>
    %49 = tpu.reciprocal %48 {approx = true} : vector<8x128xf32> -> vector<8x128xf32>
    %50 = arith.mulf %40, %13 : vector<8x128xf32>
    %51 = arith.mulf %33, %42 : vector<8x128xf32>
    %52 = arith.addf %50, %51 : vector<8x128xf32>
    %53 = math.tanh %52 : vector<8x128xf32>
    %54 = arith.mulf %49, %53 : vector<8x128xf32>
    %55 = vector.broadcast %19 : i32 to vector<8x1xi32>
    %56 = arith.cmpi slt, %55, %11 : vector<8x1xi32>
    %57 = vector.shape_cast %56 : vector<8x1xi1> to vector<8x1xi1>
    %58 = vector.broadcast %57 : vector<8x1xi1> to vector<8x128xi1>
    %59 = arith.select %58, %52, %13 : vector<8x128xi1>, vector<8x128xf32>
    %60 = vector.shape_cast %56 : vector<8x1xi1> to vector<8x1xi1>
    %61 = vector.broadcast %60 : vector<8x1xi1> to vector<8x128xi1>
    %62 = arith.select %61, %54, %12 : vector<8x128xi1>, vector<8x128xf32>
    %cst_21 = arith.constant 0.000000e+00 : f32
    %63 = vector.shape_cast %56 : vector<8x1xi1> to vector<8x1xi1>
    %64 = vector.broadcast %63 : vector<8x1xi1> to vector<8x128xi1>
    %65 = vector.broadcast %cst_21 : f32 to vector<8x128xf32>
    %66 = arith.select %64, %62, %65 : vector<8x128xi1>, vector<8x128xf32>
    %67 = arith.index_cast %18 : i32 to index
    %c0_22 = arith.constant 0 : index
    %c0_23 = arith.constant 0 : index
    %68 = vector.load %arg5[%67, %c0_22, %c0_23] : memref<8x8x128xf32, #tpu.memory_space<vmem>>, vector<1x8x128xf32>
    %69 = vector.shape_cast %68 : vector<1x8x128xf32> to vector<8x128xf32>
    %70 = vector.shape_cast %66 : vector<8x128xf32> to vector<1x8x128xf32>
    tpu.vector_store %arg5[%67, %c0_22, %c0_23], %70 {strides = array<i32>} : memref<8x8x128xf32, #tpu.memory_space<vmem>>, vector<1x8x128xf32>,
    %c1_i32_24 = arith.constant 1 : i32
    %c1_i32_25 = arith.constant 1 : i32
    %71 = arith.subi %c1_i32_25, %arg0 : i32
    %72 = arith.muli %c1_i32_24, %71 : i32
    %c7_i32_26 = arith.constant 7 : i32
    %73 = arith.subi %c7_i32_26, %c1_i32_24 : i32
    %74 = arith.muli %73, %arg0 : i32
    %75 = arith.addi %72, %74 : i32
    %76 = arith.addi %8, %75 : i32
    %c0_27 = arith.constant 0 : index
    %77 = arith.index_cast %75 : i32 to index
    %c0_28 = arith.constant 0 : index
    %c0_29 = arith.constant 0 : index
    %78 = vector.load %arg3[%c0_27, %77, %c0_28, %c0_29] : memref<1x8x8x512xbf16, #tpu.memory_space<vmem>>, vector<1x1x8x512xbf16>
    %79 = vector.shape_cast %78 : vector<1x1x8x512xbf16> to vector<8x512xbf16>
    %80 = arith.extf %79 : vector<8x512xbf16> to vector<8x512xf32>
    %81 = arith.truncf %62 : vector<8x128xf32> to vector<8x128xbf16>
    %cst_30 = arith.constant dense<0.000000e+00> : vector<8x512xf32>
    %82 = tpu.matmul %81, %10, %cst_30 {dimension_numbers = #tpu.dot_dimension_numbers<[1], [0], [0], [1], [0, 0, 1, 1], [], []>} : vector<8x128xbf16>, vector<128x512xbf16>, vector<8x512xf32> -> vector<8x512xf32>
    %83 = arith.addf %80, %82 : vector<8x512xf32>
    %84 = vector.extract_strided_slice %83 {offsets = [0, 0], sizes = [8, 128], strides = [1, 1]} : vector<8x512xf32> to vector<8x128xf32>
    %cst_31 = arith.constant 0.000000e+00 : f32
    %85 = vector.broadcast %cst_31 : f32 to vector<8x128xf32>
    %86 = arith.subf %85, %84 : vector<8x128xf32>
    %87 = math.exp %86 : vector<8x128xf32>
    %cst_32 = arith.constant 1.000000e+00 : f32
    %88 = vector.broadcast %cst_32 : f32 to vector<8x128xf32>
    %89 = arith.addf %88, %87 : vector<8x128xf32>
    %90 = tpu.reciprocal %89 {approx = true} : vector<8x128xf32> -> vector<8x128xf32>
    %91 = vector.extract_strided_slice %83 {offsets = [0, 128], sizes = [8, 128], strides = [1, 1]} : vector<8x512xf32> to vector<8x128xf32>
    %cst_33 = arith.constant 0.000000e+00 : f32
    %92 = vector.broadcast %cst_33 : f32 to vector<8x128xf32>
    %93 = arith.subf %92, %91 : vector<8x128xf32>
    %94 = math.exp %93 : vector<8x128xf32>
    %cst_34 = arith.constant 1.000000e+00 : f32
    %95 = vector.broadcast %cst_34 : f32 to vector<8x128xf32>
    %96 = arith.addf %95, %94 : vector<8x128xf32>
    %97 = tpu.reciprocal %96 {approx = true} : vector<8x128xf32> -> vector<8x128xf32>
    %98 = vector.extract_strided_slice %83 {offsets = [0, 256], sizes = [8, 128], strides = [1, 1]} : vector<8x512xf32> to vector<8x128xf32>
    %99 = math.tanh %98 : vector<8x128xf32>
    %100 = vector.extract_strided_slice %83 {offsets = [0, 384], sizes = [8, 128], strides = [1, 1]} : vector<8x512xf32> to vector<8x128xf32>
    %cst_35 = arith.constant 0.000000e+00 : f32
    %101 = vector.broadcast %cst_35 : f32 to vector<8x128xf32>
    %102 = arith.subf %101, %100 : vector<8x128xf32>
    %103 = math.exp %102 : vector<8x128xf32>
    %cst_36 = arith.constant 1.000000e+00 : f32
    %104 = vector.broadcast %cst_36 : f32 to vector<8x128xf32>
    %105 = arith.addf %104, %103 : vector<8x128xf32>
    %106 = tpu.reciprocal %105 {approx = true} : vector<8x128xf32> -> vector<8x128xf32>
    %107 = arith.mulf %97, %59 : vector<8x128xf32>
    %108 = arith.mulf %90, %99 : vector<8x128xf32>
    %109 = arith.addf %107, %108 : vector<8x128xf32>
    %110 = math.tanh %109 : vector<8x128xf32>
    %111 = arith.mulf %106, %110 : vector<8x128xf32>
    %112 = vector.broadcast %76 : i32 to vector<8x1xi32>
    %113 = arith.cmpi slt, %112, %11 : vector<8x1xi32>
    %114 = vector.shape_cast %113 : vector<8x1xi1> to vector<8x1xi1>
    %115 = vector.broadcast %114 : vector<8x1xi1> to vector<8x128xi1>
    %116 = arith.select %115, %109, %59 : vector<8x128xi1>, vector<8x128xf32>
    %117 = vector.shape_cast %113 : vector<8x1xi1> to vector<8x1xi1>
    %118 = vector.broadcast %117 : vector<8x1xi1> to vector<8x128xi1>
    %119 = arith.select %118, %111, %62 : vector<8x128xi1>, vector<8x128xf32>
    %cst_37 = arith.constant 0.000000e+00 : f32
    %120 = vector.shape_cast %113 : vector<8x1xi1> to vector<8x1xi1>
    %121 = vector.broadcast %120 : vector<8x1xi1> to vector<8x128xi1>
    %122 = vector.broadcast %cst_37 : f32 to vector<8x128xf32>
    %123 = arith.select %121, %119, %122 : vector<8x128xi1>, vector<8x128xf32>
    %124 = arith.index_cast %75 : i32 to index
    %c0_38 = arith.constant 0 : index
    %c0_39 = arith.constant 0 : index
    %125 = vector.load %arg5[%124, %c0_38, %c0_39] : memref<8x8x128xf32, #tpu.memory_space<vmem>>, vector<1x8x128xf32>
    %126 = vector.shape_cast %125 : vector<1x8x128xf32> to vector<8x128xf32>
    %127 = vector.shape_cast %123 : vector<8x128xf32> to vector<1x8x128xf32>
    tpu.vector_store %arg5[%124, %c0_38, %c0_39], %127 {strides = array<i32>} : memref<8x8x128xf32, #tpu.memory_space<vmem>>, vector<1x8x128xf32>,
    %c2_i32 = arith.constant 2 : i32
    %c1_i32_40 = arith.constant 1 : i32
    %128 = arith.subi %c1_i32_40, %arg0 : i32
    %129 = arith.muli %c2_i32, %128 : i32
    %c7_i32_41 = arith.constant 7 : i32
    %130 = arith.subi %c7_i32_41, %c2_i32 : i32
    %131 = arith.muli %130, %arg0 : i32
    %132 = arith.addi %129, %131 : i32
    %133 = arith.addi %8, %132 : i32
    %c0_42 = arith.constant 0 : index
    %134 = arith.index_cast %132 : i32 to index
    %c0_43 = arith.constant 0 : index
    %c0_44 = arith.constant 0 : index
    %135 = vector.load %arg3[%c0_42, %134, %c0_43, %c0_44] : memref<1x8x8x512xbf16, #tpu.memory_space<vmem>>, vector<1x1x8x512xbf16>
    %136 = vector.shape_cast %135 : vector<1x1x8x512xbf16> to vector<8x512xbf16>
    %137 = arith.extf %136 : vector<8x512xbf16> to vector<8x512xf32>
    %138 = arith.truncf %119 : vector<8x128xf32> to vector<8x128xbf16>
    %cst_45 = arith.constant dense<0.000000e+00> : vector<8x512xf32>
    %139 = tpu.matmul %138, %10, %cst_45 {dimension_numbers = #tpu.dot_dimension_numbers<[1], [0], [0], [1], [0, 0, 1, 1], [], []>} : vector<8x128xbf16>, vector<128x512xbf16>, vector<8x512xf32> -> vector<8x512xf32>
    %140 = arith.addf %137, %139 : vector<8x512xf32>
    %141 = vector.extract_strided_slice %140 {offsets = [0, 0], sizes = [8, 128], strides = [1, 1]} : vector<8x512xf32> to vector<8x128xf32>
    %cst_46 = arith.constant 0.000000e+00 : f32
    %142 = vector.broadcast %cst_46 : f32 to vector<8x128xf32>
    %143 = arith.subf %142, %141 : vector<8x128xf32>
    %144 = math.exp %143 : vector<8x128xf32>
    %cst_47 = arith.constant 1.000000e+00 : f32
    %145 = vector.broadcast %cst_47 : f32 to vector<8x128xf32>
    %146 = arith.addf %145, %144 : vector<8x128xf32>
    %147 = tpu.reciprocal %146 {approx = true} : vector<8x128xf32> -> vector<8x128xf32>
    %148 = vector.extract_strided_slice %140 {offsets = [0, 128], sizes = [8, 128], strides = [1, 1]} : vector<8x512xf32> to vector<8x128xf32>
    %cst_48 = arith.constant 0.000000e+00 : f32
    %149 = vector.broadcast %cst_48 : f32 to vector<8x128xf32>
    %150 = arith.subf %149, %148 : vector<8x128xf32>
    %151 = math.exp %150 : vector<8x128xf32>
    %cst_49 = arith.constant 1.000000e+00 : f32
    %152 = vector.broadcast %cst_49 : f32 to vector<8x128xf32>
    %153 = arith.addf %152, %151 : vector<8x128xf32>
    %154 = tpu.reciprocal %153 {approx = true} : vector<8x128xf32> -> vector<8x128xf32>
    %155 = vector.extract_strided_slice %140 {offsets = [0, 256], sizes = [8, 128], strides = [1, 1]} : vector<8x512xf32> to vector<8x128xf32>
    %156 = math.tanh %155 : vector<8x128xf32>
    %157 = vector.extract_strided_slice %140 {offsets = [0, 384], sizes = [8, 128], strides = [1, 1]} : vector<8x512xf32> to vector<8x128xf32>
    %cst_50 = arith.constant 0.000000e+00 : f32
    %158 = vector.broadcast %cst_50 : f32 to vector<8x128xf32>
    %159 = arith.subf %158, %157 : vector<8x128xf32>
    %160 = math.exp %159 : vector<8x128xf32>
    %cst_51 = arith.constant 1.000000e+00 : f32
    %161 = vector.broadcast %cst_51 : f32 to vector<8x128xf32>
    %162 = arith.addf %161, %160 : vector<8x128xf32>
    %163 = tpu.reciprocal %162 {approx = true} : vector<8x128xf32> -> vector<8x128xf32>
    %164 = arith.mulf %154, %116 : vector<8x128xf32>
    %165 = arith.mulf %147, %156 : vector<8x128xf32>
    %166 = arith.addf %164, %165 : vector<8x128xf32>
    %167 = math.tanh %166 : vector<8x128xf32>
    %168 = arith.mulf %163, %167 : vector<8x128xf32>
    %169 = vector.broadcast %133 : i32 to vector<8x1xi32>
    %170 = arith.cmpi slt, %169, %11 : vector<8x1xi32>
    %171 = vector.shape_cast %170 : vector<8x1xi1> to vector<8x1xi1>
    %172 = vector.broadcast %171 : vector<8x1xi1> to vector<8x128xi1>
    %173 = arith.select %172, %166, %116 : vector<8x128xi1>, vector<8x128xf32>
    %174 = vector.shape_cast %170 : vector<8x1xi1> to vector<8x1xi1>
    %175 = vector.broadcast %174 : vector<8x1xi1> to vector<8x128xi1>
    %176 = arith.select %175, %168, %119 : vector<8x128xi1>, vector<8x128xf32>
    %cst_52 = arith.constant 0.000000e+00 : f32
    %177 = vector.shape_cast %170 : vector<8x1xi1> to vector<8x1xi1>
    %178 = vector.broadcast %177 : vector<8x1xi1> to vector<8x128xi1>
    %179 = vector.broadcast %cst_52 : f32 to vector<8x128xf32>
    %180 = arith.select %178, %176, %179 : vector<8x128xi1>, vector<8x128xf32>
    %181 = arith.index_cast %132 : i32 to index
    %c0_53 = arith.constant 0 : index
    %c0_54 = arith.constant 0 : index
    %182 = vector.load %arg5[%181, %c0_53, %c0_54] : memref<8x8x128xf32, #tpu.memory_space<vmem>>, vector<1x8x128xf32>
    %183 = vector.shape_cast %182 : vector<1x8x128xf32> to vector<8x128xf32>
    %184 = vector.shape_cast %180 : vector<8x128xf32> to vector<1x8x128xf32>
    tpu.vector_store %arg5[%181, %c0_53, %c0_54], %184 {strides = array<i32>} : memref<8x8x128xf32, #tpu.memory_space<vmem>>, vector<1x8x128xf32>,
    %c3_i32 = arith.constant 3 : i32
    %c1_i32_55 = arith.constant 1 : i32
    %185 = arith.subi %c1_i32_55, %arg0 : i32
    %186 = arith.muli %c3_i32, %185 : i32
    %c7_i32_56 = arith.constant 7 : i32
    %187 = arith.subi %c7_i32_56, %c3_i32 : i32
    %188 = arith.muli %187, %arg0 : i32
    %189 = arith.addi %186, %188 : i32
    %190 = arith.addi %8, %189 : i32
    %c0_57 = arith.constant 0 : index
    %191 = arith.index_cast %189 : i32 to index
    %c0_58 = arith.constant 0 : index
    %c0_59 = arith.constant 0 : index
    %192 = vector.load %arg3[%c0_57, %191, %c0_58, %c0_59] : memref<1x8x8x512xbf16, #tpu.memory_space<vmem>>, vector<1x1x8x512xbf16>
    %193 = vector.shape_cast %192 : vector<1x1x8x512xbf16> to vector<8x512xbf16>
    %194 = arith.extf %193 : vector<8x512xbf16> to vector<8x512xf32>
    %195 = arith.truncf %176 : vector<8x128xf32> to vector<8x128xbf16>
    %cst_60 = arith.constant dense<0.000000e+00> : vector<8x512xf32>
    %196 = tpu.matmul %195, %10, %cst_60 {dimension_numbers = #tpu.dot_dimension_numbers<[1], [0], [0], [1], [0, 0, 1, 1], [], []>} : vector<8x128xbf16>, vector<128x512xbf16>, vector<8x512xf32> -> vector<8x512xf32>
    %197 = arith.addf %194, %196 : vector<8x512xf32>
    %198 = vector.extract_strided_slice %197 {offsets = [0, 0], sizes = [8, 128], strides = [1, 1]} : vector<8x512xf32> to vector<8x128xf32>
    %cst_61 = arith.constant 0.000000e+00 : f32
    %199 = vector.broadcast %cst_61 : f32 to vector<8x128xf32>
    %200 = arith.subf %199, %198 : vector<8x128xf32>
    %201 = math.exp %200 : vector<8x128xf32>
    %cst_62 = arith.constant 1.000000e+00 : f32
    %202 = vector.broadcast %cst_62 : f32 to vector<8x128xf32>
    %203 = arith.addf %202, %201 : vector<8x128xf32>
    %204 = tpu.reciprocal %203 {approx = true} : vector<8x128xf32> -> vector<8x128xf32>
    %205 = vector.extract_strided_slice %197 {offsets = [0, 128], sizes = [8, 128], strides = [1, 1]} : vector<8x512xf32> to vector<8x128xf32>
    %cst_63 = arith.constant 0.000000e+00 : f32
    %206 = vector.broadcast %cst_63 : f32 to vector<8x128xf32>
    %207 = arith.subf %206, %205 : vector<8x128xf32>
    %208 = math.exp %207 : vector<8x128xf32>
    %cst_64 = arith.constant 1.000000e+00 : f32
    %209 = vector.broadcast %cst_64 : f32 to vector<8x128xf32>
    %210 = arith.addf %209, %208 : vector<8x128xf32>
    %211 = tpu.reciprocal %210 {approx = true} : vector<8x128xf32> -> vector<8x128xf32>
    %212 = vector.extract_strided_slice %197 {offsets = [0, 256], sizes = [8, 128], strides = [1, 1]} : vector<8x512xf32> to vector<8x128xf32>
    %213 = math.tanh %212 : vector<8x128xf32>
    %214 = vector.extract_strided_slice %197 {offsets = [0, 384], sizes = [8, 128], strides = [1, 1]} : vector<8x512xf32> to vector<8x128xf32>
    %cst_65 = arith.constant 0.000000e+00 : f32
    %215 = vector.broadcast %cst_65 : f32 to vector<8x128xf32>
    %216 = arith.subf %215, %214 : vector<8x128xf32>
    %217 = math.exp %216 : vector<8x128xf32>
    %cst_66 = arith.constant 1.000000e+00 : f32
    %218 = vector.broadcast %cst_66 : f32 to vector<8x128xf32>
    %219 = arith.addf %218, %217 : vector<8x128xf32>
    %220 = tpu.reciprocal %219 {approx = true} : vector<8x128xf32> -> vector<8x128xf32>
    %221 = arith.mulf %211, %173 : vector<8x128xf32>
    %222 = arith.mulf %204, %213 : vector<8x128xf32>
    %223 = arith.addf %221, %222 : vector<8x128xf32>
    %224 = math.tanh %223 : vector<8x128xf32>
    %225 = arith.mulf %220, %224 : vector<8x128xf32>
    %226 = vector.broadcast %190 : i32 to vector<8x1xi32>
    %227 = arith.cmpi slt, %226, %11 : vector<8x1xi32>
    %228 = vector.shape_cast %227 : vector<8x1xi1> to vector<8x1xi1>
    %229 = vector.broadcast %228 : vector<8x1xi1> to vector<8x128xi1>
    %230 = arith.select %229, %223, %173 : vector<8x128xi1>, vector<8x128xf32>
    %231 = vector.shape_cast %227 : vector<8x1xi1> to vector<8x1xi1>
    %232 = vector.broadcast %231 : vector<8x1xi1> to vector<8x128xi1>
    %233 = arith.select %232, %225, %176 : vector<8x128xi1>, vector<8x128xf32>
    %cst_67 = arith.constant 0.000000e+00 : f32
    %234 = vector.shape_cast %227 : vector<8x1xi1> to vector<8x1xi1>
    %235 = vector.broadcast %234 : vector<8x1xi1> to vector<8x128xi1>
    %236 = vector.broadcast %cst_67 : f32 to vector<8x128xf32>
    %237 = arith.select %235, %233, %236 : vector<8x128xi1>, vector<8x128xf32>
    %238 = arith.index_cast %189 : i32 to index
    %c0_68 = arith.constant 0 : index
    %c0_69 = arith.constant 0 : index
    %239 = vector.load %arg5[%238, %c0_68, %c0_69] : memref<8x8x128xf32, #tpu.memory_space<vmem>>, vector<1x8x128xf32>
    %240 = vector.shape_cast %239 : vector<1x8x128xf32> to vector<8x128xf32>
    %241 = vector.shape_cast %237 : vector<8x128xf32> to vector<1x8x128xf32>
    tpu.vector_store %arg5[%238, %c0_68, %c0_69], %241 {strides = array<i32>} : memref<8x8x128xf32, #tpu.memory_space<vmem>>, vector<1x8x128xf32>,
    %c4_i32 = arith.constant 4 : i32
    %c1_i32_70 = arith.constant 1 : i32
    %242 = arith.subi %c1_i32_70, %arg0 : i32
    %243 = arith.muli %c4_i32, %242 : i32
    %c7_i32_71 = arith.constant 7 : i32
    %244 = arith.subi %c7_i32_71, %c4_i32 : i32
    %245 = arith.muli %244, %arg0 : i32
    %246 = arith.addi %243, %245 : i32
    %247 = arith.addi %8, %246 : i32
    %c0_72 = arith.constant 0 : index
    %248 = arith.index_cast %246 : i32 to index
    %c0_73 = arith.constant 0 : index
    %c0_74 = arith.constant 0 : index
    %249 = vector.load %arg3[%c0_72, %248, %c0_73, %c0_74] : memref<1x8x8x512xbf16, #tpu.memory_space<vmem>>, vector<1x1x8x512xbf16>
    %250 = vector.shape_cast %249 : vector<1x1x8x512xbf16> to vector<8x512xbf16>
    %251 = arith.extf %250 : vector<8x512xbf16> to vector<8x512xf32>
    %252 = arith.truncf %233 : vector<8x128xf32> to vector<8x128xbf16>
    %cst_75 = arith.constant dense<0.000000e+00> : vector<8x512xf32>
    %253 = tpu.matmul %252, %10, %cst_75 {dimension_numbers = #tpu.dot_dimension_numbers<[1], [0], [0], [1], [0, 0, 1, 1], [], []>} : vector<8x128xbf16>, vector<128x512xbf16>, vector<8x512xf32> -> vector<8x512xf32>
    %254 = arith.addf %251, %253 : vector<8x512xf32>
    %255 = vector.extract_strided_slice %254 {offsets = [0, 0], sizes = [8, 128], strides = [1, 1]} : vector<8x512xf32> to vector<8x128xf32>
    %cst_76 = arith.constant 0.000000e+00 : f32
    %256 = vector.broadcast %cst_76 : f32 to vector<8x128xf32>
    %257 = arith.subf %256, %255 : vector<8x128xf32>
    %258 = math.exp %257 : vector<8x128xf32>
    %cst_77 = arith.constant 1.000000e+00 : f32
    %259 = vector.broadcast %cst_77 : f32 to vector<8x128xf32>
    %260 = arith.addf %259, %258 : vector<8x128xf32>
    %261 = tpu.reciprocal %260 {approx = true} : vector<8x128xf32> -> vector<8x128xf32>
    %262 = vector.extract_strided_slice %254 {offsets = [0, 128], sizes = [8, 128], strides = [1, 1]} : vector<8x512xf32> to vector<8x128xf32>
    %cst_78 = arith.constant 0.000000e+00 : f32
    %263 = vector.broadcast %cst_78 : f32 to vector<8x128xf32>
    %264 = arith.subf %263, %262 : vector<8x128xf32>
    %265 = math.exp %264 : vector<8x128xf32>
    %cst_79 = arith.constant 1.000000e+00 : f32
    %266 = vector.broadcast %cst_79 : f32 to vector<8x128xf32>
    %267 = arith.addf %266, %265 : vector<8x128xf32>
    %268 = tpu.reciprocal %267 {approx = true} : vector<8x128xf32> -> vector<8x128xf32>
    %269 = vector.extract_strided_slice %254 {offsets = [0, 256], sizes = [8, 128], strides = [1, 1]} : vector<8x512xf32> to vector<8x128xf32>
    %270 = math.tanh %269 : vector<8x128xf32>
    %271 = vector.extract_strided_slice %254 {offsets = [0, 384], sizes = [8, 128], strides = [1, 1]} : vector<8x512xf32> to vector<8x128xf32>
    %cst_80 = arith.constant 0.000000e+00 : f32
    %272 = vector.broadcast %cst_80 : f32 to vector<8x128xf32>
    %273 = arith.subf %272, %271 : vector<8x128xf32>
    %274 = math.exp %273 : vector<8x128xf32>
    %cst_81 = arith.constant 1.000000e+00 : f32
    %275 = vector.broadcast %cst_81 : f32 to vector<8x128xf32>
    %276 = arith.addf %275, %274 : vector<8x128xf32>
    %277 = tpu.reciprocal %276 {approx = true} : vector<8x128xf32> -> vector<8x128xf32>
    %278 = arith.mulf %268, %230 : vector<8x128xf32>
    %279 = arith.mulf %261, %270 : vector<8x128xf32>
    %280 = arith.addf %278, %279 : vector<8x128xf32>
    %281 = math.tanh %280 : vector<8x128xf32>
    %282 = arith.mulf %277, %281 : vector<8x128xf32>
    %283 = vector.broadcast %247 : i32 to vector<8x1xi32>
    %284 = arith.cmpi slt, %283, %11 : vector<8x1xi32>
    %285 = vector.shape_cast %284 : vector<8x1xi1> to vector<8x1xi1>
    %286 = vector.broadcast %285 : vector<8x1xi1> to vector<8x128xi1>
    %287 = arith.select %286, %280, %230 : vector<8x128xi1>, vector<8x128xf32>
    %288 = vector.shape_cast %284 : vector<8x1xi1> to vector<8x1xi1>
    %289 = vector.broadcast %288 : vector<8x1xi1> to vector<8x128xi1>
    %290 = arith.select %289, %282, %233 : vector<8x128xi1>, vector<8x128xf32>
    %cst_82 = arith.constant 0.000000e+00 : f32
    %291 = vector.shape_cast %284 : vector<8x1xi1> to vector<8x1xi1>
    %292 = vector.broadcast %291 : vector<8x1xi1> to vector<8x128xi1>
    %293 = vector.broadcast %cst_82 : f32 to vector<8x128xf32>
    %294 = arith.select %292, %290, %293 : vector<8x128xi1>, vector<8x128xf32>
    %295 = arith.index_cast %246 : i32 to index
    %c0_83 = arith.constant 0 : index
    %c0_84 = arith.constant 0 : index
    %296 = vector.load %arg5[%295, %c0_83, %c0_84] : memref<8x8x128xf32, #tpu.memory_space<vmem>>, vector<1x8x128xf32>
    %297 = vector.shape_cast %296 : vector<1x8x128xf32> to vector<8x128xf32>
    %298 = vector.shape_cast %294 : vector<8x128xf32> to vector<1x8x128xf32>
    tpu.vector_store %arg5[%295, %c0_83, %c0_84], %298 {strides = array<i32>} : memref<8x8x128xf32, #tpu.memory_space<vmem>>, vector<1x8x128xf32>,
    %c5_i32 = arith.constant 5 : i32
    %c1_i32_85 = arith.constant 1 : i32
    %299 = arith.subi %c1_i32_85, %arg0 : i32
    %300 = arith.muli %c5_i32, %299 : i32
    %c7_i32_86 = arith.constant 7 : i32
    %301 = arith.subi %c7_i32_86, %c5_i32 : i32
    %302 = arith.muli %301, %arg0 : i32
    %303 = arith.addi %300, %302 : i32
    %304 = arith.addi %8, %303 : i32
    %c0_87 = arith.constant 0 : index
    %305 = arith.index_cast %303 : i32 to index
    %c0_88 = arith.constant 0 : index
    %c0_89 = arith.constant 0 : index
    %306 = vector.load %arg3[%c0_87, %305, %c0_88, %c0_89] : memref<1x8x8x512xbf16, #tpu.memory_space<vmem>>, vector<1x1x8x512xbf16>
    %307 = vector.shape_cast %306 : vector<1x1x8x512xbf16> to vector<8x512xbf16>
    %308 = arith.extf %307 : vector<8x512xbf16> to vector<8x512xf32>
    %309 = arith.truncf %290 : vector<8x128xf32> to vector<8x128xbf16>
    %cst_90 = arith.constant dense<0.000000e+00> : vector<8x512xf32>
    %310 = tpu.matmul %309, %10, %cst_90 {dimension_numbers = #tpu.dot_dimension_numbers<[1], [0], [0], [1], [0, 0, 1, 1], [], []>} : vector<8x128xbf16>, vector<128x512xbf16>, vector<8x512xf32> -> vector<8x512xf32>
    %311 = arith.addf %308, %310 : vector<8x512xf32>
    %312 = vector.extract_strided_slice %311 {offsets = [0, 0], sizes = [8, 128], strides = [1, 1]} : vector<8x512xf32> to vector<8x128xf32>
    %cst_91 = arith.constant 0.000000e+00 : f32
    %313 = vector.broadcast %cst_91 : f32 to vector<8x128xf32>
    %314 = arith.subf %313, %312 : vector<8x128xf32>
    %315 = math.exp %314 : vector<8x128xf32>
    %cst_92 = arith.constant 1.000000e+00 : f32
    %316 = vector.broadcast %cst_92 : f32 to vector<8x128xf32>
    %317 = arith.addf %316, %315 : vector<8x128xf32>
    %318 = tpu.reciprocal %317 {approx = true} : vector<8x128xf32> -> vector<8x128xf32>
    %319 = vector.extract_strided_slice %311 {offsets = [0, 128], sizes = [8, 128], strides = [1, 1]} : vector<8x512xf32> to vector<8x128xf32>
    %cst_93 = arith.constant 0.000000e+00 : f32
    %320 = vector.broadcast %cst_93 : f32 to vector<8x128xf32>
    %321 = arith.subf %320, %319 : vector<8x128xf32>
    %322 = math.exp %321 : vector<8x128xf32>
    %cst_94 = arith.constant 1.000000e+00 : f32
    %323 = vector.broadcast %cst_94 : f32 to vector<8x128xf32>
    %324 = arith.addf %323, %322 : vector<8x128xf32>
    %325 = tpu.reciprocal %324 {approx = true} : vector<8x128xf32> -> vector<8x128xf32>
    %326 = vector.extract_strided_slice %311 {offsets = [0, 256], sizes = [8, 128], strides = [1, 1]} : vector<8x512xf32> to vector<8x128xf32>
    %327 = math.tanh %326 : vector<8x128xf32>
    %328 = vector.extract_strided_slice %311 {offsets = [0, 384], sizes = [8, 128], strides = [1, 1]} : vector<8x512xf32> to vector<8x128xf32>
    %cst_95 = arith.constant 0.000000e+00 : f32
    %329 = vector.broadcast %cst_95 : f32 to vector<8x128xf32>
    %330 = arith.subf %329, %328 : vector<8x128xf32>
    %331 = math.exp %330 : vector<8x128xf32>
    %cst_96 = arith.constant 1.000000e+00 : f32
    %332 = vector.broadcast %cst_96 : f32 to vector<8x128xf32>
    %333 = arith.addf %332, %331 : vector<8x128xf32>
    %334 = tpu.reciprocal %333 {approx = true} : vector<8x128xf32> -> vector<8x128xf32>
    %335 = arith.mulf %325, %287 : vector<8x128xf32>
    %336 = arith.mulf %318, %327 : vector<8x128xf32>
    %337 = arith.addf %335, %336 : vector<8x128xf32>
    %338 = math.tanh %337 : vector<8x128xf32>
    %339 = arith.mulf %334, %338 : vector<8x128xf32>
    %340 = vector.broadcast %304 : i32 to vector<8x1xi32>
    %341 = arith.cmpi slt, %340, %11 : vector<8x1xi32>
    %342 = vector.shape_cast %341 : vector<8x1xi1> to vector<8x1xi1>
    %343 = vector.broadcast %342 : vector<8x1xi1> to vector<8x128xi1>
    %344 = arith.select %343, %337, %287 : vector<8x128xi1>, vector<8x128xf32>
    %345 = vector.shape_cast %341 : vector<8x1xi1> to vector<8x1xi1>
    %346 = vector.broadcast %345 : vector<8x1xi1> to vector<8x128xi1>
    %347 = arith.select %346, %339, %290 : vector<8x128xi1>, vector<8x128xf32>
    %cst_97 = arith.constant 0.000000e+00 : f32
    %348 = vector.shape_cast %341 : vector<8x1xi1> to vector<8x1xi1>
    %349 = vector.broadcast %348 : vector<8x1xi1> to vector<8x128xi1>
    %350 = vector.broadcast %cst_97 : f32 to vector<8x128xf32>
    %351 = arith.select %349, %347, %350 : vector<8x128xi1>, vector<8x128xf32>
    %352 = arith.index_cast %303 : i32 to index
    %c0_98 = arith.constant 0 : index
    %c0_99 = arith.constant 0 : index
    %353 = vector.load %arg5[%352, %c0_98, %c0_99] : memref<8x8x128xf32, #tpu.memory_space<vmem>>, vector<1x8x128xf32>
    %354 = vector.shape_cast %353 : vector<1x8x128xf32> to vector<8x128xf32>
    %355 = vector.shape_cast %351 : vector<8x128xf32> to vector<1x8x128xf32>
    tpu.vector_store %arg5[%352, %c0_98, %c0_99], %355 {strides = array<i32>} : memref<8x8x128xf32, #tpu.memory_space<vmem>>, vector<1x8x128xf32>,
    %c6_i32 = arith.constant 6 : i32
    %c1_i32_100 = arith.constant 1 : i32
    %356 = arith.subi %c1_i32_100, %arg0 : i32
    %357 = arith.muli %c6_i32, %356 : i32
    %c7_i32_101 = arith.constant 7 : i32
    %358 = arith.subi %c7_i32_101, %c6_i32 : i32
    %359 = arith.muli %358, %arg0 : i32
    %360 = arith.addi %357, %359 : i32
    %361 = arith.addi %8, %360 : i32
    %c0_102 = arith.constant 0 : index
    %362 = arith.index_cast %360 : i32 to index
    %c0_103 = arith.constant 0 : index
    %c0_104 = arith.constant 0 : index
    %363 = vector.load %arg3[%c0_102, %362, %c0_103, %c0_104] : memref<1x8x8x512xbf16, #tpu.memory_space<vmem>>, vector<1x1x8x512xbf16>
    %364 = vector.shape_cast %363 : vector<1x1x8x512xbf16> to vector<8x512xbf16>
    %365 = arith.extf %364 : vector<8x512xbf16> to vector<8x512xf32>
    %366 = arith.truncf %347 : vector<8x128xf32> to vector<8x128xbf16>
    %cst_105 = arith.constant dense<0.000000e+00> : vector<8x512xf32>
    %367 = tpu.matmul %366, %10, %cst_105 {dimension_numbers = #tpu.dot_dimension_numbers<[1], [0], [0], [1], [0, 0, 1, 1], [], []>} : vector<8x128xbf16>, vector<128x512xbf16>, vector<8x512xf32> -> vector<8x512xf32>
    %368 = arith.addf %365, %367 : vector<8x512xf32>
    %369 = vector.extract_strided_slice %368 {offsets = [0, 0], sizes = [8, 128], strides = [1, 1]} : vector<8x512xf32> to vector<8x128xf32>
    %cst_106 = arith.constant 0.000000e+00 : f32
    %370 = vector.broadcast %cst_106 : f32 to vector<8x128xf32>
    %371 = arith.subf %370, %369 : vector<8x128xf32>
    %372 = math.exp %371 : vector<8x128xf32>
    %cst_107 = arith.constant 1.000000e+00 : f32
    %373 = vector.broadcast %cst_107 : f32 to vector<8x128xf32>
    %374 = arith.addf %373, %372 : vector<8x128xf32>
    %375 = tpu.reciprocal %374 {approx = true} : vector<8x128xf32> -> vector<8x128xf32>
    %376 = vector.extract_strided_slice %368 {offsets = [0, 128], sizes = [8, 128], strides = [1, 1]} : vector<8x512xf32> to vector<8x128xf32>
    %cst_108 = arith.constant 0.000000e+00 : f32
    %377 = vector.broadcast %cst_108 : f32 to vector<8x128xf32>
    %378 = arith.subf %377, %376 : vector<8x128xf32>
    %379 = math.exp %378 : vector<8x128xf32>
    %cst_109 = arith.constant 1.000000e+00 : f32
    %380 = vector.broadcast %cst_109 : f32 to vector<8x128xf32>
    %381 = arith.addf %380, %379 : vector<8x128xf32>
    %382 = tpu.reciprocal %381 {approx = true} : vector<8x128xf32> -> vector<8x128xf32>
    %383 = vector.extract_strided_slice %368 {offsets = [0, 256], sizes = [8, 128], strides = [1, 1]} : vector<8x512xf32> to vector<8x128xf32>
    %384 = math.tanh %383 : vector<8x128xf32>
    %385 = vector.extract_strided_slice %368 {offsets = [0, 384], sizes = [8, 128], strides = [1, 1]} : vector<8x512xf32> to vector<8x128xf32>
    %cst_110 = arith.constant 0.000000e+00 : f32
    %386 = vector.broadcast %cst_110 : f32 to vector<8x128xf32>
    %387 = arith.subf %386, %385 : vector<8x128xf32>
    %388 = math.exp %387 : vector<8x128xf32>
    %cst_111 = arith.constant 1.000000e+00 : f32
    %389 = vector.broadcast %cst_111 : f32 to vector<8x128xf32>
    %390 = arith.addf %389, %388 : vector<8x128xf32>
    %391 = tpu.reciprocal %390 {approx = true} : vector<8x128xf32> -> vector<8x128xf32>
    %392 = arith.mulf %382, %344 : vector<8x128xf32>
    %393 = arith.mulf %375, %384 : vector<8x128xf32>
    %394 = arith.addf %392, %393 : vector<8x128xf32>
    %395 = math.tanh %394 : vector<8x128xf32>
    %396 = arith.mulf %391, %395 : vector<8x128xf32>
    %397 = vector.broadcast %361 : i32 to vector<8x1xi32>
    %398 = arith.cmpi slt, %397, %11 : vector<8x1xi32>
    %399 = vector.shape_cast %398 : vector<8x1xi1> to vector<8x1xi1>
    %400 = vector.broadcast %399 : vector<8x1xi1> to vector<8x128xi1>
    %401 = arith.select %400, %394, %344 : vector<8x128xi1>, vector<8x128xf32>
    %402 = vector.shape_cast %398 : vector<8x1xi1> to vector<8x1xi1>
    %403 = vector.broadcast %402 : vector<8x1xi1> to vector<8x128xi1>
    %404 = arith.select %403, %396, %347 : vector<8x128xi1>, vector<8x128xf32>
    %cst_112 = arith.constant 0.000000e+00 : f32
    %405 = vector.shape_cast %398 : vector<8x1xi1> to vector<8x1xi1>
    %406 = vector.broadcast %405 : vector<8x1xi1> to vector<8x128xi1>
    %407 = vector.broadcast %cst_112 : f32 to vector<8x128xf32>
    %408 = arith.select %406, %404, %407 : vector<8x128xi1>, vector<8x128xf32>
    %409 = arith.index_cast %360 : i32 to index
    %c0_113 = arith.constant 0 : index
    %c0_114 = arith.constant 0 : index
    %410 = vector.load %arg5[%409, %c0_113, %c0_114] : memref<8x8x128xf32, #tpu.memory_space<vmem>>, vector<1x8x128xf32>
    %411 = vector.shape_cast %410 : vector<1x8x128xf32> to vector<8x128xf32>
    %412 = vector.shape_cast %408 : vector<8x128xf32> to vector<1x8x128xf32>
    tpu.vector_store %arg5[%409, %c0_113, %c0_114], %412 {strides = array<i32>} : memref<8x8x128xf32, #tpu.memory_space<vmem>>, vector<1x8x128xf32>,
    %c7_i32_115 = arith.constant 7 : i32
    %c1_i32_116 = arith.constant 1 : i32
    %413 = arith.subi %c1_i32_116, %arg0 : i32
    %414 = arith.muli %c7_i32_115, %413 : i32
    %c7_i32_117 = arith.constant 7 : i32
    %415 = arith.subi %c7_i32_117, %c7_i32_115 : i32
    %416 = arith.muli %415, %arg0 : i32
    %417 = arith.addi %414, %416 : i32
    %418 = arith.addi %8, %417 : i32
    %c0_118 = arith.constant 0 : index
    %419 = arith.index_cast %417 : i32 to index
    %c0_119 = arith.constant 0 : index
    %c0_120 = arith.constant 0 : index
    %420 = vector.load %arg3[%c0_118, %419, %c0_119, %c0_120] : memref<1x8x8x512xbf16, #tpu.memory_space<vmem>>, vector<1x1x8x512xbf16>
    %421 = vector.shape_cast %420 : vector<1x1x8x512xbf16> to vector<8x512xbf16>
    %422 = arith.extf %421 : vector<8x512xbf16> to vector<8x512xf32>
    %423 = arith.truncf %404 : vector<8x128xf32> to vector<8x128xbf16>
    %cst_121 = arith.constant dense<0.000000e+00> : vector<8x512xf32>
    %424 = tpu.matmul %423, %10, %cst_121 {dimension_numbers = #tpu.dot_dimension_numbers<[1], [0], [0], [1], [0, 0, 1, 1], [], []>} : vector<8x128xbf16>, vector<128x512xbf16>, vector<8x512xf32> -> vector<8x512xf32>
    %425 = arith.addf %422, %424 : vector<8x512xf32>
    %426 = vector.extract_strided_slice %425 {offsets = [0, 0], sizes = [8, 128], strides = [1, 1]} : vector<8x512xf32> to vector<8x128xf32>
    %cst_122 = arith.constant 0.000000e+00 : f32
    %427 = vector.broadcast %cst_122 : f32 to vector<8x128xf32>
    %428 = arith.subf %427, %426 : vector<8x128xf32>
    %429 = math.exp %428 : vector<8x128xf32>
    %cst_123 = arith.constant 1.000000e+00 : f32
    %430 = vector.broadcast %cst_123 : f32 to vector<8x128xf32>
    %431 = arith.addf %430, %429 : vector<8x128xf32>
    %432 = tpu.reciprocal %431 {approx = true} : vector<8x128xf32> -> vector<8x128xf32>
    %433 = vector.extract_strided_slice %425 {offsets = [0, 128], sizes = [8, 128], strides = [1, 1]} : vector<8x512xf32> to vector<8x128xf32>
    %cst_124 = arith.constant 0.000000e+00 : f32
    %434 = vector.broadcast %cst_124 : f32 to vector<8x128xf32>
    %435 = arith.subf %434, %433 : vector<8x128xf32>
    %436 = math.exp %435 : vector<8x128xf32>
    %cst_125 = arith.constant 1.000000e+00 : f32
    %437 = vector.broadcast %cst_125 : f32 to vector<8x128xf32>
    %438 = arith.addf %437, %436 : vector<8x128xf32>
    %439 = tpu.reciprocal %438 {approx = true} : vector<8x128xf32> -> vector<8x128xf32>
    %440 = vector.extract_strided_slice %425 {offsets = [0, 256], sizes = [8, 128], strides = [1, 1]} : vector<8x512xf32> to vector<8x128xf32>
    %441 = math.tanh %440 : vector<8x128xf32>
    %442 = vector.extract_strided_slice %425 {offsets = [0, 384], sizes = [8, 128], strides = [1, 1]} : vector<8x512xf32> to vector<8x128xf32>
    %cst_126 = arith.constant 0.000000e+00 : f32
    %443 = vector.broadcast %cst_126 : f32 to vector<8x128xf32>
    %444 = arith.subf %443, %442 : vector<8x128xf32>
    %445 = math.exp %444 : vector<8x128xf32>
    %cst_127 = arith.constant 1.000000e+00 : f32
    %446 = vector.broadcast %cst_127 : f32 to vector<8x128xf32>
    %447 = arith.addf %446, %445 : vector<8x128xf32>
    %448 = tpu.reciprocal %447 {approx = true} : vector<8x128xf32> -> vector<8x128xf32>
    %449 = arith.mulf %439, %401 : vector<8x128xf32>
    %450 = arith.mulf %432, %441 : vector<8x128xf32>
    %451 = arith.addf %449, %450 : vector<8x128xf32>
    %452 = math.tanh %451 : vector<8x128xf32>
    %453 = arith.mulf %448, %452 : vector<8x128xf32>
    %454 = vector.broadcast %418 : i32 to vector<8x1xi32>
    %455 = arith.cmpi slt, %454, %11 : vector<8x1xi32>
    %456 = vector.shape_cast %455 : vector<8x1xi1> to vector<8x1xi1>
    %457 = vector.broadcast %456 : vector<8x1xi1> to vector<8x128xi1>
    %458 = arith.select %457, %451, %401 : vector<8x128xi1>, vector<8x128xf32>
    %459 = vector.shape_cast %455 : vector<8x1xi1> to vector<8x1xi1>
    %460 = vector.broadcast %459 : vector<8x1xi1> to vector<8x128xi1>
    %461 = arith.select %460, %453, %404 : vector<8x128xi1>, vector<8x128xf32>
    %cst_128 = arith.constant 0.000000e+00 : f32
    %462 = vector.shape_cast %455 : vector<8x1xi1> to vector<8x1xi1>
    %463 = vector.broadcast %462 : vector<8x1xi1> to vector<8x128xi1>
    %464 = vector.broadcast %cst_128 : f32 to vector<8x128xf32>
    %465 = arith.select %463, %461, %464 : vector<8x128xi1>, vector<8x128xf32>
    %466 = arith.index_cast %417 : i32 to index
    %c0_129 = arith.constant 0 : index
    %c0_130 = arith.constant 0 : index
    %467 = vector.load %arg5[%466, %c0_129, %c0_130] : memref<8x8x128xf32, #tpu.memory_space<vmem>>, vector<1x8x128xf32>
    %468 = vector.shape_cast %467 : vector<1x8x128xf32> to vector<8x128xf32>
    %469 = vector.shape_cast %465 : vector<8x128xf32> to vector<1x8x128xf32>
    tpu.vector_store %arg5[%466, %c0_129, %c0_130], %469 {strides = array<i32>} : memref<8x8x128xf32, #tpu.memory_space<vmem>>, vector<1x8x128xf32>,
    %c8_i32_131 = arith.constant 8 : i32
    %c0_132 = arith.constant 0 : index
    %c0_133 = arith.constant 0 : index
    %470 = vector.load %arg6[%c0_132, %c0_133] : memref<8x128xf32, #tpu.memory_space<vmem>>, vector<8x128xf32>
    tpu.vector_store %arg6[%c0_132, %c0_133], %461 {strides = array<i32>} : memref<8x128xf32, #tpu.memory_space<vmem>>, vector<8x128xf32>,
    %c0_134 = arith.constant 0 : index
    %c0_135 = arith.constant 0 : index
    %471 = vector.load %arg7[%c0_134, %c0_135] : memref<8x128xf32, #tpu.memory_space<vmem>>, vector<8x128xf32>
    tpu.vector_store %arg7[%c0_134, %c0_135], %458 {strides = array<i32>} : memref<8x128xf32, #tpu.memory_space<vmem>>, vector<8x128xf32>,
    return
  }
  func.func @transform_0(%arg0: i32, %arg1: i32) -> (i32, i32) {
    %c0_i32 = arith.constant 0 : i32
    %c0_i32_0 = arith.constant 0 : i32
    %c0_i32_1 = arith.constant 0 : i32
    return %c0_i32, %c0_i32_0 : i32, i32
  }
  func.func @transform_1(%arg0: i32, %arg1: i32) -> (i32, i32, i32, i32) {
    %c1_i32 = arith.constant 1 : i32
    %0 = arith.subi %c1_i32, %arg0 : i32
    %1 = arith.muli %arg1, %0 : i32
    %c0_i32 = arith.constant 0 : i32
    %2 = arith.subi %c0_i32, %arg1 : i32
    %3 = arith.muli %2, %arg0 : i32
    %4 = arith.addi %1, %3 : i32
    %c0_i32_0 = arith.constant 0 : i32
    %c0_i32_1 = arith.constant 0 : i32
    %c0_i32_2 = arith.constant 0 : i32
    return %arg0, %4, %c0_i32_0, %c0_i32_1 : i32, i32, i32, i32
  }
  func.func @transform_2(%arg0: i32, %arg1: i32) -> (i32, i32, i32) {
    %c0_i32 = arith.constant 0 : i32
    %c0_i32_0 = arith.constant 0 : i32
    %c0_i32_1 = arith.constant 0 : i32
    return %arg0, %c0_i32, %c0_i32_0 : i32, i32, i32
  }
  func.func @transform_3(%arg0: i32, %arg1: i32) -> (i32, i32, i32) {
    %c1_i32 = arith.constant 1 : i32
    %0 = arith.subi %c1_i32, %arg0 : i32
    %1 = arith.muli %arg1, %0 : i32
    %c0_i32 = arith.constant 0 : i32
    %2 = arith.subi %c0_i32, %arg1 : i32
    %3 = arith.muli %2, %arg0 : i32
    %4 = arith.addi %1, %3 : i32
    %c0_i32_0 = arith.constant 0 : i32
    %c0_i32_1 = arith.constant 0 : i32
    return %4, %c0_i32_0, %arg0 : i32, i32, i32
  }
}

module attributes {stable_mosaic.version = 11 : i64} {
  func.func @_blstm_block_kernel(%arg0: i32, %arg1: i32, %arg2: memref<8x1xi32, #tpu.memory_space<vmem>>, %arg3: memref<1x8x8x512xbf16, #tpu.memory_space<vmem>>, %arg4: memref<1x128x512xbf16, #tpu.memory_space<vmem>>, %arg5: memref<8x8x128xf32, #tpu.memory_space<vmem>>, %arg6: memref<8x128xf32, #tpu.memory_space<vmem>>, %arg7: memref<8x128xf32, #tpu.memory_space<vmem>>) attributes {dimension_semantics = [#tpu.dimension_semantics<parallel>, #tpu.dimension_semantics<arbitrary>], iteration_bounds = array<i64: 2, 1>, scalar_prefetch = 0 : i64, scratch_operands = 2 : i64, tpu.core_type = #tpu.core_type<tc>, window_params = [{pipeline_mode = #tpu.pipeline_mode<synchronous>, transform_indices = @transform_0, window_bounds = array<i64: 8, 1>}, {transform_indices = @transform_1, window_bounds = array<i64: 1, 8, 8, 512>}, {transform_indices = @transform_2, window_bounds = array<i64: 1, 128, 512>}, {transform_indices = @transform_3, window_bounds = array<i64: 8, 8, 128>}]} {
    %c0_i32 = arith.constant 0 : i32
    %0 = arith.cmpi eq, %arg1, %c0_i32 : i32
    %1 = arith.extui %0 : i1 to i32
    %c0_i32_0 = arith.constant 0 : i32
    %2 = arith.cmpi ne, %1, %c0_i32_0 : i32
    scf.if %2 {
      %cst_136 = arith.constant 0.000000e+00 : f32
      %472 = vector.broadcast %cst_136 : f32 to vector<8x128xf32>
      %c0_137 = arith.constant 0 : index
      %c0_138 = arith.constant 0 : index
      %473 = vector.load %arg6[%c0_137, %c0_138] : memref<8x128xf32, #tpu.memory_space<vmem>>, vector<8x128xf32>
      tpu.vector_store %arg6[%c0_137, %c0_138], %472 {strides = array<i32>} : memref<8x128xf32, #tpu.memory_space<vmem>>, vector<8x128xf32>,
      %cst_139 = arith.constant 0.000000e+00 : f32
      %474 = vector.broadcast %cst_139 : f32 to vector<8x128xf32>
      %c0_140 = arith.constant 0 : index
      %c0_141 = arith.constant 0 : index
      %475 = vector.load %arg7[%c0_140, %c0_141] : memref<8x128xf32, #tpu.memory_space<vmem>>, vector<8x128xf32>
      tpu.vector_store %arg7[%c0_140, %c0_141], %474 {strides = array<i32>} : memref<8x128xf32, #tpu.memory_space<vmem>>, vector<8x128xf32>,
    } else {
    }
    %c1_i32 = arith.constant 1 : i32
    %3 = arith.subi %c1_i32, %arg0 : i32
    %4 = arith.muli %arg1, %3 : i32
    %c0_i32_1 = arith.constant 0 : i32
    %5 = arith.subi %c0_i32_1, %arg1 : i32
    %6 = arith.muli %5, %arg0 : i32
    %7 = arith.addi %4, %6 : i32
    %c8_i32 = arith.constant 8 : i32
    %8 = arith.muli %7, %c8_i32 : i32
    %c0 = arith.constant 0 : index
    %c0_2 = arith.constant 0 : index
    %c0_3 = arith.constant 0 : index
    %9 = vector.load %arg4[%c0, %c0_2, %c0_3] : memref<1x128x512xbf16, #tpu.memory_space<vmem>>, vector<1x128x512xbf16>
    %10 = vector.shape_cast %9 : vector<1x128x512xbf16> to vector<128x512xbf16>
    %c0_4 = arith.constant 0 : index
    %c0_5 = arith.constant 0 : index
    %11 = vector.load %arg2[%c0_4, %c0_5] : memref<8x1xi32, #tpu.memory_space<vmem>>, vector<8x1xi32>
    %c0_6 = arith.constant 0 : index
    %c0_7 = arith.constant 0 : index
    %12 = vector.load %arg6[%c0_6, %c0_7] : memref<8x128xf32, #tpu.memory_space<vmem>>, vector<8x128xf32>
    %c0_8 = arith.constant 0 : index
    %c0_9 = arith.constant 0 : index
    %13 = vector.load %arg7[%c0_8, %c0_9] : memref<8x128xf32, #tpu.memory_space<vmem>>, vector<8x128xf32>
    %c0_i32_10 = arith.constant 0 : i32
    %c1_i32_11 = arith.constant 1 : i32
    %14 = arith.subi %c1_i32_11, %arg0 : i32
    %15 = arith.muli %c0_i32_10, %14 : i32
    %c7_i32 = arith.constant 7 : i32
    %16 = arith.subi %c7_i32, %c0_i32_10 : i32
    %17 = arith.muli %16, %arg0 : i32
    %18 = arith.addi %15, %17 : i32
    %19 = arith.addi %8, %18 : i32
    %c0_12 = arith.constant 0 : index
    %20 = arith.index_cast %18 : i32 to index
    %c0_13 = arith.constant 0 : index
    %c0_14 = arith.constant 0 : index
    %21 = vector.load %arg3[%c0_12, %20, %c0_13, %c0_14] : memref<1x8x8x512xbf16, #tpu.memory_space<vmem>>, vector<1x1x8x512xbf16>
    %22 = vector.shape_cast %21 : vector<1x1x8x512xbf16> to vector<8x512xbf16>
    %23 = arith.extf %22 : vector<8x512xbf16> to vector<8x512xf32>
    %24 = arith.truncf %12 : vector<8x128xf32> to vector<8x128xbf16>
    %cst = arith.constant dense<0.000000e+00> : vector<8x512xf32>
    %25 = tpu.matmul %24, %10, %cst {dimension_numbers = #tpu.dot_dimension_numbers<[1], [0], [0], [1], [0, 0, 1, 1], [], []>} : vector<8x128xbf16>, vector<128x512xbf16>, vector<8x512xf32> -> vector<8x512xf32>
    %26 = arith.addf %23, %25 : vector<8x512xf32>
    %27 = vector.extract_strided_slice %26 {offsets = [0, 0], sizes = [8, 128], strides = [1, 1]} : vector<8x512xf32> to vector<8x128xf32>
    %cst_15 = arith.constant 0.000000e+00 : f32
    %28 = vector.broadcast %cst_15 : f32 to vector<8x128xf32>
    %29 = arith.subf %28, %27 : vector<8x128xf32>
    %30 = math.exp %29 : vector<8x128xf32>
    %cst_16 = arith.constant 1.000000e+00 : f32
    %31 = vector.broadcast %cst_16 : f32 to vector<8x128xf32>
    %32 = arith.addf %31, %30 : vector<8x128xf32>
    %33 = tpu.reciprocal %32 {approx = true} : vector<8x128xf32> -> vector<8x128xf32>
    %34 = vector.extract_strided_slice %26 {offsets = [0, 128], sizes = [8, 128], strides = [1, 1]} : vector<8x512xf32> to vector<8x128xf32>
    %cst_17 = arith.constant 0.000000e+00 : f32
    %35 = vector.broadcast %cst_17 : f32 to vector<8x128xf32>
    %36 = arith.subf %35, %34 : vector<8x128xf32>
    %37 = math.exp %36 : vector<8x128xf32>
    %cst_18 = arith.constant 1.000000e+00 : f32
    %38 = vector.broadcast %cst_18 : f32 to vector<8x128xf32>
    %39 = arith.addf %38, %37 : vector<8x128xf32>
    %40 = tpu.reciprocal %39 {approx = true} : vector<8x128xf32> -> vector<8x128xf32>
    %41 = vector.extract_strided_slice %26 {offsets = [0, 256], sizes = [8, 128], strides = [1, 1]} : vector<8x512xf32> to vector<8x128xf32>
    %42 = math.tanh %41 : vector<8x128xf32>
    %43 = vector.extract_strided_slice %26 {offsets = [0, 384], sizes = [8, 128], strides = [1, 1]} : vector<8x512xf32> to vector<8x128xf32>
    %cst_19 = arith.constant 0.000000e+00 : f32
    %44 = vector.broadcast %cst_19 : f32 to vector<8x128xf32>
    %45 = arith.subf %44, %43 : vector<8x128xf32>
    %46 = math.exp %45 : vector<8x128xf32>
    %cst_20 = arith.constant 1.000000e+00 : f32
    %47 = vector.broadcast %cst_20 : f32 to vector<8x128xf32>
    %48 = arith.addf %47, %46 : vector<8x128xf32>
    %49 = tpu.reciprocal %48 {approx = true} : vector<8x128xf32> -> vector<8x128xf32>
    %50 = arith.mulf %40, %13 : vector<8x128xf32>
    %51 = arith.mulf %33, %42 : vector<8x128xf32>
    %52 = arith.addf %50, %51 : vector<8x128xf32>
    %53 = math.tanh %52 : vector<8x128xf32>
    %54 = arith.mulf %49, %53 : vector<8x128xf32>
    %55 = vector.broadcast %19 : i32 to vector<8x1xi32>
    %56 = arith.cmpi slt, %55, %11 : vector<8x1xi32>
    %57 = vector.shape_cast %56 : vector<8x1xi1> to vector<8x1xi1>
    %58 = vector.broadcast %57 : vector<8x1xi1> to vector<8x128xi1>
    %59 = arith.select %58, %52, %13 : vector<8x128xi1>, vector<8x128xf32>
    %60 = vector.shape_cast %56 : vector<8x1xi1> to vector<8x1xi1>
    %61 = vector.broadcast %60 : vector<8x1xi1> to vector<8x128xi1>
    %62 = arith.select %61, %54, %12 : vector<8x128xi1>, vector<8x128xf32>
    %cst_21 = arith.constant 0.000000e+00 : f32
    %63 = vector.shape_cast %56 : vector<8x1xi1> to vector<8x1xi1>
    %64 = vector.broadcast %63 : vector<8x1xi1> to vector<8x128xi1>
    %65 = vector.broadcast %cst_21 : f32 to vector<8x128xf32>
    %66 = arith.select %64, %62, %65 : vector<8x128xi1>, vector<8x128xf32>
    %67 = arith.index_cast %18 : i32 to index
    %c0_22 = arith.constant 0 : index
    %c0_23 = arith.constant 0 : index
    %68 = vector.load %arg5[%67, %c0_22, %c0_23] : memref<8x8x128xf32, #tpu.memory_space<vmem>>, vector<1x8x128xf32>
    %69 = vector.shape_cast %68 : vector<1x8x128xf32> to vector<8x128xf32>
    %70 = vector.shape_cast %66 : vector<8x128xf32> to vector<1x8x128xf32>
    tpu.vector_store %arg5[%67, %c0_22, %c0_23], %70 {strides = array<i32>} : memref<8x8x128xf32, #tpu.memory_space<vmem>>, vector<1x8x128xf32>,
    %c1_i32_24 = arith.constant 1 : i32
    %c1_i32_25 = arith.constant 1 : i32
    %71 = arith.subi %c1_i32_25, %arg0 : i32
    %72 = arith.muli %c1_i32_24, %71 : i32
    %c7_i32_26 = arith.constant 7 : i32
    %73 = arith.subi %c7_i32_26, %c1_i32_24 : i32
    %74 = arith.muli %73, %arg0 : i32
    %75 = arith.addi %72, %74 : i32
    %76 = arith.addi %8, %75 : i32
    %c0_27 = arith.constant 0 : index
    %77 = arith.index_cast %75 : i32 to index
    %c0_28 = arith.constant 0 : index
    %c0_29 = arith.constant 0 : index
    %78 = vector.load %arg3[%c0_27, %77, %c0_28, %c0_29] : memref<1x8x8x512xbf16, #tpu.memory_space<vmem>>, vector<1x1x8x512xbf16>
    %79 = vector.shape_cast %78 : vector<1x1x8x512xbf16> to vector<8x512xbf16>
    %80 = arith.extf %79 : vector<8x512xbf16> to vector<8x512xf32>
    %81 = arith.truncf %62 : vector<8x128xf32> to vector<8x128xbf16>
    %cst_30 = arith.constant dense<0.000000e+00> : vector<8x512xf32>
    %82 = tpu.matmul %81, %10, %cst_30 {dimension_numbers = #tpu.dot_dimension_numbers<[1], [0], [0], [1], [0, 0, 1, 1], [], []>} : vector<8x128xbf16>, vector<128x512xbf16>, vector<8x512xf32> -> vector<8x512xf32>
    %83 = arith.addf %80, %82 : vector<8x512xf32>
    %84 = vector.extract_strided_slice %83 {offsets = [0, 0], sizes = [8, 128], strides = [1, 1]} : vector<8x512xf32> to vector<8x128xf32>
    %cst_31 = arith.constant 0.000000e+00 : f32
    %85 = vector.broadcast %cst_31 : f32 to vector<8x128xf32>
    %86 = arith.subf %85, %84 : vector<8x128xf32>
    %87 = math.exp %86 : vector<8x128xf32>
    %cst_32 = arith.constant 1.000000e+00 : f32
    %88 = vector.broadcast %cst_32 : f32 to vector<8x128xf32>
    %89 = arith.addf %88, %87 : vector<8x128xf32>
    %90 = tpu.reciprocal %89 {approx = true} : vector<8x128xf32> -> vector<8x128xf32>
    %91 = vector.extract_strided_slice %83 {offsets = [0, 128], sizes = [8, 128], strides = [1, 1]} : vector<8x512xf32> to vector<8x128xf32>
    %cst_33 = arith.constant 0.000000e+00 : f32
    %92 = vector.broadcast %cst_33 : f32 to vector<8x128xf32>
    %93 = arith.subf %92, %91 : vector<8x128xf32>
    %94 = math.exp %93 : vector<8x128xf32>
    %cst_34 = arith.constant 1.000000e+00 : f32
    %95 = vector.broadcast %cst_34 : f32 to vector<8x128xf32>
    %96 = arith.addf %95, %94 : vector<8x128xf32>
    %97 = tpu.reciprocal %96 {approx = true} : vector<8x128xf32> -> vector<8x128xf32>
    %98 = vector.extract_strided_slice %83 {offsets = [0, 256], sizes = [8, 128], strides = [1, 1]} : vector<8x512xf32> to vector<8x128xf32>
    %99 = math.tanh %98 : vector<8x128xf32>
    %100 = vector.extract_strided_slice %83 {offsets = [0, 384], sizes = [8, 128], strides = [1, 1]} : vector<8x512xf32> to vector<8x128xf32>
    %cst_35 = arith.constant 0.000000e+00 : f32
    %101 = vector.broadcast %cst_35 : f32 to vector<8x128xf32>
    %102 = arith.subf %101, %100 : vector<8x128xf32>
    %103 = math.exp %102 : vector<8x128xf32>
    %cst_36 = arith.constant 1.000000e+00 : f32
    %104 = vector.broadcast %cst_36 : f32 to vector<8x128xf32>
    %105 = arith.addf %104, %103 : vector<8x128xf32>
    %106 = tpu.reciprocal %105 {approx = true} : vector<8x128xf32> -> vector<8x128xf32>
    %107 = arith.mulf %97, %59 : vector<8x128xf32>
    %108 = arith.mulf %90, %99 : vector<8x128xf32>
    %109 = arith.addf %107, %108 : vector<8x128xf32>
    %110 = math.tanh %109 : vector<8x128xf32>
    %111 = arith.mulf %106, %110 : vector<8x128xf32>
    %112 = vector.broadcast %76 : i32 to vector<8x1xi32>
    %113 = arith.cmpi slt, %112, %11 : vector<8x1xi32>
    %114 = vector.shape_cast %113 : vector<8x1xi1> to vector<8x1xi1>
    %115 = vector.broadcast %114 : vector<8x1xi1> to vector<8x128xi1>
    %116 = arith.select %115, %109, %59 : vector<8x128xi1>, vector<8x128xf32>
    %117 = vector.shape_cast %113 : vector<8x1xi1> to vector<8x1xi1>
    %118 = vector.broadcast %117 : vector<8x1xi1> to vector<8x128xi1>
    %119 = arith.select %118, %111, %62 : vector<8x128xi1>, vector<8x128xf32>
    %cst_37 = arith.constant 0.000000e+00 : f32
    %120 = vector.shape_cast %113 : vector<8x1xi1> to vector<8x1xi1>
    %121 = vector.broadcast %120 : vector<8x1xi1> to vector<8x128xi1>
    %122 = vector.broadcast %cst_37 : f32 to vector<8x128xf32>
    %123 = arith.select %121, %119, %122 : vector<8x128xi1>, vector<8x128xf32>
    %124 = arith.index_cast %75 : i32 to index
    %c0_38 = arith.constant 0 : index
    %c0_39 = arith.constant 0 : index
    %125 = vector.load %arg5[%124, %c0_38, %c0_39] : memref<8x8x128xf32, #tpu.memory_space<vmem>>, vector<1x8x128xf32>
    %126 = vector.shape_cast %125 : vector<1x8x128xf32> to vector<8x128xf32>
    %127 = vector.shape_cast %123 : vector<8x128xf32> to vector<1x8x128xf32>
    tpu.vector_store %arg5[%124, %c0_38, %c0_39], %127 {strides = array<i32>} : memref<8x8x128xf32, #tpu.memory_space<vmem>>, vector<1x8x128xf32>,
    %c2_i32 = arith.constant 2 : i32
    %c1_i32_40 = arith.constant 1 : i32
    %128 = arith.subi %c1_i32_40, %arg0 : i32
    %129 = arith.muli %c2_i32, %128 : i32
    %c7_i32_41 = arith.constant 7 : i32
    %130 = arith.subi %c7_i32_41, %c2_i32 : i32
    %131 = arith.muli %130, %arg0 : i32
    %132 = arith.addi %129, %131 : i32
    %133 = arith.addi %8, %132 : i32
    %c0_42 = arith.constant 0 : index
    %134 = arith.index_cast %132 : i32 to index
    %c0_43 = arith.constant 0 : index
    %c0_44 = arith.constant 0 : index
    %135 = vector.load %arg3[%c0_42, %134, %c0_43, %c0_44] : memref<1x8x8x512xbf16, #tpu.memory_space<vmem>>, vector<1x1x8x512xbf16>
    %136 = vector.shape_cast %135 : vector<1x1x8x512xbf16> to vector<8x512xbf16>
    %137 = arith.extf %136 : vector<8x512xbf16> to vector<8x512xf32>
    %138 = arith.truncf %119 : vector<8x128xf32> to vector<8x128xbf16>
    %cst_45 = arith.constant dense<0.000000e+00> : vector<8x512xf32>
    %139 = tpu.matmul %138, %10, %cst_45 {dimension_numbers = #tpu.dot_dimension_numbers<[1], [0], [0], [1], [0, 0, 1, 1], [], []>} : vector<8x128xbf16>, vector<128x512xbf16>, vector<8x512xf32> -> vector<8x512xf32>
    %140 = arith.addf %137, %139 : vector<8x512xf32>
    %141 = vector.extract_strided_slice %140 {offsets = [0, 0], sizes = [8, 128], strides = [1, 1]} : vector<8x512xf32> to vector<8x128xf32>
    %cst_46 = arith.constant 0.000000e+00 : f32
    %142 = vector.broadcast %cst_46 : f32 to vector<8x128xf32>
    %143 = arith.subf %142, %141 : vector<8x128xf32>
    %144 = math.exp %143 : vector<8x128xf32>
    %cst_47 = arith.constant 1.000000e+00 : f32
    %145 = vector.broadcast %cst_47 : f32 to vector<8x128xf32>
    %146 = arith.addf %145, %144 : vector<8x128xf32>
    %147 = tpu.reciprocal %146 {approx = true} : vector<8x128xf32> -> vector<8x128xf32>
    %148 = vector.extract_strided_slice %140 {offsets = [0, 128], sizes = [8, 128], strides = [1, 1]} : vector<8x512xf32> to vector<8x128xf32>
    %cst_48 = arith.constant 0.000000e+00 : f32
    %149 = vector.broadcast %cst_48 : f32 to vector<8x128xf32>
    %150 = arith.subf %149, %148 : vector<8x128xf32>
    %151 = math.exp %150 : vector<8x128xf32>
    %cst_49 = arith.constant 1.000000e+00 : f32
    %152 = vector.broadcast %cst_49 : f32 to vector<8x128xf32>
    %153 = arith.addf %152, %151 : vector<8x128xf32>
    %154 = tpu.reciprocal %153 {approx = true} : vector<8x128xf32> -> vector<8x128xf32>
    %155 = vector.extract_strided_slice %140 {offsets = [0, 256], sizes = [8, 128], strides = [1, 1]} : vector<8x512xf32> to vector<8x128xf32>
    %156 = math.tanh %155 : vector<8x128xf32>
    %157 = vector.extract_strided_slice %140 {offsets = [0, 384], sizes = [8, 128], strides = [1, 1]} : vector<8x512xf32> to vector<8x128xf32>
    %cst_50 = arith.constant 0.000000e+00 : f32
    %158 = vector.broadcast %cst_50 : f32 to vector<8x128xf32>
    %159 = arith.subf %158, %157 : vector<8x128xf32>
    %160 = math.exp %159 : vector<8x128xf32>
    %cst_51 = arith.constant 1.000000e+00 : f32
    %161 = vector.broadcast %cst_51 : f32 to vector<8x128xf32>
    %162 = arith.addf %161, %160 : vector<8x128xf32>
    %163 = tpu.reciprocal %162 {approx = true} : vector<8x128xf32> -> vector<8x128xf32>
    %164 = arith.mulf %154, %116 : vector<8x128xf32>
    %165 = arith.mulf %147, %156 : vector<8x128xf32>
    %166 = arith.addf %164, %165 : vector<8x128xf32>
    %167 = math.tanh %166 : vector<8x128xf32>
    %168 = arith.mulf %163, %167 : vector<8x128xf32>
    %169 = vector.broadcast %133 : i32 to vector<8x1xi32>
    %170 = arith.cmpi slt, %169, %11 : vector<8x1xi32>
    %171 = vector.shape_cast %170 : vector<8x1xi1> to vector<8x1xi1>
    %172 = vector.broadcast %171 : vector<8x1xi1> to vector<8x128xi1>
    %173 = arith.select %172, %166, %116 : vector<8x128xi1>, vector<8x128xf32>
    %174 = vector.shape_cast %170 : vector<8x1xi1> to vector<8x1xi1>
    %175 = vector.broadcast %174 : vector<8x1xi1> to vector<8x128xi1>
    %176 = arith.select %175, %168, %119 : vector<8x128xi1>, vector<8x128xf32>
    %cst_52 = arith.constant 0.000000e+00 : f32
    %177 = vector.shape_cast %170 : vector<8x1xi1> to vector<8x1xi1>
    %178 = vector.broadcast %177 : vector<8x1xi1> to vector<8x128xi1>
    %179 = vector.broadcast %cst_52 : f32 to vector<8x128xf32>
    %180 = arith.select %178, %176, %179 : vector<8x128xi1>, vector<8x128xf32>
    %181 = arith.index_cast %132 : i32 to index
    %c0_53 = arith.constant 0 : index
    %c0_54 = arith.constant 0 : index
    %182 = vector.load %arg5[%181, %c0_53, %c0_54] : memref<8x8x128xf32, #tpu.memory_space<vmem>>, vector<1x8x128xf32>
    %183 = vector.shape_cast %182 : vector<1x8x128xf32> to vector<8x128xf32>
    %184 = vector.shape_cast %180 : vector<8x128xf32> to vector<1x8x128xf32>
    tpu.vector_store %arg5[%181, %c0_53, %c0_54], %184 {strides = array<i32>} : memref<8x8x128xf32, #tpu.memory_space<vmem>>, vector<1x8x128xf32>,
    %c3_i32 = arith.constant 3 : i32
    %c1_i32_55 = arith.constant 1 : i32
    %185 = arith.subi %c1_i32_55, %arg0 : i32
    %186 = arith.muli %c3_i32, %185 : i32
    %c7_i32_56 = arith.constant 7 : i32
    %187 = arith.subi %c7_i32_56, %c3_i32 : i32
    %188 = arith.muli %187, %arg0 : i32
    %189 = arith.addi %186, %188 : i32
    %190 = arith.addi %8, %189 : i32
    %c0_57 = arith.constant 0 : index
    %191 = arith.index_cast %189 : i32 to index
    %c0_58 = arith.constant 0 : index
    %c0_59 = arith.constant 0 : index
    %192 = vector.load %arg3[%c0_57, %191, %c0_58, %c0_59] : memref<1x8x8x512xbf16, #tpu.memory_space<vmem>>, vector<1x1x8x512xbf16>
    %193 = vector.shape_cast %192 : vector<1x1x8x512xbf16> to vector<8x512xbf16>
    %194 = arith.extf %193 : vector<8x512xbf16> to vector<8x512xf32>
    %195 = arith.truncf %176 : vector<8x128xf32> to vector<8x128xbf16>
    %cst_60 = arith.constant dense<0.000000e+00> : vector<8x512xf32>
    %196 = tpu.matmul %195, %10, %cst_60 {dimension_numbers = #tpu.dot_dimension_numbers<[1], [0], [0], [1], [0, 0, 1, 1], [], []>} : vector<8x128xbf16>, vector<128x512xbf16>, vector<8x512xf32> -> vector<8x512xf32>
    %197 = arith.addf %194, %196 : vector<8x512xf32>
    %198 = vector.extract_strided_slice %197 {offsets = [0, 0], sizes = [8, 128], strides = [1, 1]} : vector<8x512xf32> to vector<8x128xf32>
    %cst_61 = arith.constant 0.000000e+00 : f32
    %199 = vector.broadcast %cst_61 : f32 to vector<8x128xf32>
    %200 = arith.subf %199, %198 : vector<8x128xf32>
    %201 = math.exp %200 : vector<8x128xf32>
    %cst_62 = arith.constant 1.000000e+00 : f32
    %202 = vector.broadcast %cst_62 : f32 to vector<8x128xf32>
    %203 = arith.addf %202, %201 : vector<8x128xf32>
    %204 = tpu.reciprocal %203 {approx = true} : vector<8x128xf32> -> vector<8x128xf32>
    %205 = vector.extract_strided_slice %197 {offsets = [0, 128], sizes = [8, 128], strides = [1, 1]} : vector<8x512xf32> to vector<8x128xf32>
    %cst_63 = arith.constant 0.000000e+00 : f32
    %206 = vector.broadcast %cst_63 : f32 to vector<8x128xf32>
    %207 = arith.subf %206, %205 : vector<8x128xf32>
    %208 = math.exp %207 : vector<8x128xf32>
    %cst_64 = arith.constant 1.000000e+00 : f32
    %209 = vector.broadcast %cst_64 : f32 to vector<8x128xf32>
    %210 = arith.addf %209, %208 : vector<8x128xf32>
    %211 = tpu.reciprocal %210 {approx = true} : vector<8x128xf32> -> vector<8x128xf32>
    %212 = vector.extract_strided_slice %197 {offsets = [0, 256], sizes = [8, 128], strides = [1, 1]} : vector<8x512xf32> to vector<8x128xf32>
    %213 = math.tanh %212 : vector<8x128xf32>
    %214 = vector.extract_strided_slice %197 {offsets = [0, 384], sizes = [8, 128], strides = [1, 1]} : vector<8x512xf32> to vector<8x128xf32>
    %cst_65 = arith.constant 0.000000e+00 : f32
    %215 = vector.broadcast %cst_65 : f32 to vector<8x128xf32>
    %216 = arith.subf %215, %214 : vector<8x128xf32>
    %217 = math.exp %216 : vector<8x128xf32>
    %cst_66 = arith.constant 1.000000e+00 : f32
    %218 = vector.broadcast %cst_66 : f32 to vector<8x128xf32>
    %219 = arith.addf %218, %217 : vector<8x128xf32>
    %220 = tpu.reciprocal %219 {approx = true} : vector<8x128xf32> -> vector<8x128xf32>
    %221 = arith.mulf %211, %173 : vector<8x128xf32>
    %222 = arith.mulf %204, %213 : vector<8x128xf32>
    %223 = arith.addf %221, %222 : vector<8x128xf32>
    %224 = math.tanh %223 : vector<8x128xf32>
    %225 = arith.mulf %220, %224 : vector<8x128xf32>
    %226 = vector.broadcast %190 : i32 to vector<8x1xi32>
    %227 = arith.cmpi slt, %226, %11 : vector<8x1xi32>
    %228 = vector.shape_cast %227 : vector<8x1xi1> to vector<8x1xi1>
    %229 = vector.broadcast %228 : vector<8x1xi1> to vector<8x128xi1>
    %230 = arith.select %229, %223, %173 : vector<8x128xi1>, vector<8x128xf32>
    %231 = vector.shape_cast %227 : vector<8x1xi1> to vector<8x1xi1>
    %232 = vector.broadcast %231 : vector<8x1xi1> to vector<8x128xi1>
    %233 = arith.select %232, %225, %176 : vector<8x128xi1>, vector<8x128xf32>
    %cst_67 = arith.constant 0.000000e+00 : f32
    %234 = vector.shape_cast %227 : vector<8x1xi1> to vector<8x1xi1>
    %235 = vector.broadcast %234 : vector<8x1xi1> to vector<8x128xi1>
    %236 = vector.broadcast %cst_67 : f32 to vector<8x128xf32>
    %237 = arith.select %235, %233, %236 : vector<8x128xi1>, vector<8x128xf32>
    %238 = arith.index_cast %189 : i32 to index
    %c0_68 = arith.constant 0 : index
    %c0_69 = arith.constant 0 : index
    %239 = vector.load %arg5[%238, %c0_68, %c0_69] : memref<8x8x128xf32, #tpu.memory_space<vmem>>, vector<1x8x128xf32>
    %240 = vector.shape_cast %239 : vector<1x8x128xf32> to vector<8x128xf32>
    %241 = vector.shape_cast %237 : vector<8x128xf32> to vector<1x8x128xf32>
    tpu.vector_store %arg5[%238, %c0_68, %c0_69], %241 {strides = array<i32>} : memref<8x8x128xf32, #tpu.memory_space<vmem>>, vector<1x8x128xf32>,
    %c4_i32 = arith.constant 4 : i32
    %c1_i32_70 = arith.constant 1 : i32
    %242 = arith.subi %c1_i32_70, %arg0 : i32
    %243 = arith.muli %c4_i32, %242 : i32
    %c7_i32_71 = arith.constant 7 : i32
    %244 = arith.subi %c7_i32_71, %c4_i32 : i32
    %245 = arith.muli %244, %arg0 : i32
    %246 = arith.addi %243, %245 : i32
    %247 = arith.addi %8, %246 : i32
    %c0_72 = arith.constant 0 : index
    %248 = arith.index_cast %246 : i32 to index
    %c0_73 = arith.constant 0 : index
    %c0_74 = arith.constant 0 : index
    %249 = vector.load %arg3[%c0_72, %248, %c0_73, %c0_74] : memref<1x8x8x512xbf16, #tpu.memory_space<vmem>>, vector<1x1x8x512xbf16>
    %250 = vector.shape_cast %249 : vector<1x1x8x512xbf16> to vector<8x512xbf16>
    %251 = arith.extf %250 : vector<8x512xbf16> to vector<8x512xf32>
    %252 = arith.truncf %233 : vector<8x128xf32> to vector<8x128xbf16>
    %cst_75 = arith.constant dense<0.000000e+00> : vector<8x512xf32>
    %253 = tpu.matmul %252, %10, %cst_75 {dimension_numbers = #tpu.dot_dimension_numbers<[1], [0], [0], [1], [0, 0, 1, 1], [], []>} : vector<8x128xbf16>, vector<128x512xbf16>, vector<8x512xf32> -> vector<8x512xf32>
    %254 = arith.addf %251, %253 : vector<8x512xf32>
    %255 = vector.extract_strided_slice %254 {offsets = [0, 0], sizes = [8, 128], strides = [1, 1]} : vector<8x512xf32> to vector<8x128xf32>
    %cst_76 = arith.constant 0.000000e+00 : f32
    %256 = vector.broadcast %cst_76 : f32 to vector<8x128xf32>
    %257 = arith.subf %256, %255 : vector<8x128xf32>
    %258 = math.exp %257 : vector<8x128xf32>
    %cst_77 = arith.constant 1.000000e+00 : f32
    %259 = vector.broadcast %cst_77 : f32 to vector<8x128xf32>
    %260 = arith.addf %259, %258 : vector<8x128xf32>
    %261 = tpu.reciprocal %260 {approx = true} : vector<8x128xf32> -> vector<8x128xf32>
    %262 = vector.extract_strided_slice %254 {offsets = [0, 128], sizes = [8, 128], strides = [1, 1]} : vector<8x512xf32> to vector<8x128xf32>
    %cst_78 = arith.constant 0.000000e+00 : f32
    %263 = vector.broadcast %cst_78 : f32 to vector<8x128xf32>
    %264 = arith.subf %263, %262 : vector<8x128xf32>
    %265 = math.exp %264 : vector<8x128xf32>
    %cst_79 = arith.constant 1.000000e+00 : f32
    %266 = vector.broadcast %cst_79 : f32 to vector<8x128xf32>
    %267 = arith.addf %266, %265 : vector<8x128xf32>
    %268 = tpu.reciprocal %267 {approx = true} : vector<8x128xf32> -> vector<8x128xf32>
    %269 = vector.extract_strided_slice %254 {offsets = [0, 256], sizes = [8, 128], strides = [1, 1]} : vector<8x512xf32> to vector<8x128xf32>
    %270 = math.tanh %269 : vector<8x128xf32>
    %271 = vector.extract_strided_slice %254 {offsets = [0, 384], sizes = [8, 128], strides = [1, 1]} : vector<8x512xf32> to vector<8x128xf32>
    %cst_80 = arith.constant 0.000000e+00 : f32
    %272 = vector.broadcast %cst_80 : f32 to vector<8x128xf32>
    %273 = arith.subf %272, %271 : vector<8x128xf32>
    %274 = math.exp %273 : vector<8x128xf32>
    %cst_81 = arith.constant 1.000000e+00 : f32
    %275 = vector.broadcast %cst_81 : f32 to vector<8x128xf32>
    %276 = arith.addf %275, %274 : vector<8x128xf32>
    %277 = tpu.reciprocal %276 {approx = true} : vector<8x128xf32> -> vector<8x128xf32>
    %278 = arith.mulf %268, %230 : vector<8x128xf32>
    %279 = arith.mulf %261, %270 : vector<8x128xf32>
    %280 = arith.addf %278, %279 : vector<8x128xf32>
    %281 = math.tanh %280 : vector<8x128xf32>
    %282 = arith.mulf %277, %281 : vector<8x128xf32>
    %283 = vector.broadcast %247 : i32 to vector<8x1xi32>
    %284 = arith.cmpi slt, %283, %11 : vector<8x1xi32>
    %285 = vector.shape_cast %284 : vector<8x1xi1> to vector<8x1xi1>
    %286 = vector.broadcast %285 : vector<8x1xi1> to vector<8x128xi1>
    %287 = arith.select %286, %280, %230 : vector<8x128xi1>, vector<8x128xf32>
    %288 = vector.shape_cast %284 : vector<8x1xi1> to vector<8x1xi1>
    %289 = vector.broadcast %288 : vector<8x1xi1> to vector<8x128xi1>
    %290 = arith.select %289, %282, %233 : vector<8x128xi1>, vector<8x128xf32>
    %cst_82 = arith.constant 0.000000e+00 : f32
    %291 = vector.shape_cast %284 : vector<8x1xi1> to vector<8x1xi1>
    %292 = vector.broadcast %291 : vector<8x1xi1> to vector<8x128xi1>
    %293 = vector.broadcast %cst_82 : f32 to vector<8x128xf32>
    %294 = arith.select %292, %290, %293 : vector<8x128xi1>, vector<8x128xf32>
    %295 = arith.index_cast %246 : i32 to index
    %c0_83 = arith.constant 0 : index
    %c0_84 = arith.constant 0 : index
    %296 = vector.load %arg5[%295, %c0_83, %c0_84] : memref<8x8x128xf32, #tpu.memory_space<vmem>>, vector<1x8x128xf32>
    %297 = vector.shape_cast %296 : vector<1x8x128xf32> to vector<8x128xf32>
    %298 = vector.shape_cast %294 : vector<8x128xf32> to vector<1x8x128xf32>
    tpu.vector_store %arg5[%295, %c0_83, %c0_84], %298 {strides = array<i32>} : memref<8x8x128xf32, #tpu.memory_space<vmem>>, vector<1x8x128xf32>,
    %c5_i32 = arith.constant 5 : i32
    %c1_i32_85 = arith.constant 1 : i32
    %299 = arith.subi %c1_i32_85, %arg0 : i32
    %300 = arith.muli %c5_i32, %299 : i32
    %c7_i32_86 = arith.constant 7 : i32
    %301 = arith.subi %c7_i32_86, %c5_i32 : i32
    %302 = arith.muli %301, %arg0 : i32
    %303 = arith.addi %300, %302 : i32
    %304 = arith.addi %8, %303 : i32
    %c0_87 = arith.constant 0 : index
    %305 = arith.index_cast %303 : i32 to index
    %c0_88 = arith.constant 0 : index
    %c0_89 = arith.constant 0 : index
    %306 = vector.load %arg3[%c0_87, %305, %c0_88, %c0_89] : memref<1x8x8x512xbf16, #tpu.memory_space<vmem>>, vector<1x1x8x512xbf16>
    %307 = vector.shape_cast %306 : vector<1x1x8x512xbf16> to vector<8x512xbf16>
    %308 = arith.extf %307 : vector<8x512xbf16> to vector<8x512xf32>
    %309 = arith.truncf %290 : vector<8x128xf32> to vector<8x128xbf16>
    %cst_90 = arith.constant dense<0.000000e+00> : vector<8x512xf32>
    %310 = tpu.matmul %309, %10, %cst_90 {dimension_numbers = #tpu.dot_dimension_numbers<[1], [0], [0], [1], [0, 0, 1, 1], [], []>} : vector<8x128xbf16>, vector<128x512xbf16>, vector<8x512xf32> -> vector<8x512xf32>
    %311 = arith.addf %308, %310 : vector<8x512xf32>
    %312 = vector.extract_strided_slice %311 {offsets = [0, 0], sizes = [8, 128], strides = [1, 1]} : vector<8x512xf32> to vector<8x128xf32>
    %cst_91 = arith.constant 0.000000e+00 : f32
    %313 = vector.broadcast %cst_91 : f32 to vector<8x128xf32>
    %314 = arith.subf %313, %312 : vector<8x128xf32>
    %315 = math.exp %314 : vector<8x128xf32>
    %cst_92 = arith.constant 1.000000e+00 : f32
    %316 = vector.broadcast %cst_92 : f32 to vector<8x128xf32>
    %317 = arith.addf %316, %315 : vector<8x128xf32>
    %318 = tpu.reciprocal %317 {approx = true} : vector<8x128xf32> -> vector<8x128xf32>
    %319 = vector.extract_strided_slice %311 {offsets = [0, 128], sizes = [8, 128], strides = [1, 1]} : vector<8x512xf32> to vector<8x128xf32>
    %cst_93 = arith.constant 0.000000e+00 : f32
    %320 = vector.broadcast %cst_93 : f32 to vector<8x128xf32>
    %321 = arith.subf %320, %319 : vector<8x128xf32>
    %322 = math.exp %321 : vector<8x128xf32>
    %cst_94 = arith.constant 1.000000e+00 : f32
    %323 = vector.broadcast %cst_94 : f32 to vector<8x128xf32>
    %324 = arith.addf %323, %322 : vector<8x128xf32>
    %325 = tpu.reciprocal %324 {approx = true} : vector<8x128xf32> -> vector<8x128xf32>
    %326 = vector.extract_strided_slice %311 {offsets = [0, 256], sizes = [8, 128], strides = [1, 1]} : vector<8x512xf32> to vector<8x128xf32>
    %327 = math.tanh %326 : vector<8x128xf32>
    %328 = vector.extract_strided_slice %311 {offsets = [0, 384], sizes = [8, 128], strides = [1, 1]} : vector<8x512xf32> to vector<8x128xf32>
    %cst_95 = arith.constant 0.000000e+00 : f32
    %329 = vector.broadcast %cst_95 : f32 to vector<8x128xf32>
    %330 = arith.subf %329, %328 : vector<8x128xf32>
    %331 = math.exp %330 : vector<8x128xf32>
    %cst_96 = arith.constant 1.000000e+00 : f32
    %332 = vector.broadcast %cst_96 : f32 to vector<8x128xf32>
    %333 = arith.addf %332, %331 : vector<8x128xf32>
    %334 = tpu.reciprocal %333 {approx = true} : vector<8x128xf32> -> vector<8x128xf32>
    %335 = arith.mulf %325, %287 : vector<8x128xf32>
    %336 = arith.mulf %318, %327 : vector<8x128xf32>
    %337 = arith.addf %335, %336 : vector<8x128xf32>
    %338 = math.tanh %337 : vector<8x128xf32>
    %339 = arith.mulf %334, %338 : vector<8x128xf32>
    %340 = vector.broadcast %304 : i32 to vector<8x1xi32>
    %341 = arith.cmpi slt, %340, %11 : vector<8x1xi32>
    %342 = vector.shape_cast %341 : vector<8x1xi1> to vector<8x1xi1>
    %343 = vector.broadcast %342 : vector<8x1xi1> to vector<8x128xi1>
    %344 = arith.select %343, %337, %287 : vector<8x128xi1>, vector<8x128xf32>
    %345 = vector.shape_cast %341 : vector<8x1xi1> to vector<8x1xi1>
    %346 = vector.broadcast %345 : vector<8x1xi1> to vector<8x128xi1>
    %347 = arith.select %346, %339, %290 : vector<8x128xi1>, vector<8x128xf32>
    %cst_97 = arith.constant 0.000000e+00 : f32
    %348 = vector.shape_cast %341 : vector<8x1xi1> to vector<8x1xi1>
    %349 = vector.broadcast %348 : vector<8x1xi1> to vector<8x128xi1>
    %350 = vector.broadcast %cst_97 : f32 to vector<8x128xf32>
    %351 = arith.select %349, %347, %350 : vector<8x128xi1>, vector<8x128xf32>
    %352 = arith.index_cast %303 : i32 to index
    %c0_98 = arith.constant 0 : index
    %c0_99 = arith.constant 0 : index
    %353 = vector.load %arg5[%352, %c0_98, %c0_99] : memref<8x8x128xf32, #tpu.memory_space<vmem>>, vector<1x8x128xf32>
    %354 = vector.shape_cast %353 : vector<1x8x128xf32> to vector<8x128xf32>
    %355 = vector.shape_cast %351 : vector<8x128xf32> to vector<1x8x128xf32>
    tpu.vector_store %arg5[%352, %c0_98, %c0_99], %355 {strides = array<i32>} : memref<8x8x128xf32, #tpu.memory_space<vmem>>, vector<1x8x128xf32>,
    %c6_i32 = arith.constant 6 : i32
    %c1_i32_100 = arith.constant 1 : i32
    %356 = arith.subi %c1_i32_100, %arg0 : i32
    %357 = arith.muli %c6_i32, %356 : i32
    %c7_i32_101 = arith.constant 7 : i32
    %358 = arith.subi %c7_i32_101, %c6_i32 : i32
    %359 = arith.muli %358, %arg0 : i32
    %360 = arith.addi %357, %359 : i32
    %361 = arith.addi %8, %360 : i32
    %c0_102 = arith.constant 0 : index
    %362 = arith.index_cast %360 : i32 to index
    %c0_103 = arith.constant 0 : index
    %c0_104 = arith.constant 0 : index
    %363 = vector.load %arg3[%c0_102, %362, %c0_103, %c0_104] : memref<1x8x8x512xbf16, #tpu.memory_space<vmem>>, vector<1x1x8x512xbf16>
    %364 = vector.shape_cast %363 : vector<1x1x8x512xbf16> to vector<8x512xbf16>
    %365 = arith.extf %364 : vector<8x512xbf16> to vector<8x512xf32>
    %366 = arith.truncf %347 : vector<8x128xf32> to vector<8x128xbf16>
    %cst_105 = arith.constant dense<0.000000e+00> : vector<8x512xf32>
    %367 = tpu.matmul %366, %10, %cst_105 {dimension_numbers = #tpu.dot_dimension_numbers<[1], [0], [0], [1], [0, 0, 1, 1], [], []>} : vector<8x128xbf16>, vector<128x512xbf16>, vector<8x512xf32> -> vector<8x512xf32>
    %368 = arith.addf %365, %367 : vector<8x512xf32>
    %369 = vector.extract_strided_slice %368 {offsets = [0, 0], sizes = [8, 128], strides = [1, 1]} : vector<8x512xf32> to vector<8x128xf32>
    %cst_106 = arith.constant 0.000000e+00 : f32
    %370 = vector.broadcast %cst_106 : f32 to vector<8x128xf32>
    %371 = arith.subf %370, %369 : vector<8x128xf32>
    %372 = math.exp %371 : vector<8x128xf32>
    %cst_107 = arith.constant 1.000000e+00 : f32
    %373 = vector.broadcast %cst_107 : f32 to vector<8x128xf32>
    %374 = arith.addf %373, %372 : vector<8x128xf32>
    %375 = tpu.reciprocal %374 {approx = true} : vector<8x128xf32> -> vector<8x128xf32>
    %376 = vector.extract_strided_slice %368 {offsets = [0, 128], sizes = [8, 128], strides = [1, 1]} : vector<8x512xf32> to vector<8x128xf32>
    %cst_108 = arith.constant 0.000000e+00 : f32
    %377 = vector.broadcast %cst_108 : f32 to vector<8x128xf32>
    %378 = arith.subf %377, %376 : vector<8x128xf32>
    %379 = math.exp %378 : vector<8x128xf32>
    %cst_109 = arith.constant 1.000000e+00 : f32
    %380 = vector.broadcast %cst_109 : f32 to vector<8x128xf32>
    %381 = arith.addf %380, %379 : vector<8x128xf32>
    %382 = tpu.reciprocal %381 {approx = true} : vector<8x128xf32> -> vector<8x128xf32>
    %383 = vector.extract_strided_slice %368 {offsets = [0, 256], sizes = [8, 128], strides = [1, 1]} : vector<8x512xf32> to vector<8x128xf32>
    %384 = math.tanh %383 : vector<8x128xf32>
    %385 = vector.extract_strided_slice %368 {offsets = [0, 384], sizes = [8, 128], strides = [1, 1]} : vector<8x512xf32> to vector<8x128xf32>
    %cst_110 = arith.constant 0.000000e+00 : f32
    %386 = vector.broadcast %cst_110 : f32 to vector<8x128xf32>
    %387 = arith.subf %386, %385 : vector<8x128xf32>
    %388 = math.exp %387 : vector<8x128xf32>
    %cst_111 = arith.constant 1.000000e+00 : f32
    %389 = vector.broadcast %cst_111 : f32 to vector<8x128xf32>
    %390 = arith.addf %389, %388 : vector<8x128xf32>
    %391 = tpu.reciprocal %390 {approx = true} : vector<8x128xf32> -> vector<8x128xf32>
    %392 = arith.mulf %382, %344 : vector<8x128xf32>
    %393 = arith.mulf %375, %384 : vector<8x128xf32>
    %394 = arith.addf %392, %393 : vector<8x128xf32>
    %395 = math.tanh %394 : vector<8x128xf32>
    %396 = arith.mulf %391, %395 : vector<8x128xf32>
    %397 = vector.broadcast %361 : i32 to vector<8x1xi32>
    %398 = arith.cmpi slt, %397, %11 : vector<8x1xi32>
    %399 = vector.shape_cast %398 : vector<8x1xi1> to vector<8x1xi1>
    %400 = vector.broadcast %399 : vector<8x1xi1> to vector<8x128xi1>
    %401 = arith.select %400, %394, %344 : vector<8x128xi1>, vector<8x128xf32>
    %402 = vector.shape_cast %398 : vector<8x1xi1> to vector<8x1xi1>
    %403 = vector.broadcast %402 : vector<8x1xi1> to vector<8x128xi1>
    %404 = arith.select %403, %396, %347 : vector<8x128xi1>, vector<8x128xf32>
    %cst_112 = arith.constant 0.000000e+00 : f32
    %405 = vector.shape_cast %398 : vector<8x1xi1> to vector<8x1xi1>
    %406 = vector.broadcast %405 : vector<8x1xi1> to vector<8x128xi1>
    %407 = vector.broadcast %cst_112 : f32 to vector<8x128xf32>
    %408 = arith.select %406, %404, %407 : vector<8x128xi1>, vector<8x128xf32>
    %409 = arith.index_cast %360 : i32 to index
    %c0_113 = arith.constant 0 : index
    %c0_114 = arith.constant 0 : index
    %410 = vector.load %arg5[%409, %c0_113, %c0_114] : memref<8x8x128xf32, #tpu.memory_space<vmem>>, vector<1x8x128xf32>
    %411 = vector.shape_cast %410 : vector<1x8x128xf32> to vector<8x128xf32>
    %412 = vector.shape_cast %408 : vector<8x128xf32> to vector<1x8x128xf32>
    tpu.vector_store %arg5[%409, %c0_113, %c0_114], %412 {strides = array<i32>} : memref<8x8x128xf32, #tpu.memory_space<vmem>>, vector<1x8x128xf32>,
    %c7_i32_115 = arith.constant 7 : i32
    %c1_i32_116 = arith.constant 1 : i32
    %413 = arith.subi %c1_i32_116, %arg0 : i32
    %414 = arith.muli %c7_i32_115, %413 : i32
    %c7_i32_117 = arith.constant 7 : i32
    %415 = arith.subi %c7_i32_117, %c7_i32_115 : i32
    %416 = arith.muli %415, %arg0 : i32
    %417 = arith.addi %414, %416 : i32
    %418 = arith.addi %8, %417 : i32
    %c0_118 = arith.constant 0 : index
    %419 = arith.index_cast %417 : i32 to index
    %c0_119 = arith.constant 0 : index
    %c0_120 = arith.constant 0 : index
    %420 = vector.load %arg3[%c0_118, %419, %c0_119, %c0_120] : memref<1x8x8x512xbf16, #tpu.memory_space<vmem>>, vector<1x1x8x512xbf16>
    %421 = vector.shape_cast %420 : vector<1x1x8x512xbf16> to vector<8x512xbf16>
    %422 = arith.extf %421 : vector<8x512xbf16> to vector<8x512xf32>
    %423 = arith.truncf %404 : vector<8x128xf32> to vector<8x128xbf16>
    %cst_121 = arith.constant dense<0.000000e+00> : vector<8x512xf32>
    %424 = tpu.matmul %423, %10, %cst_121 {dimension_numbers = #tpu.dot_dimension_numbers<[1], [0], [0], [1], [0, 0, 1, 1], [], []>} : vector<8x128xbf16>, vector<128x512xbf16>, vector<8x512xf32> -> vector<8x512xf32>
    %425 = arith.addf %422, %424 : vector<8x512xf32>
    %426 = vector.extract_strided_slice %425 {offsets = [0, 0], sizes = [8, 128], strides = [1, 1]} : vector<8x512xf32> to vector<8x128xf32>
    %cst_122 = arith.constant 0.000000e+00 : f32
    %427 = vector.broadcast %cst_122 : f32 to vector<8x128xf32>
    %428 = arith.subf %427, %426 : vector<8x128xf32>
    %429 = math.exp %428 : vector<8x128xf32>
    %cst_123 = arith.constant 1.000000e+00 : f32
    %430 = vector.broadcast %cst_123 : f32 to vector<8x128xf32>
    %431 = arith.addf %430, %429 : vector<8x128xf32>
    %432 = tpu.reciprocal %431 {approx = true} : vector<8x128xf32> -> vector<8x128xf32>
    %433 = vector.extract_strided_slice %425 {offsets = [0, 128], sizes = [8, 128], strides = [1, 1]} : vector<8x512xf32> to vector<8x128xf32>
    %cst_124 = arith.constant 0.000000e+00 : f32
    %434 = vector.broadcast %cst_124 : f32 to vector<8x128xf32>
    %435 = arith.subf %434, %433 : vector<8x128xf32>
    %436 = math.exp %435 : vector<8x128xf32>
    %cst_125 = arith.constant 1.000000e+00 : f32
    %437 = vector.broadcast %cst_125 : f32 to vector<8x128xf32>
    %438 = arith.addf %437, %436 : vector<8x128xf32>
    %439 = tpu.reciprocal %438 {approx = true} : vector<8x128xf32> -> vector<8x128xf32>
    %440 = vector.extract_strided_slice %425 {offsets = [0, 256], sizes = [8, 128], strides = [1, 1]} : vector<8x512xf32> to vector<8x128xf32>
    %441 = math.tanh %440 : vector<8x128xf32>
    %442 = vector.extract_strided_slice %425 {offsets = [0, 384], sizes = [8, 128], strides = [1, 1]} : vector<8x512xf32> to vector<8x128xf32>
    %cst_126 = arith.constant 0.000000e+00 : f32
    %443 = vector.broadcast %cst_126 : f32 to vector<8x128xf32>
    %444 = arith.subf %443, %442 : vector<8x128xf32>
    %445 = math.exp %444 : vector<8x128xf32>
    %cst_127 = arith.constant 1.000000e+00 : f32
    %446 = vector.broadcast %cst_127 : f32 to vector<8x128xf32>
    %447 = arith.addf %446, %445 : vector<8x128xf32>
    %448 = tpu.reciprocal %447 {approx = true} : vector<8x128xf32> -> vector<8x128xf32>
    %449 = arith.mulf %439, %401 : vector<8x128xf32>
    %450 = arith.mulf %432, %441 : vector<8x128xf32>
    %451 = arith.addf %449, %450 : vector<8x128xf32>
    %452 = math.tanh %451 : vector<8x128xf32>
    %453 = arith.mulf %448, %452 : vector<8x128xf32>
    %454 = vector.broadcast %418 : i32 to vector<8x1xi32>
    %455 = arith.cmpi slt, %454, %11 : vector<8x1xi32>
    %456 = vector.shape_cast %455 : vector<8x1xi1> to vector<8x1xi1>
    %457 = vector.broadcast %456 : vector<8x1xi1> to vector<8x128xi1>
    %458 = arith.select %457, %451, %401 : vector<8x128xi1>, vector<8x128xf32>
    %459 = vector.shape_cast %455 : vector<8x1xi1> to vector<8x1xi1>
    %460 = vector.broadcast %459 : vector<8x1xi1> to vector<8x128xi1>
    %461 = arith.select %460, %453, %404 : vector<8x128xi1>, vector<8x128xf32>
    %cst_128 = arith.constant 0.000000e+00 : f32
    %462 = vector.shape_cast %455 : vector<8x1xi1> to vector<8x1xi1>
    %463 = vector.broadcast %462 : vector<8x1xi1> to vector<8x128xi1>
    %464 = vector.broadcast %cst_128 : f32 to vector<8x128xf32>
    %465 = arith.select %463, %461, %464 : vector<8x128xi1>, vector<8x128xf32>
    %466 = arith.index_cast %417 : i32 to index
    %c0_129 = arith.constant 0 : index
    %c0_130 = arith.constant 0 : index
    %467 = vector.load %arg5[%466, %c0_129, %c0_130] : memref<8x8x128xf32, #tpu.memory_space<vmem>>, vector<1x8x128xf32>
    %468 = vector.shape_cast %467 : vector<1x8x128xf32> to vector<8x128xf32>
    %469 = vector.shape_cast %465 : vector<8x128xf32> to vector<1x8x128xf32>
    tpu.vector_store %arg5[%466, %c0_129, %c0_130], %469 {strides = array<i32>} : memref<8x8x128xf32, #tpu.memory_space<vmem>>, vector<1x8x128xf32>,
    %c8_i32_131 = arith.constant 8 : i32
    %c0_132 = arith.constant 0 : index
    %c0_133 = arith.constant 0 : index
    %470 = vector.load %arg6[%c0_132, %c0_133] : memref<8x128xf32, #tpu.memory_space<vmem>>, vector<8x128xf32>
    tpu.vector_store %arg6[%c0_132, %c0_133], %461 {strides = array<i32>} : memref<8x128xf32, #tpu.memory_space<vmem>>, vector<8x128xf32>,
    %c0_134 = arith.constant 0 : index
    %c0_135 = arith.constant 0 : index
    %471 = vector.load %arg7[%c0_134, %c0_135] : memref<8x128xf32, #tpu.memory_space<vmem>>, vector<8x128xf32>
    tpu.vector_store %arg7[%c0_134, %c0_135], %458 {strides = array<i32>} : memref<8x128xf32, #tpu.memory_space<vmem>>, vector<8x128xf32>,
    return
  }
  func.func @transform_0(%arg0: i32, %arg1: i32) -> (i32, i32) {
    %c0_i32 = arith.constant 0 : i32
    %c0_i32_0 = arith.constant 0 : i32
    %c0_i32_1 = arith.constant 0 : i32
    return %c0_i32, %c0_i32_0 : i32, i32
  }
  func.func @transform_1(%arg0: i32, %arg1: i32) -> (i32, i32, i32, i32) {
    %c1_i32 = arith.constant 1 : i32
    %0 = arith.subi %c1_i32, %arg0 : i32
    %1 = arith.muli %arg1, %0 : i32
    %c0_i32 = arith.constant 0 : i32
    %2 = arith.subi %c0_i32, %arg1 : i32
    %3 = arith.muli %2, %arg0 : i32
    %4 = arith.addi %1, %3 : i32
    %c0_i32_0 = arith.constant 0 : i32
    %c0_i32_1 = arith.constant 0 : i32
    %c0_i32_2 = arith.constant 0 : i32
    return %arg0, %4, %c0_i32_0, %c0_i32_1 : i32, i32, i32, i32
  }
  func.func @transform_2(%arg0: i32, %arg1: i32) -> (i32, i32, i32) {
    %c0_i32 = arith.constant 0 : i32
    %c0_i32_0 = arith.constant 0 : i32
    %c0_i32_1 = arith.constant 0 : i32
    return %arg0, %c0_i32, %c0_i32_0 : i32, i32, i32
  }
  func.func @transform_3(%arg0: i32, %arg1: i32) -> (i32, i32, i32) {
    %c1_i32 = arith.constant 1 : i32
    %0 = arith.subi %c1_i32, %arg0 : i32
    %1 = arith.muli %arg1, %0 : i32
    %c0_i32 = arith.constant 0 : i32
    %2 = arith.subi %c0_i32, %arg1 : i32
    %3 = arith.muli %2, %arg0 : i32
    %4 = arith.addi %1, %3 : i32
    %c0_i32_0 = arith.constant 0 : i32
    %c0_i32_1 = arith.constant 0 : i32
    return %4, %c0_i32_0, %arg0 : i32, i32, i32
  }
}

</mosaic_0001>

<bundles_post_ra>
// kernel: tpu_custom_call.1
= control target key start
LH: loop header
LB: loop body
LE: loop exit
PB: predicated region body
PF: predicated region fallthrough
CT: control target
= control target key end

     0   :  { %8 = vsyncpa [#allocation5], 0  ;;  %s2736_s0 = inlined_call_operand.vmem [shape: s32[8,1], index: 0, kind: input, shape index: {}]   ;;  %s2737_s1 = inlined_call_operand.hbm [shape: bf16[2,8,8,512], index: 1, kind: input, shape index: {}]   ;;  %s2738_s2 = inlined_call_operand.hbm [shape: bf16[2,128,512], index: 2, kind: input, shape index: {}]   ;;  %s2739_s3 = inlined_call_operand.hbm [shape: f32[8,8,256], index: 3, kind: output, shape index: {}]  }
   0x1   :  { %10 = vsyncpa [#allocation5 + $0x1], 0 }
   0x2   :  { %11 = vsyncpa [#allocation8], 0 }
   0x3   :  { %12 = vsyncpa [#allocation6], 0 }
   0x4   :  { %14 = vsyncpa [#allocation6 + $0x1], 0  ;;  %s2103_s12 = smov 0   ;;  %s2105_s13 = smov 0  }
   0x5   :  { %s2107_s14 = smov 0   ;;  %s2109_s15 = smov 0  }
   0x6   :  { %s2111_s16 = smov 0   ;;  %s2113_s17 = smov 0  }
   0x7 LB: > { %s1494_s18 = sadd.s32 4294967295, %s2073_s17   ;;  %s1495_s19 = sadd.s32 4294967294, %s2073_s17   ;;  %s2073_s17 = sphi %s2113_s17, %s20_s17   ;;  %s2069_s16 = sphi %s2111_s16, %s2749_s16   ;;  %s2065_s15 = sphi %s2109_s15, %s2748_s15   ;;  %s2061_s14 = sphi %s2107_s14, %s2747_s14   ;;  %s2057_s13 = sphi %s2105_s13, %s2746_s13   ;;  %s2053_s12 = sphi %s2103_s12, %s2745_s12  }
   0x8   : > { %p85_p0 = scmp.ne.s32.totalorder %s2057_s13, %s2053_s12  ;;  %p86_p1 = scmp.eq.s32.totalorder %s1494_s18, 0 }
   0x9   : > { %p153_p2 = scmp.eq.s32.totalorder %s1495_s19, 1  ;;  %p1496_p4 = scmp.ge.s32.totalorder %s2073_s17, 1 }
   0xa   : > { %p2139_p3 = por %p86_p1, %p85_p0  ;;  %p160_p6 = scmp.lt.s32.totalorder %s2073_s17, 3 }
   0xb   : > { %p2144_p5 = por %p153_p2, %p85_p0  ;;  %s1666_s22 = sshll.u32 %s2065_s15, 8 }
   0xc   : > { %p2150_p7 = pnand %p1496_p4, %p160_p6  ;;  %s176_s26 = scalar_lea.hbm %s2738_s2, %s1666_s22 }
   0xd   : > { %s177_s27 = sshll.u32 %s176_s26, 4  ;;  %s2075_s28 = smov [#allocation7]   ;;  %s178_s27 = int_to_ptr.hbm [resolvable:$true] %s177_s27 }
   0xe   : > { %s179_s29 = sshll.u32 %s2075_s28, 4  ;;  %p1726_p8 = pneg %p2150_p7  ;;  %s180_s29 = int_to_ptr.vmem [resolvable:$true] %s179_s29 }
   0xf   : > { %p1499_p10 = scmp.ge.s32.totalorder %s2073_s17, 2  ;;  %s1927_s4 = sshra.s32 %s178_s27, 4  ;;  %s1928_s4 = int_to_ptr.hbm [resolvable:$true] %s1927_s4 }
  0x10   : > { %p2161_p9 = pnand %p1726_p8, %p2139_p3  ;;  %s1929_s5 = scalar_lea.hbm %s1928_s4, 256 }
  0x11   : > { %p1930_p11 = scmp.ne.s32.totalorder %s1928_s4, %s1929_s5  ;;  %s1934_s8 = scalar_lea.hbm %s2738_s2, 512 }
  0x12   : > { %p1931_p12 = pneg %p2161_p9  ;;  %p1935_p1 = scmp.lt.s32.totalorder %s1928_s4, %s2738_s2 }
  0x13   : > { %p1936_p2 = scmp.lt.s32.totalorder %s1934_s8, %s1929_s5 }
  0x14   : > { %p1932_p13 = pnand %p1931_p12, %p1930_p11 }
  0x15   : > { %p1937_p4 = por %p1936_p2, %p1935_p1 }
  0x16   : > { %p1933_p0 = pneg %p1932_p13 }
  0x18   : > { %p1938_p6 = pnand %p1937_p4, %p1933_p0 }
  0x1a   : > { %1941 = shalt.err (!%p1938_p6)
}
  0x1b   : > { %s2076_s11 = smov 256   ;;  %s2077_s19 = smov 16  }
  0x1c   : > { %1729 = dma.hbm_to_vmem [thread:$0]  (!%p2161_p9), %s178_s27, 4096, %s180_s29, [#allocation8], %s2076_s11, %s2076_s11, %s2077_s19  }
  0x1d   : > { %p147_p8 = scmp.eq.s32.totalorder %s1494_s18, 1  ;;  %s32_s22 = sadd.s32 1, %s2069_s16 }
  0x1e   : > { %p34_p11 = scmp.ge.s32.totalorder %s32_s22, 2  ;;  %s72_s24 = sadd.s32 1, %s2061_s14 }
  0x1f   : > { %p79_p12 = scmp.ne.s32.totalorder %s2061_s14, %s2057_s13  ;;  %p80_p13 = scmp.eq.s32.totalorder %s2073_s17, 0 }
  0x20   : > { %s2751_s22 = smov (%p34_p11, %s32_s22), 0  ;;  %p1738_p1 = scmp.lt.s32.totalorder %s2073_s17, 2 }
  0x21   : > { %p2188_p0 = por %p147_p8, %p79_p12  ;;  %s67_s26 = ssub.s32 %s2069_s16, %s2751_s22 }
  0x22   : > { %s193_s28 = sand.u32 1, %s2061_s14   ;;  %p70_p9 = scmp.eq.s32.totalorder %s67_s26, 0 }
  0x23   : > { %p81_p2 = por %p80_p13, %p79_p12  ;;  %s1500_s27 = sshll.u32 %s193_s28, 7 }
  0x24   : > { %s1667_s18 = sshll.u32 %s2069_s16, 7  ;;  %s197_s7 = scalar_lea.vmem [#allocation4], %s1500_s27 }
  0x25   : > { %s2198_s29 = scalar_select %p70_p9, %s2061_s14, %s72_s24  }
  0x26   : > { %s210_s5 = scalar_lea.hbm %s2737_s1, %s1667_s18  ;;  %s213_s8 = sshll.u32 %s197_s7, 4  ;;  %s214_s8 = int_to_ptr.vmem [resolvable:$true] %s213_s8 }
  0x27   : > { %s211_s6 = sshll.u32 %s210_s5, 4  ;;  %p1731_p4 = pnand %p1738_p1, %p81_p2  ;;  %s212_s6 = int_to_ptr.hbm [resolvable:$true] %s211_s6 }
  0x28   : > { %s194_s9 = scalar_lea.sflag [#allocation5], %s193_s28  ;;  %225 = sbr.rel (%p2150_p7) target bundleno = 1405 (0x57d), region = 32 }
  0x29   : > { %1733 = dma.hbm_to_vmem [thread:$0]  (!%p1731_p4), %s212_s6, 2048, %s214_s8, %s194_s9, %s2076_s11, %s2076_s11, %s2077_s19  }
  0x2a   : > { %s2211_s10 = sand.u32 (!%p2150_p7), 1, %s2057_s13  }
  0x2b   : > { %s1504_s24 = sshll.u32 (!%p2150_p7), %s2211_s10, 7  ;;  %s228_s26 = scalar_lea.sflag (!%p2150_p7), [#allocation5], %s2211_s10 }
  0x2c   : > { %s2215_s27 = scalar_lea.vmem (!%p2150_p7), [#allocation4], %s1504_s24 }
  0x2d   : > { %2040 = dma.done.wait (%p2139_p3), %s228_s26, 2048  }
  0x2e   : > { %2042 = vsyncadd (%p2139_p3), %s228_s26, 4294965248 }
  0x2f   : > { %2044 = dma.done.wait (%p2139_p3), [#allocation8], 4096  }
  0x30   : > { %2046 = vsyncadd (%p2139_p3), [#allocation8], 4294963200  ;;  %v1622_v0 = vld [vmem:[#allocation7 + $0xe0] sm:$0xf]  ;;  %v1698_v1 = vld [vmem:[#allocation7 + $0xec] sm:$0xf0] }
  0x31   : > { %v1696_v2 = vld [vmem:[#allocation7 + $0xe4] sm:$0xf]  ;;  %v2225_v3 = vor.u32 %v1698_v1, %v1622_v0  ;;  %v1624_v4 = vld [vmem:[#allocation7 + $0xf0] sm:$0xf0]  ;;  %v1630_v5 = vld [vmem:[#allocation7 + $0xe8] sm:$0xf] }
  0x32   : > { %v1699_v6 = vld [vmem:[#allocation7 + $0xf4] sm:$0xf0]  ;;  %v2227_v7 = vor.u32 %v1696_v2, %v1624_v4  ;;  %v1697_v9 = vld [vmem:[#allocation7 + $0xec] sm:$0xf]  ;;  %v1632_v10 = vld [vmem:[#allocation7 + $0xf8] sm:$0xf0] }
  0x33   : > { %v2229_v8 = vor.u32 %v1699_v6, %v1630_v5  ;;  %v1606_v11 = vld [vmem:[#allocation7 + $0xc0] sm:$0xf]  ;;  %491 = vmatpush.bf16.msra.mxu0 %v2225_v3  ;;  %v2232_v12 = vor.u32 %v1697_v9, %v1632_v10  ;;  %v1694_v13 = vld [vmem:[#allocation7 + $0xcc] sm:$0xf0]  ;;  %v1692_v14 = vld [vmem:[#allocation7 + $0xc4] sm:$0xf] }
  0x34   : > { %v1608_v15 = vld [vmem:[#allocation7 + $0xd0] sm:$0xf0]  ;;  %504 = vmatpush.bf16.msra.mxu1 %v2227_v7  ;;  %v2236_v16 = vor.u32 %v1694_v13, %v1606_v11  ;;  %v1614_v18 = vld [vmem:[#allocation7 + $0xc8] sm:$0xf]  ;;  %v1695_v19 = vld [vmem:[#allocation7 + $0xd4] sm:$0xf0] }
  0x35   : > { %517 = vmatpush.bf16.msra.mxu2 %v2229_v8  ;;  %v2238_v17 = vor.u32 %v1692_v14, %v1608_v15  ;;  %v1693_v20 = vld [vmem:[#allocation7 + $0xcc] sm:$0xf]  ;;  %530 = vmatpush.bf16.msra.mxu3 %v2232_v12  ;;  %v2241_v21 = vor.u32 %v1695_v19, %v1614_v18  ;;  %v1616_v22 = vld [vmem:[#allocation7 + $0xd8] sm:$0xf0]  ;;  %v1590_v23 = vld [vmem:[#allocation7 + $0xa0] sm:$0xf] }
  0x36   : > { %v1690_v24 = vld [vmem:[#allocation7 + $0xac] sm:$0xf0]  ;;  %v2243_v25 = vor.u32 %v1693_v20, %v1616_v22  ;;  %v1688_v26 = vld [vmem:[#allocation7 + $0xa4] sm:$0xf]  ;;  %v1592_v27 = vld [vmem:[#allocation7 + $0xb0] sm:$0xf0] }
  0x37   : > { %v1598_v28 = vld [vmem:[#allocation7 + $0xa8] sm:$0xf]  ;;  %492 = vmatpush.bf16.msra.mxu0 %v2236_v16  ;;  %v2246_v29 = vor.u32 %v1690_v24, %v1590_v23  ;;  %v1691_v30 = vld [vmem:[#allocation7 + $0xb4] sm:$0xf0]  ;;  %v1689_v31 = vld [vmem:[#allocation7 + $0xac] sm:$0xf]  ;;  %v2250_v33 = vor.u32 %v1688_v26, %v1592_v27 }
  0x38   : > { %v1600_v32 = vld [vmem:[#allocation7 + $0xb8] sm:$0xf0]  ;;  %505 = vmatpush.bf16.msra.mxu1 %v2238_v17  ;;  %v2252_v34 = vor.u32 %v1691_v30, %v1598_v28  ;;  %v1574_v35 = vld [vmem:[#allocation7 + $0x80] sm:$0xf]  ;;  %v1686_v36 = vld [vmem:[#allocation7 + $0x8c] sm:$0xf0] }
  0x39   : > { %518 = vmatpush.bf16.msra.mxu2 %v2241_v21  ;;  %v1684_v37 = vld [vmem:[#allocation7 + $0x84] sm:$0xf]  ;;  %531 = vmatpush.bf16.msra.mxu3 %v2243_v25  ;;  %v2255_v38 = vor.u32 %v1689_v31, %v1600_v32  ;;  %v1576_v39 = vld [vmem:[#allocation7 + $0x90] sm:$0xf0]  ;;  %v1582_v40 = vld [vmem:[#allocation7 + $0x88] sm:$0xf]  ;;  %v2258_v44 = vor.u32 %v1686_v36, %v1574_v35 }
  0x3a   : > { %v1687_v41 = vld [vmem:[#allocation7 + $0x94] sm:$0xf0]  ;;  %v1685_v42 = vld [vmem:[#allocation7 + $0x8c] sm:$0xf]  ;;  %v1584_v43 = vld [vmem:[#allocation7 + $0x98] sm:$0xf0]  ;;  %v2262_v45 = vor.u32 %v1684_v37, %v1576_v39 }
  0x3b   : > { %493 = vmatpush.bf16.msra.mxu0 %v2246_v29  ;;  %v2264_v46 = vor.u32 %v1687_v41, %v1582_v40  ;;  %v1558_v47 = vld [vmem:[#allocation7 + $0x60] sm:$0xf]  ;;  %v1682_v48 = vld [vmem:[#allocation7 + $0x6c] sm:$0xf0]  ;;  %v1680_v49 = vld [vmem:[#allocation7 + $0x64] sm:$0xf]  ;;  %v2267_v50 = vor.u32 %v1685_v42, %v1584_v43 }
  0x3c   : > { %506 = vmatpush.bf16.msra.mxu1 %v2250_v33  ;;  %v1560_v51 = vld [vmem:[#allocation7 + $0x70] sm:$0xf0]  ;;  %v1566_v52 = vld [vmem:[#allocation7 + $0x68] sm:$0xf]  ;;  %v1683_v53 = vld [vmem:[#allocation7 + $0x74] sm:$0xf0]  ;;  %v2271_v56 = vor.u32 %v1682_v48, %v1558_v47 }
  0x3d   : > { %519 = vmatpush.bf16.msra.mxu2 %v2252_v34  ;;  %532 = vmatpush.bf16.msra.mxu3 %v2255_v38  ;;  %v1681_v54 = vld [vmem:[#allocation7 + $0x6c] sm:$0xf]  ;;  %v1568_v55 = vld [vmem:[#allocation7 + $0x78] sm:$0xf0]  ;;  %s319_s20 = smul.u32 7, %s2065_s15  ;;  %v2276_v57 = vor.u32 %v1680_v49, %v1560_v51  ;;  %v2278_v58 = vor.u32 %v1683_v53, %v1566_v52  ;;  %s2284_s11 = ssub.s32 1, %s2065_s15 }
  0x3e   : > { %s581_s23 = smul.u32 6, %s2065_s15  ;;  %v1542_v59 = vld [vmem:[#allocation7 + $0x40] sm:$0xf]  ;;  %v1678_v60 = vld [vmem:[#allocation7 + $0x4c] sm:$0xf0]  ;;  %v2281_v62 = vor.u32 %v1681_v54, %v1568_v55  ;;  %v2078_v26 = vmov 0  }
  0x3f   : > { %494 = vmatpush.bf16.msra.mxu0 %v2258_v44  ;;  %v1676_v61 = vld [vmem:[#allocation7 + $0x44] sm:$0xf]  ;;  %v1544_v63 = vld [vmem:[#allocation7 + $0x50] sm:$0xf0]  ;;  %v1550_v0 = vld [vmem:[#allocation7 + $0x48] sm:$0xf]  ;;  %v2287_v5 = vor.u32 %v1678_v60, %v1542_v59  ;;  %v568_v9 = vstv %s319_s20  ;;  %1796 = vset.pattern.permute.xlu0 %v2078_v26 }
  0x40   : > { %507 = vmatpush.bf16.msra.mxu1 %v2262_v45  ;;  %v1679_v1 = vld [vmem:[#allocation7 + $0x54] sm:$0xf0]  ;;  %v1677_v2 = vld [vmem:[#allocation7 + $0x4c] sm:$0xf]  ;;  %v1552_v4 = vld [vmem:[#allocation7 + $0x58] sm:$0xf0]  ;;  %v2291_v10 = vor.u32 %v1676_v61, %v1544_v63  ;;  %s2306_s18 = sadd.s32 %s581_s23, %s2284_s11  ;;  %1797 = vset.pattern.permute.xlu1 %v2078_v26 }
  0x41   : > { %520 = vmatpush.bf16.msra.mxu2 %v2264_v46  ;;  %533 = vmatpush.bf16.msra.mxu3 %v2267_v50  ;;  %v1526_v6 = vld [vmem:[#allocation7 + $0x20] sm:$0xf]  ;;  %v2293_v11 = vor.u32 %v1679_v1, %v1550_v0  ;;  %v1674_v13 = vld [vmem:[#allocation7 + $0x2c] sm:$0xf0]  ;;  %v1672_v14 = vld [vmem:[#allocation7 + $0x24] sm:$0xf]  ;;  %v2296_v18 = vor.u32 %v1677_v2, %v1552_v4  ;;  %v671_v37 = vstv %s2306_s18 }
  0x42   : > { %v1528_v15 = vld [vmem:[#allocation7 + $0x30] sm:$0xf0]  ;;  %v1534_v19 = vld [vmem:[#allocation7 + $0x28] sm:$0xf]  ;;  %v1675_v20 = vld [vmem:[#allocation7 + $0x34] sm:$0xf0]  ;;  %v2311_v27 = vor.u32 %v1674_v13, %v1526_v6  ;;  %1798 = vset.pattern.permute.xlu2 %v2078_v26 }
  0x43   : > { %495 = vmatpush.bf16.msra.mxu0 %v2271_v56  ;;  %v2301_v22 = vld [vmem:[%s2736_s0] sm:$0xff]  ;;  %v1673_v23 = vld [vmem:[#allocation7 + $0x2c] sm:$0xf]  ;;  %v1536_v24 = vld [vmem:[#allocation7 + $0x38] sm:$0xf0]  ;;  %s1100_s30 = smul.u32 6, %s2284_s11  ;;  %v2318_v30 = vor.u32 %v1672_v14, %v1528_v15  ;;  %v2320_v31 = vor.u32 %v1675_v20, %v1534_v19 }
  0x44   : > { %508 = vmatpush.bf16.msra.mxu1 %v2276_v57  ;;  %vm569_vm0 = vcmp.lt.s32.totalorder %v568_v9, %v2301_v22  ;;  %v1510_v32 = vld [vmem:[#allocation7] sm:$0xf]  ;;  %v1670_v35 = vld [vmem:[#allocation7 + $0xc] sm:$0xf0]  ;;  %v1668_v36 = vld [vmem:[#allocation7 + $0x4] sm:$0xf]  ;;  %v2324_v39 = vor.u32 %v1673_v23, %v1536_v24  ;;  %vm672_vm1 = vcmp.lt.s32.totalorder %v671_v37, %v2301_v22 }
  0x45   : > { %521 = vmatpush.bf16.msra.mxu2 %v2278_v58  ;;  %534 = vmatpush.bf16.msra.mxu3 %v2281_v62  ;;  %v570_v28 = vsel %vm569_vm0, 1, %v2078_v26  ;;  %v1512_v40 = vld [vmem:[#allocation7 + $0x10] sm:$0xf0]  ;;  %v1518_v41 = vld [vmem:[#allocation7 + $0x8] sm:$0xf]  ;;  %v2328_v48 = vor.u32 %v1670_v35, %v1510_v32  ;;  %s2341_s4 = sadd.s32 %s2065_s15, %s1100_s30  ;;  %v673_v53 = vsel %vm672_vm1, 1, %v2078_v26 }
  0x46   : > { %v1671_v42 = vld [vmem:[#allocation7 + $0x14] sm:$0xf0]  ;;  %572 = vperm.xlu0 %1796, %v570_v28   ;;  %v1669_v43 = vld [vmem:[#allocation7 + $0xc] sm:$0xf]  ;;  %v1520_v47 = vld [vmem:[#allocation7 + $0x18] sm:$0xf0]  ;;  %v2333_v49 = vor.u32 %v1668_v36, %v1512_v40  ;;  %v1190_v54 = vstv %s2341_s4 }
  0x47   : > { %496 = vmatpush.bf16.msra.mxu0 %v2287_v5  ;;  %v2335_v51 = vor.u32 %v1671_v42, %v1518_v41  ;;  %v2338_v52 = vor.u32 %v1669_v43, %v1520_v47  ;;  %v2079_v55 = vmov 0.0|0.0   ;;  %vm1191_vm2 = vcmp.lt.s32.totalorder %v1190_v54, %v2301_v22  ;;  %s1700_s5 = smul.u32 112, %s2065_s15  ;;  %s1505_s7 = sshll.u32 %s2211_s10, 6 }
  0x48   : > { %509 = vmatpush.bf16.msra.mxu1 %v2291_v10  ;;  %v1192_v59 = vsel %vm1191_vm2, 1, %v2078_v26  ;;  %s1636_s8 = smul.u32 56, %s2065_s15  ;;  %s2421_s9 = scalar_lea.vmem [#allocation9], %s1505_s7 }
  0x49   : > { %522 = vmatpush.bf16.msra.mxu2 %v2293_v11  ;;  %535 = vmatpush.bf16.msra.mxu3 %v2296_v18  ;;  %s323_s6 = scalar_lea.vmem %s2215_s27, %s1700_s5 [#allocation4]  ;;  %s1701_s26 = sshll.u32 %s2306_s18, 4 }
  0x4a   : > { %v324_v60 = vld [vmem:[%s323_s6] sm:$0xff]  ;;  %v325_v6 = vld [vmem:[%s323_s6 + $0x8] sm:$0xff]  ;;  %s579_s24 = scalar_lea.vmem %s2421_s9, %s1636_s8 [#allocation9]  ;;  %s586_s20 = scalar_lea.vmem %s2215_s27, %s1701_s26 [#allocation4] }
  0x4b   : > { %497 = vmatpush.bf16.msra.mxu0 %v2311_v27  ;;  %v326_v61 = vunpack.c.l.bf16 %v324_v60  ;;  %v327_v63 = vunpack.c.h.bf16 %v324_v60  ;;  %v329_v15 = vunpack.c.h.bf16 %v325_v6  ;;  %v328_v20 = vunpack.c.l.bf16 %v325_v6  ;;  %s685_s23 = smul.u32 5, %s2065_s15  ;;  %s1640_s19 = sshll.u32 %s2284_s11, 1 }
  0x4c   : > { %510 = vmatpush.bf16.msra.mxu1 %v2318_v30  ;;  %s788_s28 = smul.u32 3, %s2284_s11  ;;  %s1644_s30 = sshll.u32 %s2065_s15, 2 }
  0x4d   : > { %523 = vmatpush.bf16.msra.mxu2 %v2320_v31  ;;  %536 = vmatpush.bf16.msra.mxu3 %v2324_v39  ;;  %s2465_s5 = sadd.s32 %s1640_s19, %s685_s23  ;;  %s1203_s7 = smul.u32 7, %s2284_s11 }
  0x4e   : > { %675 = vperm.xlu0 %1796, %v673_v53   ;;  %s2467_s6 = sadd.s32 %s1644_s30, %s788_s28  ;;  %s1639_s8 = sshll.u32 %s2306_s18, 3 }
  0x4f   : > { %498 = vmatpush.bf16.msra.mxu0 %v2328_v48  ;;  %s1702_s18 = sshll.u32 %s2465_s5, 4  ;;  %s1703_s19 = sshll.u32 %s2467_s6, 4 }
  0x50   : > { %511 = vmatpush.bf16.msra.mxu1 %v2333_v49  ;;  %s690_s26 = scalar_lea.vmem %s2215_s27, %s1702_s18 [#allocation4]  ;;  %s794_s28 = scalar_lea.vmem %s2215_s27, %s1703_s19 [#allocation4] }
  0x51   : > { %524 = vmatpush.bf16.msra.mxu2 %v2335_v51  ;;  %537 = vmatpush.bf16.msra.mxu3 %v2338_v52  ;;  %s893_s30 = smul.u32 3, %s2065_s15 }
  0x52   : > { %499 = vmatmul.bf16.vlgmr.msra.gmra.mxu0 %v2079_v55 }
  0x53   : > { %512 = vmatmul.bf16.vlgmr.msra.gmra.mxu1 %v2079_v55  ;;  %594 = vmatpush.bf16.msrb.mxu0 %v2225_v3 }
  0x54   : > { %607 = vmatpush.bf16.msrb.mxu1 %v2227_v7  ;;  %525 = vmatmul.bf16.vlgmr.msra.gmra.mxu2 %v2079_v55 }
  0x55   : > { %538 = vmatmul.bf16.vlgmr.msra.gmra.mxu3 %v2079_v55  ;;  %620 = vmatpush.bf16.msrb.mxu2 %v2229_v8 }
  0x56   : > { %633 = vmatpush.bf16.msrb.mxu3 %v2232_v12  ;;  %1194 = vperm.xlu0 %1796, %v1192_v59  }
  0x57   : > { %595 = vmatpush.bf16.msrb.mxu0 %v2236_v16 }
  0x58   : > { %608 = vmatpush.bf16.msrb.mxu1 %v2238_v17 }
  0x59   : > { %621 = vmatpush.bf16.msrb.mxu2 %v2241_v21 }
  0x5a   : > { %634 = vmatpush.bf16.msrb.mxu3 %v2243_v25 }
  0x5b   : > { %596 = vmatpush.bf16.msrb.mxu0 %v2246_v29 }
  0x5c   : > { %609 = vmatpush.bf16.msrb.mxu1 %v2250_v33 }
  0x5d   : > { %622 = vmatpush.bf16.msrb.mxu2 %v2252_v34 }
  0x5e   : > { %635 = vmatpush.bf16.msrb.mxu3 %v2255_v38 }
  0x5f   : > { %597 = vmatpush.bf16.msrb.mxu0 %v2258_v44 }
  0x60   : > { %610 = vmatpush.bf16.msrb.mxu1 %v2262_v45 }
  0x61   : > { %623 = vmatpush.bf16.msrb.mxu2 %v2264_v46 }
  0x62   : > { %636 = vmatpush.bf16.msrb.mxu3 %v2267_v50 }
  0x63   : > { %598 = vmatpush.bf16.msrb.mxu0 %v2271_v56 }
  0x64   : > { %611 = vmatpush.bf16.msrb.mxu1 %v2276_v57 }
  0x65   : > { %624 = vmatpush.bf16.msrb.mxu2 %v2278_v58 }
  0x66   : > { %637 = vmatpush.bf16.msrb.mxu3 %v2281_v62 }
  0x67   : > { %599 = vmatpush.bf16.msrb.mxu0 %v2287_v5 }
  0x68   : > { %612 = vmatpush.bf16.msrb.mxu1 %v2291_v10 }
  0x69   : > { %625 = vmatpush.bf16.msrb.mxu2 %v2293_v11 }
  0x6a   : > { %638 = vmatpush.bf16.msrb.mxu3 %v2296_v18 }
  0x6b   : > { %600 = vmatpush.bf16.msrb.mxu0 %v2311_v27 }
  0x6c   : > { %613 = vmatpush.bf16.msrb.mxu1 %v2318_v30 }
  0x6d   : > { %626 = vmatpush.bf16.msrb.mxu2 %v2320_v31 }
  0x6e   : > { %639 = vmatpush.bf16.msrb.mxu3 %v2324_v39 }
  0x6f   : > { %601 = vmatpush.bf16.msrb.mxu0 %v2328_v48 }
  0x70   : > { %614 = vmatpush.bf16.msrb.mxu1 %v2333_v49 }
  0x71   : > { %627 = vmatpush.bf16.msrb.mxu2 %v2335_v51 }
  0x72   : > { %640 = vmatpush.bf16.msrb.mxu3 %v2338_v52 }
  0x73   : > { %698 = vmatpush.bf16.msra.mxu0 %v2225_v3 }
  0x74   : > { %711 = vmatpush.bf16.msra.mxu1 %v2227_v7 }
  0x75   : > { %724 = vmatpush.bf16.msra.mxu2 %v2229_v8 }
  0x76   : > { %737 = vmatpush.bf16.msra.mxu3 %v2232_v12 }
  0x77   : > { %699 = vmatpush.bf16.msra.mxu0 %v2236_v16 }
  0x78   : > { %712 = vmatpush.bf16.msra.mxu1 %v2238_v17 }
  0x79   : > { %725 = vmatpush.bf16.msra.mxu2 %v2241_v21 }
  0x7a   : > { %738 = vmatpush.bf16.msra.mxu3 %v2243_v25 }
  0x7b   : > { %700 = vmatpush.bf16.msra.mxu0 %v2246_v29 }
  0x7c   : > { %713 = vmatpush.bf16.msra.mxu1 %v2250_v33 }
  0x7d   : > { %726 = vmatpush.bf16.msra.mxu2 %v2252_v34 }
  0x7e   : > { %739 = vmatpush.bf16.msra.mxu3 %v2255_v38 }
  0x7f   : > { %701 = vmatpush.bf16.msra.mxu0 %v2258_v44 }
  0x80   : > { %714 = vmatpush.bf16.msra.mxu1 %v2262_v45 }
  0x81   : > { %727 = vmatpush.bf16.msra.mxu2 %v2264_v46 }
  0x82   : > { %740 = vmatpush.bf16.msra.mxu3 %v2267_v50 }
  0x83   : > { %702 = vmatpush.bf16.msra.mxu0 %v2271_v56 }
  0x84   : > { %715 = vmatpush.bf16.msra.mxu1 %v2276_v57 }
  0x85   : > { %728 = vmatpush.bf16.msra.mxu2 %v2278_v58 }
  0x86   : > { %741 = vmatpush.bf16.msra.mxu3 %v2281_v62 }
  0x87   : > { %703 = vmatpush.bf16.msra.mxu0 %v2287_v5 }
  0x88   : > { %716 = vmatpush.bf16.msra.mxu1 %v2291_v10 }
  0x89   : > { %729 = vmatpush.bf16.msra.mxu2 %v2293_v11 }
  0x8a   : > { %742 = vmatpush.bf16.msra.mxu3 %v2296_v18 }
  0x8b   : > { %704 = vmatpush.bf16.msra.mxu0 %v2311_v27 }
  0x8c   : > { %717 = vmatpush.bf16.msra.mxu1 %v2318_v30 }
  0x8d   : > { %730 = vmatpush.bf16.msra.mxu2 %v2320_v31 }
  0x8e   : > { %743 = vmatpush.bf16.msra.mxu3 %v2324_v39 }
  0x8f   : > { %705 = vmatpush.bf16.msra.mxu0 %v2328_v48 }
  0x90   : > { %718 = vmatpush.bf16.msra.mxu1 %v2333_v49 }
  0x91   : > { %731 = vmatpush.bf16.msra.mxu2 %v2335_v51 }
  0x92   : > { %744 = vmatpush.bf16.msra.mxu3 %v2338_v52 }
  0xcf   : > { %v500_v0 = vpop.f32.mrf.mxu0 }
  0xd0   : > { %v543_v1 = vadd.f32 %v500_v0, %v326_v61  ;;  %v513_v2 = vpop.f32.mrf.mxu1 }
  0xd1   : > { %v544_v4 = vadd.f32 %v513_v2, %v327_v63  ;;  %v573_v2 = vpop.permute.xlu0 %572 }
  0xd2   : > { %v547_v9 = vsub.f32 0.0, %v543_v1  ;;  %vm574_vm3 = vcmp.eq.s32.totalorder %v573_v2, 1 }
  0xd3   : > { %v552_v13 = vsub.f32 0.0, %v544_v4  ;;  %vm1708_vm4 = vmpackc.low %vm574_vm3, %vm574_vm3 }
  0xd4   : > { %v548_v14 = vmul.f32 1.442695, %v547_v9 }
  0xd5   : > { %v553_v19 = vmul.f32 1.442695, %v552_v13 }
  0xd6   : > { %1799 = vpow2.f32 %v548_v14 }
  0xd7   : > { %v526_v23 = vpop.f32.mrf.mxu2  ;;  %1801 = vpow2.f32 %v553_v19  ;;  %v502_v28 = vpop.f32.mrf.mxu0 }
  0xd8   : > { %v539_v24 = vpop.f32.mrf.mxu3  ;;  %v515_v35 = vpop.f32.mrf.mxu1  ;;  %v545_v36 = vadd.f32 %v526_v23, %v328_v20  ;;  %v587_v20 = vld [vmem:[%s586_s20] sm:$0xff] }
  0xd9   : > { %v546_v32 = vadd.f32 %v539_v24, %v329_v15  ;;  %v589_v23 = vunpack.c.l.bf16 %v587_v20  ;;  %v590_v24 = vunpack.c.h.bf16 %v587_v20 }
  0xda   : > { %1803 = vtanh.f32 %v545_v36 }
  0xdb   : > { %v558_v37 = vsub.f32 0.0, %v546_v32 }
  0xdc   : > { %v1800_v40 = vpop.eup %1799 }
  0xdd   : > { %v559_v41 = vmul.f32 1.442695, %v558_v37  ;;  %v1802_v42 = vpop.eup %1801  ;;  %v550_v43 = vadd.f32 1.0, %v1800_v40  ;;  %v588_v37 = vld [vmem:[%s586_s20 + $0x8] sm:$0xff]  ;;  %s1643_s20 = sshll.u32 %s2465_s5, 3 }
  0xde   : > { %v555_v47 = vadd.f32 1.0, %v1802_v42  ;;  %v592_v42 = vunpack.c.h.bf16 %v588_v37  ;;  %s786_s23 = scalar_lea.vmem %s2421_s9, %s1643_s20 [#allocation9] }
  0xdf   : > { %1805 = vpow2.f32 %v559_v41  ;;  %v528_v53 = vpop.f32.mrf.mxu2 }
  0xe0   : > { %1807 = vrcp.f32 %v550_v43  ;;  %v541_v54 = vpop.f32.mrf.mxu3  ;;  %v1804_v55 = vpop.eup %1803  ;;  %v591_v53 = vunpack.c.l.bf16 %v588_v37 }
  0xe1   : > { %1809 = vrcp.f32 %v555_v47 }
  0xe5   : > { %v1806_v59 = vpop.eup %1805 }
  0xe6   : > { %v1808_v60 = vpop.eup %1807  ;;  %v561_v61 = vadd.f32 1.0, %v1806_v59 }
  0xe7   : > { %v1810_v63 = vpop.eup %1809  ;;  %v564_v0 = vmul.f32 %v1808_v60, %v1804_v55 }
  0xe8   : > { %v563_v1 = vmul.f32 0.0, %v1810_v63  ;;  %1811 = vrcp.f32 %v561_v61  ;;  %v775_v63 = vstv %s2465_s5  ;;  %s1648_s5 = sshll.u32 %s2284_s11, 2 }
  0xe9   : > { %vm776_vm5 = vcmp.lt.s32.totalorder %v775_v63, %v2301_v22 }
  0xea   : > { %v565_v4 = vadd.f32 %v564_v0, %v563_v1  ;;  %v777_v2 = vsel %vm776_vm5, 1, %v2078_v26 }
  0xeb   : > { %779 = vperm.xlu1 %1797, %v777_v2  }
  0xec   : > { %1813 = vtanh.f32 %v565_v4  ;;  %v2417_v6 = vsel %vm574_vm3, %v565_v4, 0.0  ;;  %v879_v4 = vstv %s2467_s6 }
  0xed   : > { %vm880_vm6 = vcmp.lt.s32.totalorder %v879_v4, %v2301_v22 }
  0xee   : > { %v1812_v9 = vpop.eup %1811 }
  0xf2   : > { %v1814_v13 = vpop.eup %1813 }
  0xf3   : > { %v567_v14 = vmul.f32 %v1814_v13, %v1812_v9 }
  0xf5   : > { %v2424_v15 = vsel %vm574_vm3, %v567_v14, 0.0  ;;  %v1709_v19 = vpack.c.bf16 %v567_v14, %v567_v14 }
  0xf6   : > { %580 = vst [vmem:[%s579_s24] sm:$0xff] %v2424_v15  ;;  %s682_s24 = scalar_lea.vmem %s2421_s9, %s1639_s8 [#allocation9]  ;;  %s1652_s8 = sshll.u32 %s2065_s15, 1 }
  0xf7   : > { %1710 = vmatmul.msk.bf16.vlgmr.msrb.gmra.mxu0 %vm1708_vm4, %v1709_v19  ;;  %1713 = vmatmul.msk.bf16.vlgmr.msrb.gmra.mxu1 %vm1708_vm4, %v1709_v19 }
  0xf8   : > { %1716 = vmatmul.msk.bf16.vlgmr.msrb.gmra.mxu2 %vm1708_vm4, %v1709_v19  ;;  %1719 = vmatmul.msk.bf16.vlgmr.msrb.gmra.mxu3 %vm1708_vm4, %v1709_v19 }
  0xf9   : > { %802 = vmatpush.bf16.msrb.mxu0 %v2225_v3  ;;  %815 = vmatpush.bf16.msrb.mxu1 %v2227_v7 }
  0xfa   : > { %828 = vmatpush.bf16.msrb.mxu2 %v2229_v8  ;;  %841 = vmatpush.bf16.msrb.mxu3 %v2232_v12 }
  0xfd   : > { %803 = vmatpush.bf16.msrb.mxu0 %v2236_v16  ;;  %816 = vmatpush.bf16.msrb.mxu1 %v2238_v17 }
  0xfe   : > { %829 = vmatpush.bf16.msrb.mxu2 %v2241_v21  ;;  %842 = vmatpush.bf16.msrb.mxu3 %v2243_v25 }
 0x101   : > { %804 = vmatpush.bf16.msrb.mxu0 %v2246_v29  ;;  %817 = vmatpush.bf16.msrb.mxu1 %v2250_v33 }
 0x102   : > { %830 = vmatpush.bf16.msrb.mxu2 %v2252_v34  ;;  %843 = vmatpush.bf16.msrb.mxu3 %v2255_v38 }
 0x105   : > { %805 = vmatpush.bf16.msrb.mxu0 %v2258_v44  ;;  %818 = vmatpush.bf16.msrb.mxu1 %v2262_v45 }
 0x106   : > { %831 = vmatpush.bf16.msrb.mxu2 %v2264_v46  ;;  %844 = vmatpush.bf16.msrb.mxu3 %v2267_v50 }
 0x109   : > { %806 = vmatpush.bf16.msrb.mxu0 %v2271_v56  ;;  %819 = vmatpush.bf16.msrb.mxu1 %v2276_v57 }
 0x10a   : > { %832 = vmatpush.bf16.msrb.mxu2 %v2278_v58  ;;  %845 = vmatpush.bf16.msrb.mxu3 %v2281_v62 }
 0x10d   : > { %807 = vmatpush.bf16.msrb.mxu0 %v2287_v5  ;;  %820 = vmatpush.bf16.msrb.mxu1 %v2291_v10 }
 0x10e   : > { %833 = vmatpush.bf16.msrb.mxu2 %v2293_v11  ;;  %846 = vmatpush.bf16.msrb.mxu3 %v2296_v18 }
 0x111   : > { %808 = vmatpush.bf16.msrb.mxu0 %v2311_v27  ;;  %821 = vmatpush.bf16.msrb.mxu1 %v2318_v30 }
 0x112   : > { %834 = vmatpush.bf16.msrb.mxu2 %v2320_v31  ;;  %847 = vmatpush.bf16.msrb.mxu3 %v2324_v39 }
 0x115   : > { %809 = vmatpush.bf16.msrb.mxu0 %v2328_v48  ;;  %822 = vmatpush.bf16.msrb.mxu1 %v2333_v49 }
 0x116   : > { %835 = vmatpush.bf16.msrb.mxu2 %v2335_v51  ;;  %848 = vmatpush.bf16.msrb.mxu3 %v2338_v52 }
 0x174   : > { %v603_v28 = vpop.f32.mrf.mxu0  ;;  %v616_v32 = vpop.f32.mrf.mxu1 }
 0x175   : > { %v646_v35 = vadd.f32 %v603_v28, %v589_v23  ;;  %v647_v36 = vadd.f32 %v616_v32, %v590_v24  ;;  %v881_v28 = vsel %vm880_vm6, 1, %v2078_v26  ;;  %v1292_v32 = vstv %s1203_s7  ;;  %s996_s7 = smul.u32 5, %s2284_s11 }
 0x176   : > { %883 = vperm.xlu1 %1797, %v881_v28   ;;  %vm1293_vm7 = vcmp.lt.s32.totalorder %v1292_v32, %v2301_v22 }
 0x177   : > { %v650_v40 = vsub.f32 0.0, %v646_v35  ;;  %v655_v41 = vsub.f32 0.0, %v647_v36  ;;  %s2574_s18 = sadd.s32 %s1652_s8, %s996_s7 }
 0x178   : > { %s1655_s7 = sshll.u32 %s2574_s18, 3 }
 0x179   : > { %v651_v43 = vmul.f32 1.442695, %v650_v40  ;;  %v656_v47 = vmul.f32 1.442695, %v655_v41  ;;  %s1098_s8 = scalar_lea.vmem %s2421_s9, %s1655_s7 [#allocation9] }
 0x17b   : > { %1815 = vpow2.f32 %v651_v43  ;;  %v629_v54 = vpop.f32.mrf.mxu2  ;;  %v642_v55 = vpop.f32.mrf.mxu3 }
 0x17c   : > { %1817 = vpow2.f32 %v656_v47  ;;  %v649_v59 = vadd.f32 %v642_v55, %v592_v42  ;;  %v605_v60 = vpop.f32.mrf.mxu0  ;;  %v618_v61 = vpop.f32.mrf.mxu1  ;;  %v648_v1 = vadd.f32 %v629_v54, %v591_v53  ;;  %v1294_v47 = vsel %vm1293_vm7, 1, %v2078_v26 }
 0x17d   : > { %v676_v53 = vpop.permute.xlu0 %675 }
 0x17e   : > { %v661_v0 = vsub.f32 0.0, %v649_v59  ;;  %vm677_vm8 = vcmp.eq.s32.totalorder %v676_v53, 1  ;;  %1296 = vperm.xlu1 %1797, %v1294_v47  }
 0x180   : > { %v662_v9 = vmul.f32 1.442695, %v661_v0 }
 0x181   : > { %v1816_v13 = vpop.eup %1815 }
 0x182   : > { %v1818_v14 = vpop.eup %1817  ;;  %v653_v19 = vadd.f32 1.0, %v1816_v13  ;;  %1819 = vpow2.f32 %v662_v9 }
 0x183   : > { %v658_v20 = vadd.f32 1.0, %v1818_v14  ;;  %1821 = vtanh.f32 %v648_v1  ;;  %v631_v23 = vpop.f32.mrf.mxu2  ;;  %v644_v24 = vpop.f32.mrf.mxu3 }
 0x184   : > { %1823 = vrcp.f32 %v653_v19  ;;  %v692_v19 = vld [vmem:[%s690_s26 + $0x8] sm:$0xff] }
 0x185   : > { %1825 = vrcp.f32 %v658_v20  ;;  %v696_v24 = vunpack.c.h.bf16 %v692_v19 }
 0x188   : > { %v1820_v35 = vpop.eup %1819 }
 0x189   : > { %v1822_v36 = vpop.eup %1821  ;;  %v664_v42 = vadd.f32 1.0, %v1820_v35  ;;  %v695_v35 = vunpack.c.l.bf16 %v692_v19 }
 0x18a   : > { %v1824_v37 = vpop.eup %1823 }
 0x18b   : > { %v1826_v40 = vpop.eup %1825  ;;  %v667_v41 = vmul.f32 %v1824_v37, %v1822_v36  ;;  %1827 = vrcp.f32 %v664_v42 }
 0x18c   : > { %v666_v43 = vmul.f32 %v1826_v40, %v2417_v6 }
 0x18e   : > { %v668_v54 = vadd.f32 %v667_v41, %v666_v43 }
 0x190   : > { %1829 = vtanh.f32 %v668_v54  ;;  %v2480_v55 = vsel %vm677_vm8, %v668_v54, %v2417_v6  ;;  %v691_v6 = vld [vmem:[%s690_s26] sm:$0xff]  ;;  %s1647_s26 = sshll.u32 %s2467_s6, 3 }
 0x191   : > { %v1828_v59 = vpop.eup %1827  ;;  %v694_v2 = vunpack.c.h.bf16 %v691_v6  ;;  %s890_s20 = scalar_lea.vmem %s2421_s9, %s1647_s26 [#allocation9] }
 0x196   : > { %v1830_v60 = vpop.eup %1829 }
 0x197   : > { %v670_v61 = vmul.f32 %v1830_v60, %v1828_v59 }
 0x199   : > { %v680_v63 = vsel %vm677_vm8, %v670_v61, 0.0  ;;  %v2485_v0 = vsel %vm677_vm8, %v670_v61, %v2424_v15  ;;  %v693_v15 = vunpack.c.l.bf16 %v691_v6 }
 0x19a   : > { %683 = vst [vmem:[%s682_s24] sm:$0xff] %v680_v63  ;;  %v697_v1 = vpack.c.bf16 %v2485_v0, %v2485_v0  ;;  %s2572_s24 = sadd.s32 %s1648_s5, %s893_s30  ;;  %s1705_s30 = sshll.u32 %s2574_s18, 4 }
 0x19b   : > { %s1704_s6 = sshll.u32 %s2572_s24, 4  ;;  %s1651_s19 = sshll.u32 %s2572_s24, 3 }
 0x19c   : > { %706 = vmatmul.bf16.vlgmr.msra.gmra.mxu0 %v697_v1  ;;  %719 = vmatmul.bf16.vlgmr.msra.gmra.mxu1 %v697_v1  ;;  %s1002_s5 = scalar_lea.vmem %s2215_s27, %s1705_s30 [#allocation4]  ;;  %s1661_s30 = smul.u32 56, %s2284_s11 }
 0x19d   : > { %732 = vmatmul.bf16.vlgmr.msra.gmra.mxu2 %v697_v1  ;;  %745 = vmatmul.bf16.vlgmr.msra.gmra.mxu3 %v697_v1 }
 0x19e   : > { %906 = vmatpush.bf16.msra.mxu0 %v2225_v3  ;;  %919 = vmatpush.bf16.msra.mxu1 %v2227_v7 }
 0x19f   : > { %932 = vmatpush.bf16.msra.mxu2 %v2229_v8  ;;  %945 = vmatpush.bf16.msra.mxu3 %v2232_v12 }
 0x1a2   : > { %907 = vmatpush.bf16.msra.mxu0 %v2236_v16  ;;  %920 = vmatpush.bf16.msra.mxu1 %v2238_v17 }
 0x1a3   : > { %933 = vmatpush.bf16.msra.mxu2 %v2241_v21  ;;  %946 = vmatpush.bf16.msra.mxu3 %v2243_v25 }
 0x1a6   : > { %908 = vmatpush.bf16.msra.mxu0 %v2246_v29  ;;  %921 = vmatpush.bf16.msra.mxu1 %v2250_v33 }
 0x1a7   : > { %934 = vmatpush.bf16.msra.mxu2 %v2252_v34  ;;  %947 = vmatpush.bf16.msra.mxu3 %v2255_v38 }
 0x1aa   : > { %909 = vmatpush.bf16.msra.mxu0 %v2258_v44  ;;  %922 = vmatpush.bf16.msra.mxu1 %v2262_v45 }
 0x1ab   : > { %935 = vmatpush.bf16.msra.mxu2 %v2264_v46  ;;  %948 = vmatpush.bf16.msra.mxu3 %v2267_v50 }
 0x1ae   : > { %910 = vmatpush.bf16.msra.mxu0 %v2271_v56  ;;  %923 = vmatpush.bf16.msra.mxu1 %v2276_v57 }
 0x1af   : > { %936 = vmatpush.bf16.msra.mxu2 %v2278_v58  ;;  %949 = vmatpush.bf16.msra.mxu3 %v2281_v62 }
 0x1b2   : > { %911 = vmatpush.bf16.msra.mxu0 %v2287_v5  ;;  %924 = vmatpush.bf16.msra.mxu1 %v2291_v10 }
 0x1b3   : > { %937 = vmatpush.bf16.msra.mxu2 %v2293_v11  ;;  %950 = vmatpush.bf16.msra.mxu3 %v2296_v18 }
 0x1b6   : > { %912 = vmatpush.bf16.msra.mxu0 %v2311_v27  ;;  %925 = vmatpush.bf16.msra.mxu1 %v2318_v30 }
 0x1b7   : > { %938 = vmatpush.bf16.msra.mxu2 %v2320_v31  ;;  %951 = vmatpush.bf16.msra.mxu3 %v2324_v39 }
 0x1ba   : > { %913 = vmatpush.bf16.msra.mxu0 %v2328_v48  ;;  %926 = vmatpush.bf16.msra.mxu1 %v2333_v49 }
 0x1bb   : > { %939 = vmatpush.bf16.msra.mxu2 %v2335_v51  ;;  %952 = vmatpush.bf16.msra.mxu3 %v2338_v52 }
 0x219   : > { %v707_v4 = vpop.f32.mrf.mxu0  ;;  %v720_v9 = vpop.f32.mrf.mxu1 }
 0x21a   : > { %v750_v13 = vadd.f32 %v707_v4, %v693_v15  ;;  %v751_v14 = vadd.f32 %v720_v9, %v694_v2 }
 0x21c   : > { %v754_v20 = vsub.f32 0.0, %v750_v13  ;;  %v759_v23 = vsub.f32 0.0, %v751_v14  ;;  %v780_v14 = vpop.permute.xlu1 %779 }
 0x21d   : > { %vm781_vm9 = vcmp.eq.s32.totalorder %v780_v14, 1 }
 0x21e   : > { %v755_v28 = vmul.f32 1.442695, %v754_v20  ;;  %v760_v32 = vmul.f32 1.442695, %v759_v23 }
 0x220   : > { %1831 = vpow2.f32 %v755_v28  ;;  %v733_v36 = vpop.f32.mrf.mxu2  ;;  %v746_v37 = vpop.f32.mrf.mxu3 }
 0x221   : > { %1833 = vpow2.f32 %v760_v32  ;;  %v753_v40 = vadd.f32 %v746_v37, %v696_v24  ;;  %v709_v41 = vpop.f32.mrf.mxu0  ;;  %v722_v42 = vpop.f32.mrf.mxu1  ;;  %v752_v47 = vadd.f32 %v733_v36, %v695_v35 }
 0x223   : > { %v765_v43 = vsub.f32 0.0, %v753_v40 }
 0x225   : > { %v766_v53 = vmul.f32 1.442695, %v765_v43 }
 0x226   : > { %v1832_v54 = vpop.eup %1831 }
 0x227   : > { %v1834_v59 = vpop.eup %1833  ;;  %v757_v60 = vadd.f32 1.0, %v1832_v54  ;;  %1835 = vpow2.f32 %v766_v53  ;;  %v796_v53 = vld [vmem:[%s794_s28 + $0x8] sm:$0xff] }
 0x228   : > { %v762_v61 = vadd.f32 1.0, %v1834_v59  ;;  %1837 = vtanh.f32 %v752_v47  ;;  %v735_v63 = vpop.f32.mrf.mxu2  ;;  %v748_v1 = vpop.f32.mrf.mxu3 }
 0x229   : > { %1839 = vrcp.f32 %v757_v60  ;;  %v800_v60 = vunpack.c.h.bf16 %v796_v53  ;;  %v799_v1 = vunpack.c.l.bf16 %v796_v53 }
 0x22a   : > { %1841 = vrcp.f32 %v762_v61 }
 0x22d   : > { %v1836_v6 = vpop.eup %1835 }
 0x22e   : > { %v1838_v15 = vpop.eup %1837  ;;  %v768_v13 = vadd.f32 1.0, %v1836_v6 }
 0x22f   : > { %v1840_v2 = vpop.eup %1839 }
 0x230   : > { %v1842_v4 = vpop.eup %1841  ;;  %v771_v9 = vmul.f32 %v1840_v2, %v1838_v15  ;;  %1843 = vrcp.f32 %v768_v13  ;;  %v983_v13 = vstv %s2572_s24  ;;  %s1706_s24 = sshll.u32 %s2341_s4, 4 }
 0x231   : > { %v770_v19 = vmul.f32 %v1842_v4, %v2480_v55  ;;  %vm984_vm10 = vcmp.lt.s32.totalorder %v983_v13, %v2301_v22  ;;  %s1105_s26 = scalar_lea.vmem %s2215_s27, %s1706_s24 [#allocation4] }
 0x233   : > { %v772_v20 = vadd.f32 %v771_v9, %v770_v19 }
 0x235   : > { %1845 = vtanh.f32 %v772_v20  ;;  %v2525_v23 = vsel %vm781_vm9, %v772_v20, %v2480_v55  ;;  %v795_v55 = vld [vmem:[%s794_s28] sm:$0xff]  ;;  %v985_v20 = vsel %vm984_vm10, 1, %v2078_v26  ;;  %s994_s28 = scalar_lea.vmem %s2421_s9, %s1651_s19 [#allocation9] }
 0x236   : > { %v1844_v24 = vpop.eup %1843  ;;  %v798_v40 = vunpack.c.h.bf16 %v795_v55  ;;  %987 = vperm.xlu2 %1798, %v985_v20  }
 0x23b   : > { %v1846_v28 = vpop.eup %1845 }
 0x23c   : > { %v774_v32 = vmul.f32 %v1846_v28, %v1844_v24  ;;  %v1087_v24 = vstv %s2574_s18  ;;  %s1658_s18 = sshll.u32 %s2341_s4, 3 }
 0x23d   : > { %vm1088_vm11 = vcmp.lt.s32.totalorder %v1087_v24, %v2301_v22  ;;  %v884_v22 = vpop.permute.xlu1 %883 }
 0x23e   : > { %v2530_v35 = vsel %vm781_vm9, %v774_v32, %v2485_v0  ;;  %v784_v36 = vsel %vm781_vm9, %v774_v32, 0.0  ;;  %v797_v0 = vunpack.c.l.bf16 %v795_v55  ;;  %vm885_vm12 = vcmp.eq.s32.totalorder %v884_v22, 1 }
 0x23f   : > { %787 = vst [vmem:[%s786_s23] sm:$0xff] %v784_v36  ;;  %v801_v37 = vpack.c.bf16 %v2530_v35, %v2530_v35  ;;  %s898_s23 = scalar_lea.vmem %s2215_s27, %s1704_s6 [#allocation4]  ;;  %s1707_s6 = smul.u32 112, %s2284_s11 }
 0x240   : > { %v900_v24 = vld [vmem:[%s898_s23 + $0x8] sm:$0xff] }
 0x241   : > { %810 = vmatmul.bf16.vlgmr.msrb.gmra.mxu0 %v801_v37  ;;  %823 = vmatmul.bf16.vlgmr.msrb.gmra.mxu1 %v801_v37 }
 0x242   : > { %836 = vmatmul.bf16.vlgmr.msrb.gmra.mxu2 %v801_v37  ;;  %849 = vmatmul.bf16.vlgmr.msrb.gmra.mxu3 %v801_v37 }
 0x243   : > { %1010 = vmatpush.bf16.msrb.mxu0 %v2225_v3  ;;  %1023 = vmatpush.bf16.msrb.mxu1 %v2227_v7 }
 0x244   : > { %1036 = vmatpush.bf16.msrb.mxu2 %v2229_v8  ;;  %1049 = vmatpush.bf16.msrb.mxu3 %v2232_v12 }
 0x247   : > { %1011 = vmatpush.bf16.msrb.mxu0 %v2236_v16  ;;  %1024 = vmatpush.bf16.msrb.mxu1 %v2238_v17 }
 0x248   : > { %1037 = vmatpush.bf16.msrb.mxu2 %v2241_v21  ;;  %1050 = vmatpush.bf16.msrb.mxu3 %v2243_v25 }
 0x24b   : > { %1012 = vmatpush.bf16.msrb.mxu0 %v2246_v29  ;;  %1025 = vmatpush.bf16.msrb.mxu1 %v2250_v33 }
 0x24c   : > { %1038 = vmatpush.bf16.msrb.mxu2 %v2252_v34  ;;  %1051 = vmatpush.bf16.msrb.mxu3 %v2255_v38 }
 0x24f   : > { %1013 = vmatpush.bf16.msrb.mxu0 %v2258_v44  ;;  %1026 = vmatpush.bf16.msrb.mxu1 %v2262_v45 }
 0x250   : > { %1039 = vmatpush.bf16.msrb.mxu2 %v2264_v46  ;;  %1052 = vmatpush.bf16.msrb.mxu3 %v2267_v50 }
 0x253   : > { %1014 = vmatpush.bf16.msrb.mxu0 %v2271_v56  ;;  %1027 = vmatpush.bf16.msrb.mxu1 %v2276_v57 }
 0x254   : > { %1040 = vmatpush.bf16.msrb.mxu2 %v2278_v58  ;;  %1053 = vmatpush.bf16.msrb.mxu3 %v2281_v62 }
 0x257   : > { %1015 = vmatpush.bf16.msrb.mxu0 %v2287_v5  ;;  %1028 = vmatpush.bf16.msrb.mxu1 %v2291_v10 }
 0x258   : > { %1041 = vmatpush.bf16.msrb.mxu2 %v2293_v11  ;;  %1054 = vmatpush.bf16.msrb.mxu3 %v2296_v18 }
 0x25b   : > { %1016 = vmatpush.bf16.msrb.mxu0 %v2311_v27  ;;  %1029 = vmatpush.bf16.msrb.mxu1 %v2318_v30 }
 0x25c   : > { %1042 = vmatpush.bf16.msrb.mxu2 %v2320_v31  ;;  %1055 = vmatpush.bf16.msrb.mxu3 %v2324_v39 }
 0x25f   : > { %1017 = vmatpush.bf16.msrb.mxu0 %v2328_v48  ;;  %1030 = vmatpush.bf16.msrb.mxu1 %v2333_v49 }
 0x260   : > { %1043 = vmatpush.bf16.msrb.mxu2 %v2335_v51  ;;  %1056 = vmatpush.bf16.msrb.mxu3 %v2338_v52 }
 0x2be   : > { %v811_v41 = vpop.f32.mrf.mxu0  ;;  %v824_v42 = vpop.f32.mrf.mxu1 }
 0x2bf   : > { %v854_v43 = vadd.f32 %v811_v41, %v797_v0  ;;  %v855_v47 = vadd.f32 %v824_v42, %v798_v40  ;;  %v1089_v41 = vsel %vm1088_vm11, 1, %v2078_v26 }
 0x2c0   : > { %1091 = vperm.xlu2 %1798, %v1089_v41  }
 0x2c1   : > { %v858_v54 = vsub.f32 0.0, %v854_v43  ;;  %v863_v59 = vsub.f32 0.0, %v855_v47 }
 0x2c3   : > { %v859_v61 = vmul.f32 1.442695, %v858_v54  ;;  %v864_v63 = vmul.f32 1.442695, %v863_v59 }
 0x2c5   : > { %1847 = vpow2.f32 %v859_v61  ;;  %v837_v6 = vpop.f32.mrf.mxu2  ;;  %v850_v15 = vpop.f32.mrf.mxu3 }
 0x2c6   : > { %1849 = vpow2.f32 %v864_v63  ;;  %v857_v2 = vadd.f32 %v850_v15, %v800_v60  ;;  %v813_v4 = vpop.f32.mrf.mxu0  ;;  %v826_v9 = vpop.f32.mrf.mxu1  ;;  %v856_v19 = vadd.f32 %v837_v6, %v799_v1 }
 0x2c8   : > { %v869_v14 = vsub.f32 0.0, %v857_v2 }
 0x2ca   : > { %v870_v28 = vmul.f32 1.442695, %v869_v14 }
 0x2cb   : > { %v1848_v32 = vpop.eup %1847 }
 0x2cc   : > { %v1850_v36 = vpop.eup %1849  ;;  %v861_v37 = vadd.f32 1.0, %v1848_v32  ;;  %1851 = vpow2.f32 %v870_v28 }
 0x2cd   : > { %v866_v55 = vadd.f32 1.0, %v1850_v36  ;;  %1853 = vtanh.f32 %v856_v19  ;;  %v839_v0 = vpop.f32.mrf.mxu2  ;;  %v852_v40 = vpop.f32.mrf.mxu3  ;;  %v904_v36 = vunpack.c.h.bf16 %v900_v24 }
 0x2ce   : > { %1855 = vrcp.f32 %v861_v37  ;;  %v903_v0 = vunpack.c.l.bf16 %v900_v24 }
 0x2cf   : > { %1857 = vrcp.f32 %v866_v55 }
 0x2d2   : > { %v1852_v42 = vpop.eup %1851 }
 0x2d3   : > { %v1854_v43 = vpop.eup %1853  ;;  %v872_v59 = vadd.f32 1.0, %v1852_v42 }
 0x2d4   : > { %v1856_v47 = vpop.eup %1855 }
 0x2d5   : > { %v1858_v53 = vpop.eup %1857  ;;  %v875_v54 = vmul.f32 %v1856_v47, %v1854_v43  ;;  %1859 = vrcp.f32 %v872_v59 }
 0x2d6   : > { %v874_v60 = vmul.f32 %v1858_v53, %v2525_v23 }
 0x2d8   : > { %v876_v61 = vadd.f32 %v875_v54, %v874_v60 }
 0x2da   : > { %1861 = vtanh.f32 %v876_v61  ;;  %v2584_v63 = vsel %vm885_vm12, %v876_v61, %v2525_v23  ;;  %v899_v23 = vld [vmem:[%s898_s23] sm:$0xff]  ;;  %s1207_s23 = scalar_lea.vmem %s2215_s27, %s1707_s6 [#allocation4]  ;;  %s1663_s27 = sshll.u32 %s2065_s15, 3 }
 0x2db   : > { %v1860_v26 = vpop.eup %1859  ;;  %v902_v9 = vunpack.c.h.bf16 %v899_v23  ;;  %s1308_s15 = scalar_lea.sflag [#allocation6], %s2211_s10 }
 0x2e0   : > { %v1862_v1 = vpop.eup %1861 }
 0x2e1   : > { %v878_v6 = vmul.f32 %v1862_v1, %v1860_v26 }
 0x2e3   : > { %v888_v15 = vsel %vm885_vm12, %v878_v6, 0.0  ;;  %v2589_v2 = vsel %vm885_vm12, %v878_v6, %v2530_v35  ;;  %v901_v35 = vunpack.c.l.bf16 %v899_v23 }
 0x2e4   : > { %891 = vst [vmem:[%s890_s20] sm:$0xff] %v888_v15  ;;  %v905_v4 = vpack.c.bf16 %v2589_v2, %v2589_v2  ;;  %s1201_s20 = scalar_lea.vmem %s2421_s9, %s1658_s18 [#allocation9] }
 0x2e6   : > { %914 = vmatmul.bf16.vlgmr.msra.gmra.mxu0 %v905_v4  ;;  %927 = vmatmul.bf16.vlgmr.msra.gmra.mxu1 %v905_v4 }
 0x2e7   : > { %940 = vmatmul.bf16.vlgmr.msra.gmra.mxu2 %v905_v4  ;;  %953 = vmatmul.bf16.vlgmr.msra.gmra.mxu3 %v905_v4 }
 0x2e8   : > { %1113 = vmatpush.bf16.msra.mxu0 %v2225_v3  ;;  %1126 = vmatpush.bf16.msra.mxu1 %v2227_v7 }
 0x2e9   : > { %1139 = vmatpush.bf16.msra.mxu2 %v2229_v8  ;;  %1152 = vmatpush.bf16.msra.mxu3 %v2232_v12 }
 0x2ec   : > { %1114 = vmatpush.bf16.msra.mxu0 %v2236_v16  ;;  %1127 = vmatpush.bf16.msra.mxu1 %v2238_v17 }
 0x2ed   : > { %1140 = vmatpush.bf16.msra.mxu2 %v2241_v21  ;;  %1153 = vmatpush.bf16.msra.mxu3 %v2243_v25 }
 0x2f0   : > { %1115 = vmatpush.bf16.msra.mxu0 %v2246_v29  ;;  %1128 = vmatpush.bf16.msra.mxu1 %v2250_v33 }
 0x2f1   : > { %1141 = vmatpush.bf16.msra.mxu2 %v2252_v34  ;;  %1154 = vmatpush.bf16.msra.mxu3 %v2255_v38 }
 0x2f4   : > { %1116 = vmatpush.bf16.msra.mxu0 %v2258_v44  ;;  %1129 = vmatpush.bf16.msra.mxu1 %v2262_v45 }
 0x2f5   : > { %1142 = vmatpush.bf16.msra.mxu2 %v2264_v46  ;;  %1155 = vmatpush.bf16.msra.mxu3 %v2267_v50 }
 0x2f8   : > { %1117 = vmatpush.bf16.msra.mxu0 %v2271_v56  ;;  %1130 = vmatpush.bf16.msra.mxu1 %v2276_v57 }
 0x2f9   : > { %1143 = vmatpush.bf16.msra.mxu2 %v2278_v58  ;;  %1156 = vmatpush.bf16.msra.mxu3 %v2281_v62 }
 0x2fc   : > { %1118 = vmatpush.bf16.msra.mxu0 %v2287_v5  ;;  %1131 = vmatpush.bf16.msra.mxu1 %v2291_v10 }
 0x2fd   : > { %1144 = vmatpush.bf16.msra.mxu2 %v2293_v11  ;;  %1157 = vmatpush.bf16.msra.mxu3 %v2296_v18 }
 0x300   : > { %1119 = vmatpush.bf16.msra.mxu0 %v2311_v27  ;;  %1132 = vmatpush.bf16.msra.mxu1 %v2318_v30 }
 0x301   : > { %1145 = vmatpush.bf16.msra.mxu2 %v2320_v31  ;;  %1158 = vmatpush.bf16.msra.mxu3 %v2324_v39 }
 0x304   : > { %1120 = vmatpush.bf16.msra.mxu0 %v2328_v48  ;;  %1133 = vmatpush.bf16.msra.mxu1 %v2333_v49 }
 0x305   : > { %1146 = vmatpush.bf16.msra.mxu2 %v2335_v51  ;;  %1159 = vmatpush.bf16.msra.mxu3 %v2338_v52 }
 0x363   : > { %v915_v13 = vpop.f32.mrf.mxu0  ;;  %v928_v14 = vpop.f32.mrf.mxu1 }
 0x364   : > { %v958_v19 = vadd.f32 %v915_v13, %v901_v35  ;;  %v959_v20 = vadd.f32 %v928_v14, %v902_v9  ;;  %v988_v35 = vpop.permute.xlu2 %987 }
 0x365   : > { %vm989_vm13 = vcmp.eq.s32.totalorder %v988_v35, 1  ;;  %v1107_v35 = vld [vmem:[%s1105_s26 + $0x8] sm:$0xff] }
 0x366   : > { %v962_v28 = vsub.f32 0.0, %v958_v19  ;;  %v967_v32 = vsub.f32 0.0, %v959_v20 }
 0x368   : > { %v963_v37 = vmul.f32 1.442695, %v962_v28  ;;  %v968_v55 = vmul.f32 1.442695, %v967_v32 }
 0x36a   : > { %1863 = vpow2.f32 %v963_v37  ;;  %v941_v40 = vpop.f32.mrf.mxu2  ;;  %v954_v41 = vpop.f32.mrf.mxu3 }
 0x36b   : > { %1865 = vpow2.f32 %v968_v55  ;;  %v961_v42 = vadd.f32 %v954_v41, %v904_v36  ;;  %v917_v43 = vpop.f32.mrf.mxu0  ;;  %v930_v47 = vpop.f32.mrf.mxu1  ;;  %v960_v54 = vadd.f32 %v941_v40, %v903_v0 }
 0x36c   : > { %v1092_v40 = vpop.permute.xlu2 %1091 }
 0x36d   : > { %v973_v53 = vsub.f32 0.0, %v961_v42  ;;  %vm1093_vm14 = vcmp.eq.s32.totalorder %v1092_v40, 1 }
 0x36f   : > { %v974_v59 = vmul.f32 1.442695, %v973_v53 }
 0x370   : > { %v1864_v60 = vpop.eup %1863 }
 0x371   : > { %v1866_v22 = vpop.eup %1865  ;;  %v965_v61 = vadd.f32 1.0, %v1864_v60  ;;  %1867 = vpow2.f32 %v974_v59 }
 0x372   : > { %v970_v26 = vadd.f32 1.0, %v1866_v22  ;;  %1869 = vtanh.f32 %v960_v54  ;;  %v943_v1 = vpop.f32.mrf.mxu2  ;;  %v956_v6 = vpop.f32.mrf.mxu3 }
 0x373   : > { %1871 = vrcp.f32 %v965_v61  ;;  %v1106_v61 = vld [vmem:[%s1105_s26] sm:$0xff] }
 0x374   : > { %1873 = vrcp.f32 %v970_v26  ;;  %v1108_v26 = vunpack.c.l.bf16 %v1106_v61  ;;  %v1109_v1 = vunpack.c.h.bf16 %v1106_v61 }
 0x377   : > { %v1868_v15 = vpop.eup %1867 }
 0x378   : > { %v1870_v4 = vpop.eup %1869  ;;  %v976_v14 = vadd.f32 1.0, %v1868_v15 }
 0x379   : > { %v1872_v23 = vpop.eup %1871 }
 0x37a   : > { %v1874_v9 = vpop.eup %1873  ;;  %v979_v13 = vmul.f32 %v1872_v23, %v1870_v4  ;;  %1875 = vrcp.f32 %v976_v14  ;;  %v1111_v14 = vunpack.c.h.bf16 %v1107_v35 }
 0x37b   : > { %v978_v19 = vmul.f32 %v1874_v9, %v2584_v63 }
 0x37d   : > { %v980_v20 = vadd.f32 %v979_v13, %v978_v19 }
 0x37f   : > { %1877 = vtanh.f32 %v980_v20  ;;  %v2629_v24 = vsel %vm989_vm13, %v980_v20, %v2584_v63 }
 0x380   : > { %v1876_v28 = vpop.eup %1875 }
 0x385   : > { %v1878_v32 = vpop.eup %1877 }
 0x386   : > { %v982_v36 = vmul.f32 %v1878_v32, %v1876_v28 }
 0x388   : > { %v2634_v37 = vsel %vm989_vm13, %v982_v36, %v2589_v2  ;;  %v992_v55 = vsel %vm989_vm13, %v982_v36, 0.0 }
 0x389   : > { %995 = vst [vmem:[%s994_s28] sm:$0xff] %v992_v55  ;;  %v1009_v0 = vpack.c.bf16 %v2634_v37, %v2634_v37  ;;  %s1326_s28 = scalar_lea.hbm %s2739_s3, %s1663_s27 }
 0x38a   : > { %s1329_s7 = sshll.u32 %s1326_s28, 4  ;;  %s1330_s7 = int_to_ptr.hbm [resolvable:$true] %s1329_s7 }
 0x38b   : > { %1018 = vmatmul.bf16.vlgmr.msrb.gmra.mxu0 %v1009_v0  ;;  %1031 = vmatmul.bf16.vlgmr.msrb.gmra.mxu1 %v1009_v0  ;;  %s2001_s24 = sshra.s32 %s1330_s7, 4  ;;  %s2002_s24 = int_to_ptr.hbm [resolvable:$true] %s2001_s24 }
 0x38c   : > { %1044 = vmatmul.bf16.vlgmr.msrb.gmra.mxu2 %v1009_v0  ;;  %1057 = vmatmul.bf16.vlgmr.msrb.gmra.mxu3 %v1009_v0  ;;  %s2003_s26 = scalar_lea.hbm %s2002_s24, 64  ;;  %p2008_p8 = scmp.lt.s32.totalorder %s2002_s24, %s2739_s3 }
 0x38d   : > { %1215 = vmatpush.bf16.msrb.mxu0 %v2225_v3  ;;  %1228 = vmatpush.bf16.msrb.mxu1 %v2227_v7  ;;  %v1003_v3 = vld [vmem:[%s1002_s5] sm:$0xff]  ;;  %p2004_p3 = scmp.ne.s32.totalorder %s2002_s24, %s2003_s26 }
 0x38e   : > { %1241 = vmatpush.bf16.msrb.mxu2 %v2229_v8  ;;  %1254 = vmatpush.bf16.msrb.mxu3 %v2232_v12  ;;  %v1005_v7 = vunpack.c.l.bf16 %v1003_v3  ;;  %v1006_v8 = vunpack.c.h.bf16 %v1003_v3 }
 0x38f   : > { %p2005_p7 = pnand %p2004_p3, %p2188_p0 }
 0x391   : > { %1216 = vmatpush.bf16.msrb.mxu0 %v2236_v16  ;;  %1229 = vmatpush.bf16.msrb.mxu1 %v2238_v17  ;;  %p2006_p6 = pneg %p2005_p7 }
 0x392   : > { %1242 = vmatpush.bf16.msrb.mxu2 %v2241_v21  ;;  %1255 = vmatpush.bf16.msrb.mxu3 %v2243_v25  ;;  %v1004_v25 = vld [vmem:[%s1002_s5 + $0x8] sm:$0xff]  ;;  %s1327_s5 = sshll.u32 %s2421_s9, 4  ;;  %s2698_s5 = int_to_ptr.vmem [resolvable:$true] %s1327_s5 }
 0x395   : > { %1217 = vmatpush.bf16.msrb.mxu0 %v2246_v29  ;;  %1230 = vmatpush.bf16.msrb.mxu1 %v2250_v33 }
 0x396   : > { %1243 = vmatpush.bf16.msrb.mxu2 %v2252_v34  ;;  %1256 = vmatpush.bf16.msrb.mxu3 %v2255_v38  ;;  %v1008_v34 = vunpack.c.h.bf16 %v1004_v25 }
 0x399   : > { %1218 = vmatpush.bf16.msrb.mxu0 %v2258_v44  ;;  %1231 = vmatpush.bf16.msrb.mxu1 %v2262_v45  ;;  %v1007_v45 = vunpack.c.l.bf16 %v1004_v25 }
 0x39a   : > { %1244 = vmatpush.bf16.msrb.mxu2 %v2264_v46  ;;  %1257 = vmatpush.bf16.msrb.mxu3 %v2267_v50 }
 0x39d   : > { %1219 = vmatpush.bf16.msrb.mxu0 %v2271_v56  ;;  %1232 = vmatpush.bf16.msrb.mxu1 %v2276_v57 }
 0x39e   : > { %1245 = vmatpush.bf16.msrb.mxu2 %v2278_v58  ;;  %1258 = vmatpush.bf16.msrb.mxu3 %v2281_v62 }
 0x3a1   : > { %1220 = vmatpush.bf16.msrb.mxu0 %v2287_v5  ;;  %1233 = vmatpush.bf16.msrb.mxu1 %v2291_v10 }
 0x3a2   : > { %1246 = vmatpush.bf16.msrb.mxu2 %v2293_v11  ;;  %1259 = vmatpush.bf16.msrb.mxu3 %v2296_v18 }
 0x3a5   : > { %1221 = vmatpush.bf16.msrb.mxu0 %v2311_v27  ;;  %1234 = vmatpush.bf16.msrb.mxu1 %v2318_v30 }
 0x3a6   : > { %1247 = vmatpush.bf16.msrb.mxu2 %v2320_v31  ;;  %1260 = vmatpush.bf16.msrb.mxu3 %v2324_v39 }
 0x3a9   : > { %1222 = vmatpush.bf16.msrb.mxu0 %v2328_v48  ;;  %1235 = vmatpush.bf16.msrb.mxu1 %v2333_v49 }
 0x3aa   : > { %1248 = vmatpush.bf16.msrb.mxu2 %v2335_v51  ;;  %1261 = vmatpush.bf16.msrb.mxu3 %v2338_v52 }
 0x408   : > { %v1019_v12 = vpop.f32.mrf.mxu0  ;;  %v1032_v16 = vpop.f32.mrf.mxu1 }
 0x409   : > { %v1062_v17 = vadd.f32 %v1019_v12, %v1005_v7  ;;  %v1063_v21 = vadd.f32 %v1032_v16, %v1006_v8 }
 0x40b   : > { %v1066_v29 = vsub.f32 0.0, %v1062_v17  ;;  %v1071_v33 = vsub.f32 0.0, %v1063_v21 }
 0x40d   : > { %v1067_v38 = vmul.f32 1.442695, %v1066_v29  ;;  %v1072_v44 = vmul.f32 1.442695, %v1071_v33 }
 0x40f   : > { %1879 = vpow2.f32 %v1067_v38  ;;  %v1045_v46 = vpop.f32.mrf.mxu2  ;;  %v1058_v50 = vpop.f32.mrf.mxu3 }
 0x410   : > { %1881 = vpow2.f32 %v1072_v44  ;;  %v1065_v56 = vadd.f32 %v1058_v50, %v1008_v34  ;;  %v1021_v57 = vpop.f32.mrf.mxu0  ;;  %v1034_v58 = vpop.f32.mrf.mxu1  ;;  %v1064_v5 = vadd.f32 %v1045_v46, %v1007_v45 }
 0x411   : > { %v1195_v46 = vpop.permute.xlu0 %1194 }
 0x412   : > { %v1077_v62 = vsub.f32 0.0, %v1065_v56  ;;  %vm1196_vm15 = vcmp.eq.s32.totalorder %v1195_v46, 1 }
 0x414   : > { %v1078_v10 = vmul.f32 1.442695, %v1077_v62 }
 0x415   : > { %v1880_v11 = vpop.eup %1879 }
 0x416   : > { %v1882_v18 = vpop.eup %1881  ;;  %v1069_v27 = vadd.f32 1.0, %v1880_v11  ;;  %1883 = vpow2.f32 %v1078_v10 }
 0x417   : > { %v1074_v30 = vadd.f32 1.0, %v1882_v18  ;;  %1885 = vtanh.f32 %v1064_v5  ;;  %v1047_v31 = vpop.f32.mrf.mxu2  ;;  %v1060_v39 = vpop.f32.mrf.mxu3 }
 0x418   : > { %1887 = vrcp.f32 %v1069_v27  ;;  %v1208_v27 = vld [vmem:[%s1207_s23] sm:$0xff] }
 0x419   : > { %1889 = vrcp.f32 %v1074_v30  ;;  %v1210_v30 = vunpack.c.l.bf16 %v1208_v27  ;;  %v1211_v31 = vunpack.c.h.bf16 %v1208_v27 }
 0x41c   : > { %v1884_v48 = vpop.eup %1883 }
 0x41d   : > { %v1886_v49 = vpop.eup %1885  ;;  %v1080_v2 = vadd.f32 1.0, %v1884_v48 }
 0x41e   : > { %v1888_v51 = vpop.eup %1887 }
 0x41f   : > { %v1890_v52 = vpop.eup %1889  ;;  %v1083_v63 = vmul.f32 %v1888_v51, %v1886_v49  ;;  %1891 = vrcp.f32 %v1080_v2 }
 0x420   : > { %v1082_v41 = vmul.f32 %v1890_v52, %v2629_v24  ;;  %v1209_v52 = vld [vmem:[%s1207_s23 + $0x8] sm:$0xff] }
 0x421   : > { %v1213_v40 = vunpack.c.h.bf16 %v1209_v52 }
 0x422   : > { %v1084_v42 = vadd.f32 %v1083_v63, %v1082_v41 }
 0x424   : > { %1893 = vtanh.f32 %v1084_v42  ;;  %v2674_v43 = vsel %vm1093_vm14, %v1084_v42, %v2629_v24  ;;  %v1110_v24 = vunpack.c.l.bf16 %v1107_v35 }
 0x425   : > { %v1892_v47 = vpop.eup %1891 }
 0x42a   : > { %v1894_v53 = vpop.eup %1893 }
 0x42b   : > { %v1086_v54 = vmul.f32 %v1894_v53, %v1892_v47 }
 0x42d   : > { %v1096_v59 = vsel %vm1093_vm14, %v1086_v54, 0.0  ;;  %v2679_v60 = vsel %vm1093_vm14, %v1086_v54, %v2634_v37 }
 0x42e   : > { %1099 = vst [vmem:[%s1098_s8] sm:$0xff] %v1096_v59  ;;  %v1112_v22 = vpack.c.bf16 %v2679_v60, %v2679_v60  ;;  %s1303_s8 = scalar_lea.vmem %s2421_s9, %s1661_s30 [#allocation9] }
 0x430   : > { %1121 = vmatmul.bf16.vlgmr.msra.gmra.mxu0 %v1112_v22  ;;  %1134 = vmatmul.bf16.vlgmr.msra.gmra.mxu1 %v1112_v22 }
 0x431   : > { %1147 = vmatmul.bf16.vlgmr.msra.gmra.mxu2 %v1112_v22  ;;  %1160 = vmatmul.bf16.vlgmr.msra.gmra.mxu3 %v1112_v22 }
 0x4ad   : > { %v1122_v6 = vpop.f32.mrf.mxu0  ;;  %v1135_v15 = vpop.f32.mrf.mxu1 }
 0x4ae   : > { %v1165_v4 = vadd.f32 %v1122_v6, %v1108_v26  ;;  %v1166_v23 = vadd.f32 %v1135_v15, %v1109_v1 }
 0x4b0   : > { %v1169_v9 = vsub.f32 0.0, %v1165_v4  ;;  %v1174_v13 = vsub.f32 0.0, %v1166_v23 }
 0x4b2   : > { %v1170_v19 = vmul.f32 1.442695, %v1169_v9  ;;  %v1175_v20 = vmul.f32 1.442695, %v1174_v13 }
 0x4b4   : > { %1895 = vpow2.f32 %v1170_v19  ;;  %v1148_v28 = vpop.f32.mrf.mxu2  ;;  %v1161_v32 = vpop.f32.mrf.mxu3 }
 0x4b5   : > { %1897 = vpow2.f32 %v1175_v20  ;;  %v1168_v36 = vadd.f32 %v1161_v32, %v1111_v14  ;;  %v1124_v37 = vpop.f32.mrf.mxu0  ;;  %v1137_v55 = vpop.f32.mrf.mxu1  ;;  %v1167_v3 = vadd.f32 %v1148_v28, %v1110_v24 }
 0x4b6   : > { %v1297_v37 = vpop.permute.xlu1 %1296 }
 0x4b7   : > { %v1180_v0 = vsub.f32 0.0, %v1168_v36  ;;  %vm1298_vm0 = vcmp.eq.s32.totalorder %v1297_v37, 1 }
 0x4b9   : > { %v1181_v7 = vmul.f32 1.442695, %v1180_v0 }
 0x4ba   : > { %v1896_v8 = vpop.eup %1895 }
 0x4bb   : > { %v1898_v12 = vpop.eup %1897  ;;  %v1172_v16 = vadd.f32 1.0, %v1896_v8  ;;  %1899 = vpow2.f32 %v1181_v7 }
 0x4bc   : > { %v1177_v17 = vadd.f32 1.0, %v1898_v12  ;;  %1901 = vtanh.f32 %v1167_v3  ;;  %v1150_v21 = vpop.f32.mrf.mxu2  ;;  %v1163_v25 = vpop.f32.mrf.mxu3 }
 0x4bd   : > { %1903 = vrcp.f32 %v1172_v16 }
 0x4be   : > { %1905 = vrcp.f32 %v1177_v17 }
 0x4c1   : > { %v1900_v29 = vpop.eup %1899 }
 0x4c2   : > { %v1902_v33 = vpop.eup %1901  ;;  %v1183_v45 = vadd.f32 1.0, %v1900_v29 }
 0x4c3   : > { %v1904_v34 = vpop.eup %1903 }
 0x4c4   : > { %v1906_v38 = vpop.eup %1905  ;;  %v1186_v44 = vmul.f32 %v1904_v34, %v1902_v33  ;;  %1907 = vrcp.f32 %v1183_v45 }
 0x4c5   : > { %v1185_v50 = vmul.f32 %v1906_v38, %v2674_v43 }
 0x4c7   : > { %v1187_v56 = vadd.f32 %v1186_v44, %v1185_v50 }
 0x4c9   : > { %1909 = vtanh.f32 %v1187_v56  ;;  %v1197_v57 = vsel %vm1196_vm15, %v1187_v56, %v2674_v43  ;;  %v1212_v43 = vunpack.c.l.bf16 %v1209_v52 }
 0x4ca   : > { %v1908_v58 = vpop.eup %1907 }
 0x4cf   : > { %v1910_v62 = vpop.eup %1909 }
 0x4d0   : > { %v1189_v5 = vmul.f32 %v1910_v62, %v1908_v58 }
 0x4d2   : > { %v1199_v10 = vsel %vm1196_vm15, %v1189_v5, 0.0  ;;  %v1198_v11 = vsel %vm1196_vm15, %v1189_v5, %v2679_v60 }
 0x4d3   : > { %1202 = vst [vmem:[%s1201_s20] sm:$0xff] %v1199_v10  ;;  %v1214_v18 = vpack.c.bf16 %v1198_v11, %v1198_v11  ;;  %s2007_s20 = scalar_lea.hbm %s2739_s3, 128 }
 0x4d4   : > { %p2009_p11 = scmp.lt.s32.totalorder %s2007_s20, %s2003_s26 }
 0x4d5   : > { %1223 = vmatmul.bf16.vlgmr.msrb.gmra.mxu0 %v1214_v18  ;;  %1236 = vmatmul.bf16.vlgmr.msrb.gmra.mxu1 %v1214_v18 }
 0x4d6   : > { %1249 = vmatmul.bf16.vlgmr.msrb.gmra.mxu2 %v1214_v18  ;;  %1262 = vmatmul.bf16.vlgmr.msrb.gmra.mxu3 %v1214_v18  ;;  %p2010_p12 = por %p2009_p11, %p2008_p8 }
 0x4d8   : > { %p2011_p13 = pnand %p2010_p12, %p2006_p6 }
 0x552   : > { %v1224_v39 = vpop.f32.mrf.mxu0  ;;  %v1237_v48 = vpop.f32.mrf.mxu1 }
 0x553   : > { %v1267_v49 = vadd.f32 %v1224_v39, %v1210_v30  ;;  %v1268_v51 = vadd.f32 %v1237_v48, %v1211_v31 }
 0x555   : > { %v1271_v63 = vsub.f32 0.0, %v1267_v49  ;;  %v1276_v2 = vsub.f32 0.0, %v1268_v51 }
 0x557   : > { %v1272_v41 = vmul.f32 1.442695, %v1271_v63  ;;  %v1277_v42 = vmul.f32 1.442695, %v1276_v2 }
 0x559   : > { %1911 = vpow2.f32 %v1272_v41  ;;  %v1250_v47 = vpop.f32.mrf.mxu2  ;;  %v1263_v53 = vpop.f32.mrf.mxu3 }
 0x55a   : > { %1913 = vpow2.f32 %v1277_v42  ;;  %v1270_v54 = vadd.f32 %v1263_v53, %v1213_v40  ;;  %v1226_v59 = vpop.f32.mrf.mxu0  ;;  %v1239_v60 = vpop.f32.mrf.mxu1  ;;  %v1269_v61 = vadd.f32 %v1250_v47, %v1212_v43 }
 0x55c   : > { %v1282_v22 = vsub.f32 0.0, %v1270_v54 }
 0x55e   : > { %v1283_v26 = vmul.f32 1.442695, %v1282_v22 }
 0x55f   : > { %v1912_v1 = vpop.eup %1911 }
 0x560   : > { %v1914_v6 = vpop.eup %1913  ;;  %v1274_v15 = vadd.f32 1.0, %v1912_v1  ;;  %1915 = vpow2.f32 %v1283_v26 }
 0x561   : > { %v1279_v4 = vadd.f32 1.0, %v1914_v6  ;;  %1917 = vtanh.f32 %v1269_v61  ;;  %v1252_v23 = vpop.f32.mrf.mxu2  ;;  %v1265_v35 = vpop.f32.mrf.mxu3 }
 0x562   : > { %1919 = vrcp.f32 %v1274_v15 }
 0x563   : > { %1921 = vrcp.f32 %v1279_v4 }
 0x566   : > { %v1916_v9 = vpop.eup %1915 }
 0x567   : > { %v1918_v13 = vpop.eup %1917  ;;  %v1285_v24 = vadd.f32 1.0, %v1916_v9 }
 0x568   : > { %v1920_v14 = vpop.eup %1919 }
 0x569   : > { %v1922_v19 = vpop.eup %1921  ;;  %v1288_v20 = vmul.f32 %v1920_v14, %v1918_v13  ;;  %1923 = vrcp.f32 %v1285_v24 }
 0x56a   : > { %v1287_v28 = vmul.f32 %v1922_v19, %v1197_v57 }
 0x56c   : > { %v1289_v32 = vadd.f32 %v1288_v20, %v1287_v28 }
 0x56e   : > { %1925 = vtanh.f32 %v1289_v32 }
 0x56f   : > { %v1924_v36 = vpop.eup %1923 }
 0x574   : > { %v1926_v55 = vpop.eup %1925 }
 0x575   : > { %v1291_v0 = vmul.f32 %v1926_v55, %v1924_v36 }
 0x577   : > { %v1301_v3 = vsel %vm1298_vm0, %v1291_v0, 0.0 }
 0x578   : > { %1304 = vst [vmem:[%s1303_s8] sm:$0xff] %v1301_v3 }
 0x579   : > { %2014 = shalt.err (!%p2011_p13)
}
 0x57a   : > { %s2080_s10 = smov 128   ;;  %s2081_s9 = smov 256  }
 0x57b   : > { %s2082_s27 = smov 8  }
 0x57c   : > { %1724 = dma.vmem_to_hbm [thread:$0]  (%p2188_p0), %s2698_s5, 1024, %s1330_s7, %s1308_s15, %s2080_s10, %s2081_s9, %s2082_s27  }
 0x57d PF: > { %s1344_s4 = sand.u32 1, %s2053_s12   ;;  %p1735_p1 = pnand %p1499_p10, %p2144_p5 }
 0x57e   : > { %s1345_s19 = scalar_lea.sflag [#allocation6], %s1344_s4 }
 0x57f   : > { %p1736_p9 = pneg %p1735_p1 }
 0x581   : > { %2048 = dma.done.wait (%p1736_p9), %s1345_s19, 1024  }
 0x582   : > { %2050 = vsyncadd (%p1736_p9), %s1345_s19, 4294966272  ;;  %s20_s17 = sadd.s32 1, %s2073_s17   ;;  %s2745_s12 = smov %s2057_s13 }
 0x583   : > { %p17_p2 = scmp.ge.s32.totalorder %s20_s17, 4   ;;  %s2746_s13 = smov %s2061_s14 }
 0x584   : > { %s2747_s14 = smov %s2198_s29  ;;  %s2748_s15 = smov %s2069_s16 }
 0x585   : > { %s2749_s16 = smov %s2751_s22  ;;  %19 = sbr.rel (!%p17_p2) target bundleno = 7 (0x7), region = 102 }
 0x58a   :  { %1351 = vsyncpa [#allocation5], 1 }
 0x58b   :  { %1353 = vsyncpa [#allocation5 + $0x1], 1 }
 0x58c   :  { %1354 = vsyncpa [#allocation8], 1 }
 0x58d   :  { %1355 = vsyncpa [#allocation6], 1 }
 0x58e   :  { %1357 = vsyncpa [#allocation6 + $0x1], 1 }

// kernel: tpu_custom_call.1
= control target key start
LH: loop header
LB: loop body
LE: loop exit
PB: predicated region body
PF: predicated region fallthrough
CT: control target
= control target key end

     0   :  { %s2815_s0 = inlined_call_operand.vmem [shape: s32[8,1], index: 0, kind: input, shape index: {}]   ;;  %s2816_s1 = inlined_call_operand.hbm [shape: bf16[2,8,8,512], index: 1, kind: input, shape index: {}]   ;;  %s2817_s2 = inlined_call_operand.hbm [shape: bf16[2,128,512], index: 2, kind: input, shape index: {}]   ;;  %s2818_s3 = inlined_call_operand.hbm [shape: f32[8,8,256], index: 3, kind: output, shape index: {}]  }
   0x1   :  { %2819 = sst [smem:[#allocation13_spill]] %s2816_s1 }
   0x2   :  { %8 = vsyncpa [#allocation5], 0 }
   0x3   :  { %10 = vsyncpa [#allocation5 + $0x1], 0 }
   0x4   :  { %11 = vsyncpa [#allocation8], 0 }
   0x5   :  { %13 = vsyncpa [#allocation8 + $0x1], 0 }
   0x6   :  { %14 = vsyncpa [#allocation6], 0 }
   0x7   :  { %16 = vsyncpa [#allocation6 + $0x1], 0  ;;  %s2130_s12 = smov 0   ;;  %s2132_s13 = smov 0  }
   0x8   :  { %s2134_s14 = smov 0   ;;  %s2136_s15 = smov 0  }
   0x9   :  { %s2138_s16 = smov 0   ;;  %s2140_s17 = smov 0  }
   0xa LB: > { %s1522_s18 = sadd.s32 4294967295, %s2101_s17   ;;  %s1523_s19 = sadd.s32 4294967294, %s2101_s17   ;;  %s2101_s17 = sphi %s2140_s17, %s22_s17   ;;  %s2097_s16 = sphi %s2138_s16, %s2830_s16   ;;  %s2093_s15 = sphi %s2136_s15, %s2829_s15   ;;  %s2089_s14 = sphi %s2134_s14, %s2828_s14   ;;  %s2085_s13 = sphi %s2132_s13, %s2827_s13   ;;  %s2081_s12 = sphi %s2130_s12, %s2826_s12  }
   0xb   : > { %s34_s20 = sadd.s32 1, %s2097_s16  ;;  %s74_s21 = sadd.s32 1, %s2089_s14 }
   0xc   : > { %p36_p0 = scmp.ge.s32.totalorder %s34_s20, 2  ;;  %p81_p1 = scmp.ne.s32.totalorder %s2089_s14, %s2085_s13 }
   0xd   : > { %p82_p2 = scmp.eq.s32.totalorder %s2101_s17, 0  ;;  %p87_p3 = scmp.ne.s32.totalorder %s2085_s13, %s2081_s12 }
   0xe   : > { %s2832_s20 = smov (%p36_p0, %s34_s20), 0  ;;  %p88_p5 = scmp.eq.s32.totalorder %s1522_s18, 0 }
   0xf   : > { %p2171_p4 = por %p82_p2, %p81_p1  ;;  %s69_s23 = ssub.s32 %s2097_s16, %s2832_s20 }
  0x10   : > { %p149_p6 = scmp.eq.s32.totalorder %s1522_s18, 1  ;;  %p72_p7 = scmp.eq.s32.totalorder %s69_s23, 0 }
  0x11   : > { %p2177_p8 = por %p88_p5, %p87_p3  ;;  %p155_p10 = scmp.eq.s32.totalorder %s1523_s19, 1 }
  0x12   : > { %p2181_p9 = por %p149_p6, %p81_p1  ;;  %p1525_p12 = scmp.ge.s32.totalorder %s2101_s17, 2 }
  0x13   : > { %s2186_s26 = scalar_select %p72_p7, %s2089_s14, %s74_s21  }
  0x14   : > { %p2188_p11 = por %p155_p10, %p87_p3  ;;  %p1767_p13 = scmp.lt.s32.totalorder %s2101_s17, 2 }
  0x15   : > { %s2195_s28 = sand.u32 1, %s2089_s14   ;;  %s1696_s30 = sshll.u32 %s2097_s16, 7 }
  0x16   : > { %s1526_s29 = sshll.u32 %s2195_s28, 7  ;;  %s2824_s1 = sld [smem:[#allocation13_spill]] }
  0x17   : > { %s182_s7 = scalar_lea.vmem [#allocation4], %s1526_s29  ;;  %p2204_p0 = pnand %p1767_p13, %p2171_p4 }
  0x18   : > { %s198_s8 = sshll.u32 %s182_s7, 4  ;;  %p1532_p1 = scmp.ge.s32.totalorder %s2101_s17, 1  ;;  %s199_s8 = int_to_ptr.vmem [resolvable:$true] %s198_s8 }
  0x19   : > { %s179_s11 = scalar_lea.sflag [#allocation5], %s2195_s28  ;;  %s2103_s18 = smov 256  }
  0x1a   : > { %s2104_s19 = smov 16   ;;  %p228_p2 = scmp.lt.s32.totalorder %s2101_s17, 3 }
  0x1b   : > { %s1529_s21 = sshll.u32 %s2195_s28, 8  ;;  %s1697_s23 = sshll.u32 %s2097_s16, 8 }
  0x1c   : > { %s195_s6 = scalar_lea.hbm %s2824_s1, %s1696_s30  ;;  %p229_p3 = pnand %p1532_p1, %p228_p2 }
  0x1d   : > { %s196_s9 = sshll.u32 %s195_s6, 4  ;;  %s217_s22 = scalar_lea.hbm %s2817_s2, %s1697_s23  ;;  %s197_s9 = int_to_ptr.hbm [resolvable:$true] %s196_s9 }
  0x1e   : > { %1759 = dma.hbm_to_vmem [thread:$0]  (!%p2204_p0), %s197_s9, 2048, %s199_s8, %s179_s11, %s2103_s18, %s2103_s18, %s2104_s19  }
  0x1f   : > { %s212_s4 = scalar_lea.vmem [#allocation7], %s1529_s21  ;;  %s218_s6 = sshll.u32 %s217_s22, 4  ;;  %s219_s6 = int_to_ptr.hbm [resolvable:$true] %s218_s6 }
  0x20   : > { %s220_s5 = sshll.u32 %s212_s4, 4  ;;  %s209_s7 = scalar_lea.sflag [#allocation8], %s2195_s28  ;;  %s221_s5 = int_to_ptr.vmem [resolvable:$true] %s220_s5 }
  0x21   : > { %1762 = dma.hbm_to_vmem [thread:$0]  (!%p2204_p0), %s219_s6, 4096, %s221_s5, %s209_s7, %s2103_s18, %s2103_s18, %s2104_s19  }
  0x22   : > { %232 = sbr.rel (%p229_p3) target bundleno = 1400 (0x578), region = 32  ;;  %s2222_s8 = sand.u32 (!%p229_p3), 1, %s2085_s13  }
  0x23   : > { %s1533_s9 = sshll.u32 (!%p229_p3), %s2222_s8, 7  ;;  %s235_s11 = scalar_lea.sflag (!%p229_p3), [#allocation5], %s2222_s8 }
  0x24   : > { %s2226_s1 = scalar_lea.vmem (!%p229_p3), [#allocation4], %s1533_s9 }
  0x27   : > { %2068 = dma.done.wait (%p2177_p8), %s235_s11, 2048  }
  0x28   : > { %2070 = vsyncadd (%p2177_p8), %s235_s11, 4294965248  ;;  %s1534_s28 = sshll.u32 %s2222_s8, 8  ;;  %s245_s10 = scalar_lea.sflag [#allocation8], %s2222_s8 }
  0x29   : > { %s2234_s18 = scalar_lea.vmem [#allocation7], %s1534_s28 }
  0x2a   : > { %2072 = dma.done.wait (%p2177_p8), %s245_s10, 4096  }
  0x2b   : > { %2074 = vsyncadd (%p2177_p8), %s245_s10, 4294963200  ;;  %v1652_v0 = vld [vmem:[%s2234_s18 + $0xe0] sm:$0xf]  ;;  %v1728_v1 = vld [vmem:[%s2234_s18 + $0xec] sm:$0xf0]  ;;  %s336_s24 = smul.u32 7, %s2093_s15 }
  0x2c   : > { %v1726_v2 = vld [vmem:[%s2234_s18 + $0xe4] sm:$0xf]  ;;  %v2243_v3 = vor.u32 %v1728_v1, %v1652_v0  ;;  %v1654_v4 = vld [vmem:[%s2234_s18 + $0xf0] sm:$0xf0]  ;;  %v1660_v5 = vld [vmem:[%s2234_s18 + $0xe8] sm:$0xf] }
  0x2d   : > { %v1729_v6 = vld [vmem:[%s2234_s18 + $0xf4] sm:$0xf0]  ;;  %v2248_v7 = vor.u32 %v1726_v2, %v1654_v4  ;;  %v1727_v9 = vld [vmem:[%s2234_s18 + $0xec] sm:$0xf]  ;;  %v1662_v10 = vld [vmem:[%s2234_s18 + $0xf8] sm:$0xf0] }
  0x2e   : > { %v2250_v8 = vor.u32 %v1729_v6, %v1660_v5  ;;  %v1636_v11 = vld [vmem:[%s2234_s18 + $0xc0] sm:$0xf]  ;;  %508 = vmatpush.bf16.msra.mxu0 %v2243_v3  ;;  %v2256_v12 = vor.u32 %v1727_v9, %v1662_v10  ;;  %v1724_v13 = vld [vmem:[%s2234_s18 + $0xcc] sm:$0xf0]  ;;  %v1722_v14 = vld [vmem:[%s2234_s18 + $0xc4] sm:$0xf]  ;;  %v585_v9 = vstv %s336_s24 }
  0x2f   : > { %v1638_v15 = vld [vmem:[%s2234_s18 + $0xd0] sm:$0xf0]  ;;  %521 = vmatpush.bf16.msra.mxu1 %v2248_v7  ;;  %v2263_v16 = vor.u32 %v1724_v13, %v1636_v11  ;;  %v1644_v18 = vld [vmem:[%s2234_s18 + $0xc8] sm:$0xf]  ;;  %v1725_v19 = vld [vmem:[%s2234_s18 + $0xd4] sm:$0xf0] }
  0x30   : > { %534 = vmatpush.bf16.msra.mxu2 %v2250_v8  ;;  %v2265_v17 = vor.u32 %v1722_v14, %v1638_v15  ;;  %v1723_v20 = vld [vmem:[%s2234_s18 + $0xcc] sm:$0xf]  ;;  %547 = vmatpush.bf16.msra.mxu3 %v2256_v12  ;;  %v2271_v21 = vor.u32 %v1725_v19, %v1644_v18  ;;  %v1646_v22 = vld [vmem:[%s2234_s18 + $0xd8] sm:$0xf0]  ;;  %v1620_v23 = vld [vmem:[%s2234_s18 + $0xa0] sm:$0xf] }
  0x31   : > { %v1720_v24 = vld [vmem:[%s2234_s18 + $0xac] sm:$0xf0]  ;;  %v2276_v25 = vor.u32 %v1723_v20, %v1646_v22  ;;  %v1718_v26 = vld [vmem:[%s2234_s18 + $0xa4] sm:$0xf]  ;;  %v1622_v27 = vld [vmem:[%s2234_s18 + $0xb0] sm:$0xf0] }
  0x32   : > { %v1628_v28 = vld [vmem:[%s2234_s18 + $0xa8] sm:$0xf]  ;;  %509 = vmatpush.bf16.msra.mxu0 %v2263_v16  ;;  %v2282_v29 = vor.u32 %v1720_v24, %v1620_v23  ;;  %v1721_v30 = vld [vmem:[%s2234_s18 + $0xb4] sm:$0xf0]  ;;  %v1719_v31 = vld [vmem:[%s2234_s18 + $0xac] sm:$0xf]  ;;  %v2289_v33 = vor.u32 %v1718_v26, %v1622_v27 }
  0x33   : > { %v1630_v32 = vld [vmem:[%s2234_s18 + $0xb8] sm:$0xf0]  ;;  %522 = vmatpush.bf16.msra.mxu1 %v2265_v17  ;;  %v2291_v34 = vor.u32 %v1721_v30, %v1628_v28  ;;  %v1604_v35 = vld [vmem:[%s2234_s18 + $0x80] sm:$0xf]  ;;  %v1716_v36 = vld [vmem:[%s2234_s18 + $0x8c] sm:$0xf0] }
  0x34   : > { %535 = vmatpush.bf16.msra.mxu2 %v2271_v21  ;;  %v1714_v37 = vld [vmem:[%s2234_s18 + $0x84] sm:$0xf]  ;;  %548 = vmatpush.bf16.msra.mxu3 %v2276_v25  ;;  %v2297_v38 = vor.u32 %v1719_v31, %v1630_v32  ;;  %v1606_v39 = vld [vmem:[%s2234_s18 + $0x90] sm:$0xf0]  ;;  %v1612_v40 = vld [vmem:[%s2234_s18 + $0x88] sm:$0xf]  ;;  %v2305_v44 = vor.u32 %v1716_v36, %v1604_v35 }
  0x35   : > { %v1717_v41 = vld [vmem:[%s2234_s18 + $0x94] sm:$0xf0]  ;;  %v1715_v42 = vld [vmem:[%s2234_s18 + $0x8c] sm:$0xf]  ;;  %v1614_v43 = vld [vmem:[%s2234_s18 + $0x98] sm:$0xf0]  ;;  %v2309_v45 = vor.u32 %v1714_v37, %v1606_v39 }
  0x36   : > { %510 = vmatpush.bf16.msra.mxu0 %v2282_v29  ;;  %v2311_v46 = vor.u32 %v1717_v41, %v1612_v40  ;;  %v1588_v47 = vld [vmem:[%s2234_s18 + $0x60] sm:$0xf]  ;;  %v1712_v48 = vld [vmem:[%s2234_s18 + $0x6c] sm:$0xf0]  ;;  %v1710_v49 = vld [vmem:[%s2234_s18 + $0x64] sm:$0xf]  ;;  %v2317_v50 = vor.u32 %v1715_v42, %v1614_v43 }
  0x37   : > { %523 = vmatpush.bf16.msra.mxu1 %v2289_v33  ;;  %v1590_v51 = vld [vmem:[%s2234_s18 + $0x70] sm:$0xf0]  ;;  %v1596_v52 = vld [vmem:[%s2234_s18 + $0x68] sm:$0xf]  ;;  %v1713_v53 = vld [vmem:[%s2234_s18 + $0x74] sm:$0xf0]  ;;  %v2326_v56 = vor.u32 %v1712_v48, %v1588_v47 }
  0x38   : > { %536 = vmatpush.bf16.msra.mxu2 %v2291_v34  ;;  %549 = vmatpush.bf16.msra.mxu3 %v2297_v38  ;;  %v1711_v54 = vld [vmem:[%s2234_s18 + $0x6c] sm:$0xf]  ;;  %v1598_v55 = vld [vmem:[%s2234_s18 + $0x78] sm:$0xf0]  ;;  %s598_s19 = smul.u32 6, %s2093_s15  ;;  %v2331_v57 = vor.u32 %v1710_v49, %v1590_v51  ;;  %v2333_v58 = vor.u32 %v1713_v53, %v1596_v52  ;;  %s2347_s21 = ssub.s32 1, %s2093_s15 }
  0x39   : > { %v1572_v59 = vld [vmem:[%s2234_s18 + $0x40] sm:$0xf]  ;;  %v1708_v60 = vld [vmem:[%s2234_s18 + $0x4c] sm:$0xf0]  ;;  %v1706_v61 = vld [vmem:[%s2234_s18 + $0x44] sm:$0xf]  ;;  %v2339_v62 = vor.u32 %v1711_v54, %v1598_v55 }
  0x3a   : > { %511 = vmatpush.bf16.msra.mxu0 %v2305_v44  ;;  %v1574_v63 = vld [vmem:[%s2234_s18 + $0x50] sm:$0xf0]  ;;  %v1580_v0 = vld [vmem:[%s2234_s18 + $0x48] sm:$0xf]  ;;  %v1709_v1 = vld [vmem:[%s2234_s18 + $0x54] sm:$0xf0]  ;;  %v2350_v5 = vor.u32 %v1708_v60, %v1572_v59  ;;  %s2375_s30 = sadd.s32 %s598_s19, %s2347_s21 }
  0x3b   : > { %524 = vmatpush.bf16.msra.mxu1 %v2309_v45  ;;  %v1707_v2 = vld [vmem:[%s2234_s18 + $0x4c] sm:$0xf]  ;;  %v1582_v4 = vld [vmem:[%s2234_s18 + $0x58] sm:$0xf0]  ;;  %v1556_v6 = vld [vmem:[%s2234_s18 + $0x20] sm:$0xf]  ;;  %v2355_v10 = vor.u32 %v1706_v61, %v1574_v63  ;;  %v2357_v11 = vor.u32 %v1709_v1, %v1580_v0  ;;  %v688_v37 = vstv %s2375_s30 }
  0x3c   : > { %537 = vmatpush.bf16.msra.mxu2 %v2311_v46  ;;  %550 = vmatpush.bf16.msra.mxu3 %v2317_v50  ;;  %v1704_v13 = vld [vmem:[%s2234_s18 + $0x2c] sm:$0xf0]  ;;  %v1702_v14 = vld [vmem:[%s2234_s18 + $0x24] sm:$0xf]  ;;  %v1558_v15 = vld [vmem:[%s2234_s18 + $0x30] sm:$0xf0]  ;;  %v2363_v18 = vor.u32 %v1707_v2, %v1582_v4 }
  0x3d   : > { %v1564_v19 = vld [vmem:[%s2234_s18 + $0x28] sm:$0xf]  ;;  %v1705_v20 = vld [vmem:[%s2234_s18 + $0x34] sm:$0xf0]  ;;  %v2370_v22 = vld [vmem:[%s2815_s0] sm:$0xff]  ;;  %v2105_v26 = vmov 0   ;;  %v2382_v27 = vor.u32 %v1704_v13, %v1556_v6  ;;  %v2389_v30 = vor.u32 %v1702_v14, %v1558_v15 }
  0x3e   : > { %512 = vmatpush.bf16.msra.mxu0 %v2326_v56  ;;  %v1703_v23 = vld [vmem:[%s2234_s18 + $0x2c] sm:$0xf]  ;;  %v1566_v24 = vld [vmem:[%s2234_s18 + $0x38] sm:$0xf0]  ;;  %1824 = vset.pattern.permute.xlu0 %v2105_v26  ;;  %vm586_vm0 = vcmp.lt.s32.totalorder %v585_v9, %v2370_v22  ;;  %s1117_s22 = smul.u32 6, %s2347_s21  ;;  %v2391_v31 = vor.u32 %v1705_v20, %v1564_v19  ;;  %vm689_vm1 = vcmp.lt.s32.totalorder %v688_v37, %v2370_v22  ;;  %v2106_v55 = vmov 0.0|0.0  }
  0x3f   : > { %525 = vmatpush.bf16.msra.mxu1 %v2331_v57  ;;  %v587_v28 = vsel %vm586_vm0, 1, %v2105_v26  ;;  %1825 = vset.pattern.permute.xlu1 %v2105_v26  ;;  %v1540_v32 = vld [vmem:[%s2234_s18] sm:$0xf]  ;;  %v1700_v35 = vld [vmem:[%s2234_s18 + $0xc] sm:$0xf0]  ;;  %v2398_v39 = vor.u32 %v1703_v23, %v1566_v24  ;;  %v690_v53 = vsel %vm689_vm1, 1, %v2105_v26 }
  0x40   : > { %538 = vmatpush.bf16.msra.mxu2 %v2333_v58  ;;  %551 = vmatpush.bf16.msra.mxu3 %v2339_v62  ;;  %v1698_v36 = vld [vmem:[%s2234_s18 + $0x4] sm:$0xf]  ;;  %v1542_v40 = vld [vmem:[%s2234_s18 + $0x10] sm:$0xf0]  ;;  %v1548_v41 = vld [vmem:[%s2234_s18 + $0x8] sm:$0xf]  ;;  %v2407_v48 = vor.u32 %v1700_v35, %v1540_v32  ;;  %s2420_s4 = sadd.s32 %s2093_s15, %s1117_s22 }
  0x41   : > { %v1701_v42 = vld [vmem:[%s2234_s18 + $0x14] sm:$0xf0]  ;;  %589 = vperm.xlu0 %1824, %v587_v28   ;;  %v1699_v43 = vld [vmem:[%s2234_s18 + $0xc] sm:$0xf]  ;;  %v1550_v47 = vld [vmem:[%s2234_s18 + $0x18] sm:$0xf0]  ;;  %1826 = vset.pattern.permute.xlu2 %v2105_v26  ;;  %v2412_v49 = vor.u32 %v1698_v36, %v1542_v40  ;;  %v1207_v54 = vstv %s2420_s4 }
  0x42   : > { %513 = vmatpush.bf16.msra.mxu0 %v2350_v5  ;;  %v2414_v51 = vor.u32 %v1701_v42, %v1548_v41  ;;  %v2417_v52 = vor.u32 %v1699_v43, %v1550_v47  ;;  %vm1208_vm2 = vcmp.lt.s32.totalorder %v1207_v54, %v2370_v22  ;;  %s1730_s5 = smul.u32 112, %s2093_s15  ;;  %s1535_s7 = sshll.u32 %s2222_s8, 6 }
  0x43   : > { %526 = vmatpush.bf16.msra.mxu1 %v2355_v10  ;;  %v1209_v59 = vsel %vm1208_vm2, 1, %v2105_v26  ;;  %s1666_s9 = smul.u32 56, %s2093_s15  ;;  %s2500_s11 = scalar_lea.vmem [#allocation9], %s1535_s7 }
  0x44   : > { %539 = vmatpush.bf16.msra.mxu2 %v2357_v11  ;;  %552 = vmatpush.bf16.msra.mxu3 %v2363_v18  ;;  %s340_s6 = scalar_lea.vmem %s2226_s1, %s1730_s5 [#allocation4]  ;;  %s1731_s10 = sshll.u32 %s2375_s30, 4 }
  0x45   : > { %v341_v60 = vld [vmem:[%s340_s6] sm:$0xff]  ;;  %v342_v6 = vld [vmem:[%s340_s6 + $0x8] sm:$0xff]  ;;  %s596_s28 = scalar_lea.vmem %s2500_s11, %s1666_s9 [#allocation9]  ;;  %s603_s18 = scalar_lea.vmem %s2226_s1, %s1731_s10 [#allocation4] }
  0x46   : > { %514 = vmatpush.bf16.msra.mxu0 %v2382_v27  ;;  %v343_v61 = vunpack.c.l.bf16 %v341_v60  ;;  %v344_v63 = vunpack.c.h.bf16 %v341_v60  ;;  %v346_v15 = vunpack.c.h.bf16 %v342_v6  ;;  %v345_v20 = vunpack.c.l.bf16 %v342_v6  ;;  %s702_s24 = smul.u32 5, %s2093_s15  ;;  %s1670_s19 = sshll.u32 %s2347_s21, 1 }
  0x47   : > { %527 = vmatpush.bf16.msra.mxu1 %v2389_v30  ;;  %s805_s23 = smul.u32 3, %s2347_s21  ;;  %s1674_s29 = sshll.u32 %s2093_s15, 2 }
  0x48   : > { %540 = vmatpush.bf16.msra.mxu2 %v2391_v31  ;;  %553 = vmatpush.bf16.msra.mxu3 %v2398_v39  ;;  %s2544_s22 = sadd.s32 %s1670_s19, %s702_s24  ;;  %s1220_s6 = smul.u32 7, %s2347_s21 }
  0x49   : > { %692 = vperm.xlu0 %1824, %v690_v53   ;;  %s2546_s5 = sadd.s32 %s1674_s29, %s805_s23  ;;  %s1669_s7 = sshll.u32 %s2375_s30, 3 }
  0x4a   : > { %515 = vmatpush.bf16.msra.mxu0 %v2407_v48  ;;  %s699_s9 = scalar_lea.vmem %s2500_s11, %s1669_s7 [#allocation9]  ;;  %s1732_s30 = sshll.u32 %s2544_s22, 4 }
  0x4b   : > { %528 = vmatpush.bf16.msra.mxu1 %v2412_v49  ;;  %s1673_s10 = sshll.u32 %s2544_s22, 3  ;;  %s1733_s24 = sshll.u32 %s2546_s5, 4 }
  0x4c   : > { %541 = vmatpush.bf16.msra.mxu2 %v2414_v51  ;;  %554 = vmatpush.bf16.msra.mxu3 %v2417_v52  ;;  %s811_s19 = scalar_lea.vmem %s2226_s1, %s1733_s24 [#allocation4]  ;;  %s910_s23 = smul.u32 3, %s2093_s15 }
  0x4d   : > { %516 = vmatmul.bf16.vlgmr.msra.gmra.mxu0 %v2106_v55  ;;  %s1678_s29 = sshll.u32 %s2347_s21, 2 }
  0x4e   : > { %529 = vmatmul.bf16.vlgmr.msra.gmra.mxu1 %v2106_v55  ;;  %611 = vmatpush.bf16.msrb.mxu0 %v2243_v3  ;;  %s2651_s7 = sadd.s32 %s1678_s29, %s910_s23 }
  0x4f   : > { %624 = vmatpush.bf16.msrb.mxu1 %v2248_v7  ;;  %542 = vmatmul.bf16.vlgmr.msra.gmra.mxu2 %v2106_v55 }
  0x50   : > { %555 = vmatmul.bf16.vlgmr.msra.gmra.mxu3 %v2106_v55  ;;  %637 = vmatpush.bf16.msrb.mxu2 %v2250_v8 }
  0x51   : > { %650 = vmatpush.bf16.msrb.mxu3 %v2256_v12  ;;  %1211 = vperm.xlu0 %1824, %v1209_v59  }
  0x52   : > { %612 = vmatpush.bf16.msrb.mxu0 %v2263_v16 }
  0x53   : > { %625 = vmatpush.bf16.msrb.mxu1 %v2265_v17 }
  0x54   : > { %638 = vmatpush.bf16.msrb.mxu2 %v2271_v21 }
  0x55   : > { %651 = vmatpush.bf16.msrb.mxu3 %v2276_v25 }
  0x56   : > { %613 = vmatpush.bf16.msrb.mxu0 %v2282_v29 }
  0x57   : > { %626 = vmatpush.bf16.msrb.mxu1 %v2289_v33 }
  0x58   : > { %639 = vmatpush.bf16.msrb.mxu2 %v2291_v34 }
  0x59   : > { %652 = vmatpush.bf16.msrb.mxu3 %v2297_v38 }
  0x5a   : > { %614 = vmatpush.bf16.msrb.mxu0 %v2305_v44 }
  0x5b   : > { %627 = vmatpush.bf16.msrb.mxu1 %v2309_v45 }
  0x5c   : > { %640 = vmatpush.bf16.msrb.mxu2 %v2311_v46 }
  0x5d   : > { %653 = vmatpush.bf16.msrb.mxu3 %v2317_v50 }
  0x5e   : > { %615 = vmatpush.bf16.msrb.mxu0 %v2326_v56 }
  0x5f   : > { %628 = vmatpush.bf16.msrb.mxu1 %v2331_v57 }
  0x60   : > { %641 = vmatpush.bf16.msrb.mxu2 %v2333_v58 }
  0x61   : > { %654 = vmatpush.bf16.msrb.mxu3 %v2339_v62 }
  0x62   : > { %616 = vmatpush.bf16.msrb.mxu0 %v2350_v5 }
  0x63   : > { %629 = vmatpush.bf16.msrb.mxu1 %v2355_v10 }
  0x64   : > { %642 = vmatpush.bf16.msrb.mxu2 %v2357_v11 }
  0x65   : > { %655 = vmatpush.bf16.msrb.mxu3 %v2363_v18 }
  0x66   : > { %617 = vmatpush.bf16.msrb.mxu0 %v2382_v27 }
  0x67   : > { %630 = vmatpush.bf16.msrb.mxu1 %v2389_v30 }
  0x68   : > { %643 = vmatpush.bf16.msrb.mxu2 %v2391_v31 }
  0x69   : > { %656 = vmatpush.bf16.msrb.mxu3 %v2398_v39 }
  0x6a   : > { %618 = vmatpush.bf16.msrb.mxu0 %v2407_v48 }
  0x6b   : > { %631 = vmatpush.bf16.msrb.mxu1 %v2412_v49 }
  0x6c   : > { %644 = vmatpush.bf16.msrb.mxu2 %v2414_v51 }
  0x6d   : > { %657 = vmatpush.bf16.msrb.mxu3 %v2417_v52 }
  0x6e   : > { %715 = vmatpush.bf16.msra.mxu0 %v2243_v3 }
  0x6f   : > { %728 = vmatpush.bf16.msra.mxu1 %v2248_v7 }
  0x70   : > { %741 = vmatpush.bf16.msra.mxu2 %v2250_v8 }
  0x71   : > { %754 = vmatpush.bf16.msra.mxu3 %v2256_v12 }
  0x72   : > { %716 = vmatpush.bf16.msra.mxu0 %v2263_v16 }
  0x73   : > { %729 = vmatpush.bf16.msra.mxu1 %v2265_v17 }
  0x74   : > { %742 = vmatpush.bf16.msra.mxu2 %v2271_v21 }
  0x75   : > { %755 = vmatpush.bf16.msra.mxu3 %v2276_v25 }
  0x76   : > { %717 = vmatpush.bf16.msra.mxu0 %v2282_v29 }
  0x77   : > { %730 = vmatpush.bf16.msra.mxu1 %v2289_v33 }
  0x78   : > { %743 = vmatpush.bf16.msra.mxu2 %v2291_v34 }
  0x79   : > { %756 = vmatpush.bf16.msra.mxu3 %v2297_v38 }
  0x7a   : > { %718 = vmatpush.bf16.msra.mxu0 %v2305_v44 }
  0x7b   : > { %731 = vmatpush.bf16.msra.mxu1 %v2309_v45 }
  0x7c   : > { %744 = vmatpush.bf16.msra.mxu2 %v2311_v46 }
  0x7d   : > { %757 = vmatpush.bf16.msra.mxu3 %v2317_v50 }
  0x7e   : > { %719 = vmatpush.bf16.msra.mxu0 %v2326_v56 }
  0x7f   : > { %732 = vmatpush.bf16.msra.mxu1 %v2331_v57 }
  0x80   : > { %745 = vmatpush.bf16.msra.mxu2 %v2333_v58 }
  0x81   : > { %758 = vmatpush.bf16.msra.mxu3 %v2339_v62 }
  0x82   : > { %720 = vmatpush.bf16.msra.mxu0 %v2350_v5 }
  0x83   : > { %733 = vmatpush.bf16.msra.mxu1 %v2355_v10 }
  0x84   : > { %746 = vmatpush.bf16.msra.mxu2 %v2357_v11 }
  0x85   : > { %759 = vmatpush.bf16.msra.mxu3 %v2363_v18 }
  0x86   : > { %721 = vmatpush.bf16.msra.mxu0 %v2382_v27 }
  0x87   : > { %734 = vmatpush.bf16.msra.mxu1 %v2389_v30 }
  0x88   : > { %747 = vmatpush.bf16.msra.mxu2 %v2391_v31 }
  0x89   : > { %760 = vmatpush.bf16.msra.mxu3 %v2398_v39 }
  0x8a   : > { %722 = vmatpush.bf16.msra.mxu0 %v2407_v48 }
  0x8b   : > { %735 = vmatpush.bf16.msra.mxu1 %v2412_v49 }
  0x8c   : > { %748 = vmatpush.bf16.msra.mxu2 %v2414_v51 }
  0x8d   : > { %761 = vmatpush.bf16.msra.mxu3 %v2417_v52 }
  0xca   : > { %v517_v0 = vpop.f32.mrf.mxu0 }
  0xcb   : > { %v560_v1 = vadd.f32 %v517_v0, %v343_v61  ;;  %v530_v2 = vpop.f32.mrf.mxu1 }
  0xcc   : > { %v561_v4 = vadd.f32 %v530_v2, %v344_v63  ;;  %v590_v2 = vpop.permute.xlu0 %589 }
  0xcd   : > { %v564_v9 = vsub.f32 0.0, %v560_v1  ;;  %vm591_vm3 = vcmp.eq.s32.totalorder %v590_v2, 1 }
  0xce   : > { %v569_v13 = vsub.f32 0.0, %v561_v4  ;;  %vm1738_vm4 = vmpackc.low %vm591_vm3, %vm591_vm3 }
  0xcf   : > { %v565_v14 = vmul.f32 1.442695, %v564_v9 }
  0xd0   : > { %v570_v19 = vmul.f32 1.442695, %v569_v13 }
  0xd1   : > { %1827 = vpow2.f32 %v565_v14 }
  0xd2   : > { %v543_v23 = vpop.f32.mrf.mxu2  ;;  %1829 = vpow2.f32 %v570_v19  ;;  %v519_v28 = vpop.f32.mrf.mxu0 }
  0xd3   : > { %v556_v24 = vpop.f32.mrf.mxu3  ;;  %v532_v35 = vpop.f32.mrf.mxu1  ;;  %v562_v36 = vadd.f32 %v543_v23, %v345_v20  ;;  %v604_v20 = vld [vmem:[%s603_s18] sm:$0xff] }
  0xd4   : > { %v563_v32 = vadd.f32 %v556_v24, %v346_v15  ;;  %v606_v23 = vunpack.c.l.bf16 %v604_v20  ;;  %v607_v24 = vunpack.c.h.bf16 %v604_v20 }
  0xd5   : > { %1831 = vtanh.f32 %v562_v36 }
  0xd6   : > { %v575_v37 = vsub.f32 0.0, %v563_v32 }
  0xd7   : > { %v1828_v40 = vpop.eup %1827 }
  0xd8   : > { %v576_v41 = vmul.f32 1.442695, %v575_v37  ;;  %v1830_v42 = vpop.eup %1829  ;;  %v567_v43 = vadd.f32 1.0, %v1828_v40  ;;  %v605_v37 = vld [vmem:[%s603_s18 + $0x8] sm:$0xff]  ;;  %s803_s18 = scalar_lea.vmem %s2500_s11, %s1673_s10 [#allocation9] }
  0xd9   : > { %v572_v47 = vadd.f32 1.0, %v1830_v42  ;;  %v609_v42 = vunpack.c.h.bf16 %v605_v37 }
  0xda   : > { %1833 = vpow2.f32 %v576_v41  ;;  %v545_v53 = vpop.f32.mrf.mxu2 }
  0xdb   : > { %1835 = vrcp.f32 %v567_v43  ;;  %v558_v54 = vpop.f32.mrf.mxu3  ;;  %v1832_v55 = vpop.eup %1831  ;;  %v608_v53 = vunpack.c.l.bf16 %v605_v37 }
  0xdc   : > { %1837 = vrcp.f32 %v572_v47 }
  0xe0   : > { %v1834_v59 = vpop.eup %1833 }
  0xe1   : > { %v1836_v60 = vpop.eup %1835  ;;  %v578_v61 = vadd.f32 1.0, %v1834_v59 }
  0xe2   : > { %v1838_v63 = vpop.eup %1837  ;;  %v581_v0 = vmul.f32 %v1836_v60, %v1832_v55 }
  0xe3   : > { %v580_v1 = vmul.f32 0.0, %v1838_v63  ;;  %1839 = vrcp.f32 %v578_v61  ;;  %v792_v63 = vstv %s2544_s22  ;;  %s1013_s22 = smul.u32 5, %s2347_s21 }
  0xe4   : > { %vm793_vm5 = vcmp.lt.s32.totalorder %v792_v63, %v2370_v22 }
  0xe5   : > { %v582_v4 = vadd.f32 %v581_v0, %v580_v1  ;;  %v794_v2 = vsel %vm793_vm5, 1, %v2105_v26 }
  0xe6   : > { %796 = vperm.xlu1 %1825, %v794_v2  }
  0xe7   : > { %1841 = vtanh.f32 %v582_v4  ;;  %v2496_v6 = vsel %vm591_vm3, %v582_v4, 0.0  ;;  %v896_v4 = vstv %s2546_s5 }
  0xe8   : > { %vm897_vm6 = vcmp.lt.s32.totalorder %v896_v4, %v2370_v22 }
  0xe9   : > { %v1840_v9 = vpop.eup %1839 }
  0xed   : > { %v1842_v13 = vpop.eup %1841 }
  0xee   : > { %v584_v14 = vmul.f32 %v1842_v13, %v1840_v9 }
  0xf0   : > { %v2503_v15 = vsel %vm591_vm3, %v584_v14, 0.0  ;;  %v1739_v19 = vpack.c.bf16 %v584_v14, %v584_v14 }
  0xf1   : > { %597 = vst [vmem:[%s596_s28] sm:$0xff] %v2503_v15  ;;  %s707_s28 = scalar_lea.vmem %s2226_s1, %s1732_s30 [#allocation4]  ;;  %s1677_s30 = sshll.u32 %s2546_s5, 3 }
  0xf2   : > { %1740 = vmatmul.msk.bf16.vlgmr.msrb.gmra.mxu0 %vm1738_vm4, %v1739_v19  ;;  %1743 = vmatmul.msk.bf16.vlgmr.msrb.gmra.mxu1 %vm1738_vm4, %v1739_v19  ;;  %s1734_s5 = sshll.u32 %s2651_s7, 4 }
  0xf3   : > { %1746 = vmatmul.msk.bf16.vlgmr.msrb.gmra.mxu2 %vm1738_vm4, %v1739_v19  ;;  %1749 = vmatmul.msk.bf16.vlgmr.msrb.gmra.mxu3 %vm1738_vm4, %v1739_v19  ;;  %s915_s10 = scalar_lea.vmem %s2226_s1, %s1734_s5 [#allocation4] }
  0xf4   : > { %819 = vmatpush.bf16.msrb.mxu0 %v2243_v3  ;;  %832 = vmatpush.bf16.msrb.mxu1 %v2248_v7 }
  0xf5   : > { %845 = vmatpush.bf16.msrb.mxu2 %v2250_v8  ;;  %858 = vmatpush.bf16.msrb.mxu3 %v2256_v12 }
  0xf8   : > { %820 = vmatpush.bf16.msrb.mxu0 %v2263_v16  ;;  %833 = vmatpush.bf16.msrb.mxu1 %v2265_v17 }
  0xf9   : > { %846 = vmatpush.bf16.msrb.mxu2 %v2271_v21  ;;  %859 = vmatpush.bf16.msrb.mxu3 %v2276_v25 }
  0xfc   : > { %821 = vmatpush.bf16.msrb.mxu0 %v2282_v29  ;;  %834 = vmatpush.bf16.msrb.mxu1 %v2289_v33 }
  0xfd   : > { %847 = vmatpush.bf16.msrb.mxu2 %v2291_v34  ;;  %860 = vmatpush.bf16.msrb.mxu3 %v2297_v38 }
 0x100   : > { %822 = vmatpush.bf16.msrb.mxu0 %v2305_v44  ;;  %835 = vmatpush.bf16.msrb.mxu1 %v2309_v45 }
 0x101   : > { %848 = vmatpush.bf16.msrb.mxu2 %v2311_v46  ;;  %861 = vmatpush.bf16.msrb.mxu3 %v2317_v50 }
 0x104   : > { %823 = vmatpush.bf16.msrb.mxu0 %v2326_v56  ;;  %836 = vmatpush.bf16.msrb.mxu1 %v2331_v57 }
 0x105   : > { %849 = vmatpush.bf16.msrb.mxu2 %v2333_v58  ;;  %862 = vmatpush.bf16.msrb.mxu3 %v2339_v62 }
 0x108   : > { %824 = vmatpush.bf16.msrb.mxu0 %v2350_v5  ;;  %837 = vmatpush.bf16.msrb.mxu1 %v2355_v10 }
 0x109   : > { %850 = vmatpush.bf16.msrb.mxu2 %v2357_v11  ;;  %863 = vmatpush.bf16.msrb.mxu3 %v2363_v18 }
 0x10c   : > { %825 = vmatpush.bf16.msrb.mxu0 %v2382_v27  ;;  %838 = vmatpush.bf16.msrb.mxu1 %v2389_v30 }
 0x10d   : > { %851 = vmatpush.bf16.msrb.mxu2 %v2391_v31  ;;  %864 = vmatpush.bf16.msrb.mxu3 %v2398_v39 }
 0x110   : > { %826 = vmatpush.bf16.msrb.mxu0 %v2407_v48  ;;  %839 = vmatpush.bf16.msrb.mxu1 %v2412_v49 }
 0x111   : > { %852 = vmatpush.bf16.msrb.mxu2 %v2414_v51  ;;  %865 = vmatpush.bf16.msrb.mxu3 %v2417_v52 }
 0x16f   : > { %v620_v28 = vpop.f32.mrf.mxu0  ;;  %v633_v32 = vpop.f32.mrf.mxu1 }
 0x170   : > { %v663_v35 = vadd.f32 %v620_v28, %v606_v23  ;;  %v664_v36 = vadd.f32 %v633_v32, %v607_v24  ;;  %v898_v28 = vsel %vm897_vm6, 1, %v2105_v26  ;;  %v1309_v32 = vstv %s1220_s6  ;;  %s1682_s6 = sshll.u32 %s2093_s15, 1 }
 0x171   : > { %900 = vperm.xlu1 %1825, %v898_v28   ;;  %vm1310_vm7 = vcmp.lt.s32.totalorder %v1309_v32, %v2370_v22 }
 0x172   : > { %v667_v40 = vsub.f32 0.0, %v663_v35  ;;  %v672_v41 = vsub.f32 0.0, %v664_v36 }
 0x174   : > { %v668_v43 = vmul.f32 1.442695, %v667_v40  ;;  %v673_v47 = vmul.f32 1.442695, %v672_v41 }
 0x176   : > { %1843 = vpow2.f32 %v668_v43  ;;  %v646_v54 = vpop.f32.mrf.mxu2  ;;  %v659_v55 = vpop.f32.mrf.mxu3 }
 0x177   : > { %1845 = vpow2.f32 %v673_v47  ;;  %v666_v59 = vadd.f32 %v659_v55, %v609_v42  ;;  %v622_v60 = vpop.f32.mrf.mxu0  ;;  %v635_v61 = vpop.f32.mrf.mxu1  ;;  %v665_v1 = vadd.f32 %v646_v54, %v608_v53  ;;  %v1311_v47 = vsel %vm1310_vm7, 1, %v2105_v26 }
 0x178   : > { %v693_v53 = vpop.permute.xlu0 %692 }
 0x179   : > { %v678_v0 = vsub.f32 0.0, %v666_v59  ;;  %vm694_vm8 = vcmp.eq.s32.totalorder %v693_v53, 1  ;;  %1313 = vperm.xlu1 %1825, %v1311_v47  }
 0x17b   : > { %v679_v9 = vmul.f32 1.442695, %v678_v0 }
 0x17c   : > { %v1844_v13 = vpop.eup %1843 }
 0x17d   : > { %v1846_v14 = vpop.eup %1845  ;;  %v670_v19 = vadd.f32 1.0, %v1844_v13  ;;  %1847 = vpow2.f32 %v679_v9 }
 0x17e   : > { %v675_v20 = vadd.f32 1.0, %v1846_v14  ;;  %1849 = vtanh.f32 %v665_v1  ;;  %v648_v23 = vpop.f32.mrf.mxu2  ;;  %v661_v24 = vpop.f32.mrf.mxu3 }
 0x17f   : > { %1851 = vrcp.f32 %v670_v19  ;;  %v709_v19 = vld [vmem:[%s707_s28 + $0x8] sm:$0xff] }
 0x180   : > { %1853 = vrcp.f32 %v675_v20  ;;  %v713_v24 = vunpack.c.h.bf16 %v709_v19 }
 0x183   : > { %v1848_v35 = vpop.eup %1847 }
 0x184   : > { %v1850_v36 = vpop.eup %1849  ;;  %v681_v42 = vadd.f32 1.0, %v1848_v35  ;;  %v712_v35 = vunpack.c.l.bf16 %v709_v19 }
 0x185   : > { %v1852_v37 = vpop.eup %1851 }
 0x186   : > { %v1854_v40 = vpop.eup %1853  ;;  %v684_v41 = vmul.f32 %v1852_v37, %v1850_v36  ;;  %1855 = vrcp.f32 %v681_v42 }
 0x187   : > { %v683_v43 = vmul.f32 %v1854_v40, %v2496_v6 }
 0x189   : > { %v685_v54 = vadd.f32 %v684_v41, %v683_v43 }
 0x18b   : > { %1857 = vtanh.f32 %v685_v54  ;;  %v2559_v55 = vsel %vm694_vm8, %v685_v54, %v2496_v6  ;;  %v708_v6 = vld [vmem:[%s707_s28] sm:$0xff]  ;;  %s907_s28 = scalar_lea.vmem %s2500_s11, %s1677_s30 [#allocation9] }
 0x18c   : > { %v1856_v59 = vpop.eup %1855  ;;  %v711_v2 = vunpack.c.h.bf16 %v708_v6 }
 0x191   : > { %v1858_v60 = vpop.eup %1857 }
 0x192   : > { %v687_v61 = vmul.f32 %v1858_v60, %v1856_v59 }
 0x194   : > { %v697_v63 = vsel %vm694_vm8, %v687_v61, 0.0  ;;  %v2564_v0 = vsel %vm694_vm8, %v687_v61, %v2503_v15  ;;  %v710_v15 = vunpack.c.l.bf16 %v708_v6 }
 0x195   : > { %700 = vst [vmem:[%s699_s9] sm:$0xff] %v697_v63  ;;  %v714_v1 = vpack.c.bf16 %v2564_v0, %v2564_v0  ;;  %s2653_s9 = sadd.s32 %s1682_s6, %s1013_s22  ;;  %s1736_s6 = sshll.u32 %s2420_s4, 4 }
 0x196   : > { %s1685_s29 = sshll.u32 %s2653_s9, 3 }
 0x197   : > { %723 = vmatmul.bf16.vlgmr.msra.gmra.mxu0 %v714_v1  ;;  %736 = vmatmul.bf16.vlgmr.msra.gmra.mxu1 %v714_v1  ;;  %s1115_s22 = scalar_lea.vmem %s2500_s11, %s1685_s29 [#allocation9] }
 0x198   : > { %749 = vmatmul.bf16.vlgmr.msra.gmra.mxu2 %v714_v1  ;;  %762 = vmatmul.bf16.vlgmr.msra.gmra.mxu3 %v714_v1 }
 0x199   : > { %923 = vmatpush.bf16.msra.mxu0 %v2243_v3  ;;  %936 = vmatpush.bf16.msra.mxu1 %v2248_v7 }
 0x19a   : > { %949 = vmatpush.bf16.msra.mxu2 %v2250_v8  ;;  %962 = vmatpush.bf16.msra.mxu3 %v2256_v12 }
 0x19d   : > { %924 = vmatpush.bf16.msra.mxu0 %v2263_v16  ;;  %937 = vmatpush.bf16.msra.mxu1 %v2265_v17 }
 0x19e   : > { %950 = vmatpush.bf16.msra.mxu2 %v2271_v21  ;;  %963 = vmatpush.bf16.msra.mxu3 %v2276_v25 }
 0x1a1   : > { %925 = vmatpush.bf16.msra.mxu0 %v2282_v29  ;;  %938 = vmatpush.bf16.msra.mxu1 %v2289_v33 }
 0x1a2   : > { %951 = vmatpush.bf16.msra.mxu2 %v2291_v34  ;;  %964 = vmatpush.bf16.msra.mxu3 %v2297_v38 }
 0x1a5   : > { %926 = vmatpush.bf16.msra.mxu0 %v2305_v44  ;;  %939 = vmatpush.bf16.msra.mxu1 %v2309_v45 }
 0x1a6   : > { %952 = vmatpush.bf16.msra.mxu2 %v2311_v46  ;;  %965 = vmatpush.bf16.msra.mxu3 %v2317_v50 }
 0x1a9   : > { %927 = vmatpush.bf16.msra.mxu0 %v2326_v56  ;;  %940 = vmatpush.bf16.msra.mxu1 %v2331_v57 }
 0x1aa   : > { %953 = vmatpush.bf16.msra.mxu2 %v2333_v58  ;;  %966 = vmatpush.bf16.msra.mxu3 %v2339_v62 }
 0x1ad   : > { %928 = vmatpush.bf16.msra.mxu0 %v2350_v5  ;;  %941 = vmatpush.bf16.msra.mxu1 %v2355_v10 }
 0x1ae   : > { %954 = vmatpush.bf16.msra.mxu2 %v2357_v11  ;;  %967 = vmatpush.bf16.msra.mxu3 %v2363_v18 }
 0x1b1   : > { %929 = vmatpush.bf16.msra.mxu0 %v2382_v27  ;;  %942 = vmatpush.bf16.msra.mxu1 %v2389_v30 }
 0x1b2   : > { %955 = vmatpush.bf16.msra.mxu2 %v2391_v31  ;;  %968 = vmatpush.bf16.msra.mxu3 %v2398_v39 }
 0x1b5   : > { %930 = vmatpush.bf16.msra.mxu0 %v2407_v48  ;;  %943 = vmatpush.bf16.msra.mxu1 %v2412_v49 }
 0x1b6   : > { %956 = vmatpush.bf16.msra.mxu2 %v2414_v51  ;;  %969 = vmatpush.bf16.msra.mxu3 %v2417_v52 }
 0x214   : > { %v724_v4 = vpop.f32.mrf.mxu0  ;;  %v737_v9 = vpop.f32.mrf.mxu1 }
 0x215   : > { %v767_v13 = vadd.f32 %v724_v4, %v710_v15  ;;  %v768_v14 = vadd.f32 %v737_v9, %v711_v2 }
 0x217   : > { %v771_v20 = vsub.f32 0.0, %v767_v13  ;;  %v776_v23 = vsub.f32 0.0, %v768_v14  ;;  %v797_v14 = vpop.permute.xlu1 %796 }
 0x218   : > { %vm798_vm9 = vcmp.eq.s32.totalorder %v797_v14, 1 }
 0x219   : > { %v772_v28 = vmul.f32 1.442695, %v771_v20  ;;  %v777_v32 = vmul.f32 1.442695, %v776_v23 }
 0x21b   : > { %1859 = vpow2.f32 %v772_v28  ;;  %v750_v36 = vpop.f32.mrf.mxu2  ;;  %v763_v37 = vpop.f32.mrf.mxu3 }
 0x21c   : > { %1861 = vpow2.f32 %v777_v32  ;;  %v770_v40 = vadd.f32 %v763_v37, %v713_v24  ;;  %v726_v41 = vpop.f32.mrf.mxu0  ;;  %v739_v42 = vpop.f32.mrf.mxu1  ;;  %v769_v47 = vadd.f32 %v750_v36, %v712_v35 }
 0x21e   : > { %v782_v43 = vsub.f32 0.0, %v770_v40 }
 0x220   : > { %v783_v53 = vmul.f32 1.442695, %v782_v43 }
 0x221   : > { %v1860_v54 = vpop.eup %1859 }
 0x222   : > { %v1862_v59 = vpop.eup %1861  ;;  %v774_v60 = vadd.f32 1.0, %v1860_v54  ;;  %1863 = vpow2.f32 %v783_v53  ;;  %v813_v53 = vld [vmem:[%s811_s19 + $0x8] sm:$0xff] }
 0x223   : > { %v779_v61 = vadd.f32 1.0, %v1862_v59  ;;  %1865 = vtanh.f32 %v769_v47  ;;  %v752_v63 = vpop.f32.mrf.mxu2  ;;  %v765_v1 = vpop.f32.mrf.mxu3 }
 0x224   : > { %1867 = vrcp.f32 %v774_v60  ;;  %v817_v60 = vunpack.c.h.bf16 %v813_v53  ;;  %v816_v1 = vunpack.c.l.bf16 %v813_v53 }
 0x225   : > { %1869 = vrcp.f32 %v779_v61 }
 0x228   : > { %v1864_v6 = vpop.eup %1863 }
 0x229   : > { %v1866_v15 = vpop.eup %1865  ;;  %v785_v13 = vadd.f32 1.0, %v1864_v6 }
 0x22a   : > { %v1868_v2 = vpop.eup %1867 }
 0x22b   : > { %v1870_v4 = vpop.eup %1869  ;;  %v788_v9 = vmul.f32 %v1868_v2, %v1866_v15  ;;  %1871 = vrcp.f32 %v785_v13  ;;  %v1000_v13 = vstv %s2651_s7 }
 0x22c   : > { %v787_v19 = vmul.f32 %v1870_v4, %v2559_v55  ;;  %vm1001_vm10 = vcmp.lt.s32.totalorder %v1000_v13, %v2370_v22 }
 0x22e   : > { %v789_v20 = vadd.f32 %v788_v9, %v787_v19 }
 0x230   : > { %1873 = vtanh.f32 %v789_v20  ;;  %v2604_v23 = vsel %vm798_vm9, %v789_v20, %v2559_v55  ;;  %v812_v55 = vld [vmem:[%s811_s19] sm:$0xff]  ;;  %v1002_v20 = vsel %vm1001_vm10, 1, %v2105_v26  ;;  %s1735_s19 = sshll.u32 %s2653_s9, 4 }
 0x231   : > { %v1872_v24 = vpop.eup %1871  ;;  %v815_v40 = vunpack.c.h.bf16 %v812_v55  ;;  %1004 = vperm.xlu2 %1826, %v1002_v20   ;;  %s1019_s23 = scalar_lea.vmem %s2226_s1, %s1735_s19 [#allocation4]  ;;  %s1344_s19 = sshll.u32 %s2500_s11, 4  ;;  %s2777_s19 = int_to_ptr.vmem [resolvable:$true] %s1344_s19 }
 0x236   : > { %v1874_v28 = vpop.eup %1873 }
 0x237   : > { %v791_v32 = vmul.f32 %v1874_v28, %v1872_v24  ;;  %v1104_v24 = vstv %s2653_s9  ;;  %s1688_s9 = sshll.u32 %s2420_s4, 3 }
 0x238   : > { %vm1105_vm11 = vcmp.lt.s32.totalorder %v1104_v24, %v2370_v22  ;;  %v901_v22 = vpop.permute.xlu1 %900  ;;  %v917_v24 = vld [vmem:[%s915_s10 + $0x8] sm:$0xff]  ;;  %s1218_s30 = scalar_lea.vmem %s2500_s11, %s1688_s9 [#allocation9]  ;;  %s2035_s9 = scalar_lea.hbm %s2818_s3, 128 }
 0x239   : > { %v2609_v35 = vsel %vm798_vm9, %v791_v32, %v2564_v0  ;;  %v801_v36 = vsel %vm798_vm9, %v791_v32, 0.0  ;;  %v814_v0 = vunpack.c.l.bf16 %v812_v55  ;;  %vm902_vm12 = vcmp.eq.s32.totalorder %v901_v22, 1 }
 0x23a   : > { %804 = vst [vmem:[%s803_s18] sm:$0xff] %v801_v36  ;;  %v818_v37 = vpack.c.bf16 %v2609_v35, %v2609_v35  ;;  %s1681_s18 = sshll.u32 %s2651_s7, 3  ;;  %s1122_s7 = scalar_lea.vmem %s2226_s1, %s1736_s6 [#allocation4] }
 0x23b   : > { %s1011_s24 = scalar_lea.vmem %s2500_s11, %s1681_s18 [#allocation9] }
 0x23c   : > { %827 = vmatmul.bf16.vlgmr.msrb.gmra.mxu0 %v818_v37  ;;  %840 = vmatmul.bf16.vlgmr.msrb.gmra.mxu1 %v818_v37 }
 0x23d   : > { %853 = vmatmul.bf16.vlgmr.msrb.gmra.mxu2 %v818_v37  ;;  %866 = vmatmul.bf16.vlgmr.msrb.gmra.mxu3 %v818_v37 }
 0x23e   : > { %1027 = vmatpush.bf16.msrb.mxu0 %v2243_v3  ;;  %1040 = vmatpush.bf16.msrb.mxu1 %v2248_v7 }
 0x23f   : > { %1053 = vmatpush.bf16.msrb.mxu2 %v2250_v8  ;;  %1066 = vmatpush.bf16.msrb.mxu3 %v2256_v12 }
 0x242   : > { %1028 = vmatpush.bf16.msrb.mxu0 %v2263_v16  ;;  %1041 = vmatpush.bf16.msrb.mxu1 %v2265_v17 }
 0x243   : > { %1054 = vmatpush.bf16.msrb.mxu2 %v2271_v21  ;;  %1067 = vmatpush.bf16.msrb.mxu3 %v2276_v25 }
 0x246   : > { %1029 = vmatpush.bf16.msrb.mxu0 %v2282_v29  ;;  %1042 = vmatpush.bf16.msrb.mxu1 %v2289_v33 }
 0x247   : > { %1055 = vmatpush.bf16.msrb.mxu2 %v2291_v34  ;;  %1068 = vmatpush.bf16.msrb.mxu3 %v2297_v38 }
 0x24a   : > { %1030 = vmatpush.bf16.msrb.mxu0 %v2305_v44  ;;  %1043 = vmatpush.bf16.msrb.mxu1 %v2309_v45 }
 0x24b   : > { %1056 = vmatpush.bf16.msrb.mxu2 %v2311_v46  ;;  %1069 = vmatpush.bf16.msrb.mxu3 %v2317_v50 }
 0x24e   : > { %1031 = vmatpush.bf16.msrb.mxu0 %v2326_v56  ;;  %1044 = vmatpush.bf16.msrb.mxu1 %v2331_v57 }
 0x24f   : > { %1057 = vmatpush.bf16.msrb.mxu2 %v2333_v58  ;;  %1070 = vmatpush.bf16.msrb.mxu3 %v2339_v62 }
 0x252   : > { %1032 = vmatpush.bf16.msrb.mxu0 %v2350_v5  ;;  %1045 = vmatpush.bf16.msrb.mxu1 %v2355_v10 }
 0x253   : > { %1058 = vmatpush.bf16.msrb.mxu2 %v2357_v11  ;;  %1071 = vmatpush.bf16.msrb.mxu3 %v2363_v18 }
 0x256   : > { %1033 = vmatpush.bf16.msrb.mxu0 %v2382_v27  ;;  %1046 = vmatpush.bf16.msrb.mxu1 %v2389_v30 }
 0x257   : > { %1059 = vmatpush.bf16.msrb.mxu2 %v2391_v31  ;;  %1072 = vmatpush.bf16.msrb.mxu3 %v2398_v39 }
 0x25a   : > { %1034 = vmatpush.bf16.msrb.mxu0 %v2407_v48  ;;  %1047 = vmatpush.bf16.msrb.mxu1 %v2412_v49 }
 0x25b   : > { %1060 = vmatpush.bf16.msrb.mxu2 %v2414_v51  ;;  %1073 = vmatpush.bf16.msrb.mxu3 %v2417_v52 }
 0x2b9   : > { %v828_v41 = vpop.f32.mrf.mxu0  ;;  %v841_v42 = vpop.f32.mrf.mxu1 }
 0x2ba   : > { %v871_v43 = vadd.f32 %v828_v41, %v814_v0  ;;  %v872_v47 = vadd.f32 %v841_v42, %v815_v40  ;;  %v1106_v41 = vsel %vm1105_vm11, 1, %v2105_v26 }
 0x2bb   : > { %1108 = vperm.xlu2 %1826, %v1106_v41  }
 0x2bc   : > { %v875_v54 = vsub.f32 0.0, %v871_v43  ;;  %v880_v59 = vsub.f32 0.0, %v872_v47 }
 0x2be   : > { %v876_v61 = vmul.f32 1.442695, %v875_v54  ;;  %v881_v63 = vmul.f32 1.442695, %v880_v59 }
 0x2c0   : > { %1875 = vpow2.f32 %v876_v61  ;;  %v854_v6 = vpop.f32.mrf.mxu2  ;;  %v867_v15 = vpop.f32.mrf.mxu3 }
 0x2c1   : > { %1877 = vpow2.f32 %v881_v63  ;;  %v874_v2 = vadd.f32 %v867_v15, %v817_v60  ;;  %v830_v4 = vpop.f32.mrf.mxu0  ;;  %v843_v9 = vpop.f32.mrf.mxu1  ;;  %v873_v19 = vadd.f32 %v854_v6, %v816_v1 }
 0x2c3   : > { %v886_v14 = vsub.f32 0.0, %v874_v2 }
 0x2c5   : > { %v887_v28 = vmul.f32 1.442695, %v886_v14 }
 0x2c6   : > { %v1876_v32 = vpop.eup %1875 }
 0x2c7   : > { %v1878_v36 = vpop.eup %1877  ;;  %v878_v37 = vadd.f32 1.0, %v1876_v32  ;;  %1879 = vpow2.f32 %v887_v28 }
 0x2c8   : > { %v883_v55 = vadd.f32 1.0, %v1878_v36  ;;  %1881 = vtanh.f32 %v873_v19  ;;  %v856_v0 = vpop.f32.mrf.mxu2  ;;  %v869_v40 = vpop.f32.mrf.mxu3  ;;  %v921_v36 = vunpack.c.h.bf16 %v917_v24 }
 0x2c9   : > { %1883 = vrcp.f32 %v878_v37  ;;  %v920_v0 = vunpack.c.l.bf16 %v917_v24 }
 0x2ca   : > { %1885 = vrcp.f32 %v883_v55 }
 0x2cd   : > { %v1880_v42 = vpop.eup %1879 }
 0x2ce   : > { %v1882_v43 = vpop.eup %1881  ;;  %v889_v59 = vadd.f32 1.0, %v1880_v42 }
 0x2cf   : > { %v1884_v47 = vpop.eup %1883 }
 0x2d0   : > { %v1886_v53 = vpop.eup %1885  ;;  %v892_v54 = vmul.f32 %v1884_v47, %v1882_v43  ;;  %1887 = vrcp.f32 %v889_v59 }
 0x2d1   : > { %v891_v60 = vmul.f32 %v1886_v53, %v2604_v23 }
 0x2d3   : > { %v893_v61 = vadd.f32 %v892_v54, %v891_v60 }
 0x2d5   : > { %1889 = vtanh.f32 %v893_v61  ;;  %v2663_v63 = vsel %vm902_vm12, %v893_v61, %v2604_v23  ;;  %v916_v23 = vld [vmem:[%s915_s10] sm:$0xff] }
 0x2d6   : > { %v1888_v26 = vpop.eup %1887  ;;  %v919_v9 = vunpack.c.h.bf16 %v916_v23 }
 0x2db   : > { %v1890_v1 = vpop.eup %1889 }
 0x2dc   : > { %v895_v6 = vmul.f32 %v1890_v1, %v1888_v26 }
 0x2de   : > { %v905_v15 = vsel %vm902_vm12, %v895_v6, 0.0  ;;  %v2668_v2 = vsel %vm902_vm12, %v895_v6, %v2609_v35  ;;  %v918_v35 = vunpack.c.l.bf16 %v916_v23 }
 0x2df   : > { %908 = vst [vmem:[%s907_s28] sm:$0xff] %v905_v15  ;;  %v922_v4 = vpack.c.bf16 %v2668_v2, %v2668_v2  ;;  %s1737_s28 = smul.u32 112, %s2347_s21 }
 0x2e1   : > { %931 = vmatmul.bf16.vlgmr.msra.gmra.mxu0 %v922_v4  ;;  %944 = vmatmul.bf16.vlgmr.msra.gmra.mxu1 %v922_v4  ;;  %s1224_s5 = scalar_lea.vmem %s2226_s1, %s1737_s28 [#allocation4]  ;;  %s1693_s1 = sshll.u32 %s2093_s15, 3 }
 0x2e2   : > { %957 = vmatmul.bf16.vlgmr.msra.gmra.mxu2 %v922_v4  ;;  %970 = vmatmul.bf16.vlgmr.msra.gmra.mxu3 %v922_v4  ;;  %s1343_s18 = scalar_lea.hbm %s2818_s3, %s1693_s1  ;;  %s1325_s15 = scalar_lea.sflag [#allocation6], %s2222_s8 }
 0x2e3   : > { %1130 = vmatpush.bf16.msra.mxu0 %v2243_v3  ;;  %1143 = vmatpush.bf16.msra.mxu1 %v2248_v7 }
 0x2e4   : > { %1156 = vmatpush.bf16.msra.mxu2 %v2250_v8  ;;  %1169 = vmatpush.bf16.msra.mxu3 %v2256_v12 }
 0x2e7   : > { %1131 = vmatpush.bf16.msra.mxu0 %v2263_v16  ;;  %1144 = vmatpush.bf16.msra.mxu1 %v2265_v17 }
 0x2e8   : > { %1157 = vmatpush.bf16.msra.mxu2 %v2271_v21  ;;  %1170 = vmatpush.bf16.msra.mxu3 %v2276_v25 }
 0x2eb   : > { %1132 = vmatpush.bf16.msra.mxu0 %v2282_v29  ;;  %1145 = vmatpush.bf16.msra.mxu1 %v2289_v33 }
 0x2ec   : > { %1158 = vmatpush.bf16.msra.mxu2 %v2291_v34  ;;  %1171 = vmatpush.bf16.msra.mxu3 %v2297_v38 }
 0x2ef   : > { %1133 = vmatpush.bf16.msra.mxu0 %v2305_v44  ;;  %1146 = vmatpush.bf16.msra.mxu1 %v2309_v45 }
 0x2f0   : > { %1159 = vmatpush.bf16.msra.mxu2 %v2311_v46  ;;  %1172 = vmatpush.bf16.msra.mxu3 %v2317_v50 }
 0x2f3   : > { %1134 = vmatpush.bf16.msra.mxu0 %v2326_v56  ;;  %1147 = vmatpush.bf16.msra.mxu1 %v2331_v57 }
 0x2f4   : > { %1160 = vmatpush.bf16.msra.mxu2 %v2333_v58  ;;  %1173 = vmatpush.bf16.msra.mxu3 %v2339_v62 }
 0x2f7   : > { %1135 = vmatpush.bf16.msra.mxu0 %v2350_v5  ;;  %1148 = vmatpush.bf16.msra.mxu1 %v2355_v10 }
 0x2f8   : > { %1161 = vmatpush.bf16.msra.mxu2 %v2357_v11  ;;  %1174 = vmatpush.bf16.msra.mxu3 %v2363_v18 }
 0x2fb   : > { %1136 = vmatpush.bf16.msra.mxu0 %v2382_v27  ;;  %1149 = vmatpush.bf16.msra.mxu1 %v2389_v30 }
 0x2fc   : > { %1162 = vmatpush.bf16.msra.mxu2 %v2391_v31  ;;  %1175 = vmatpush.bf16.msra.mxu3 %v2398_v39 }
 0x2ff   : > { %1137 = vmatpush.bf16.msra.mxu0 %v2407_v48  ;;  %1150 = vmatpush.bf16.msra.mxu1 %v2412_v49 }
 0x300   : > { %1163 = vmatpush.bf16.msra.mxu2 %v2414_v51  ;;  %1176 = vmatpush.bf16.msra.mxu3 %v2417_v52 }
 0x35e   : > { %v932_v13 = vpop.f32.mrf.mxu0  ;;  %v945_v14 = vpop.f32.mrf.mxu1 }
 0x35f   : > { %v975_v19 = vadd.f32 %v932_v13, %v918_v35  ;;  %v976_v20 = vadd.f32 %v945_v14, %v919_v9  ;;  %v1005_v35 = vpop.permute.xlu2 %1004 }
 0x360   : > { %vm1006_vm13 = vcmp.eq.s32.totalorder %v1005_v35, 1  ;;  %v1124_v35 = vld [vmem:[%s1122_s7 + $0x8] sm:$0xff] }
 0x361   : > { %v979_v28 = vsub.f32 0.0, %v975_v19  ;;  %v984_v32 = vsub.f32 0.0, %v976_v20 }
 0x363   : > { %v980_v37 = vmul.f32 1.442695, %v979_v28  ;;  %v985_v55 = vmul.f32 1.442695, %v984_v32 }
 0x365   : > { %1891 = vpow2.f32 %v980_v37  ;;  %v958_v40 = vpop.f32.mrf.mxu2  ;;  %v971_v41 = vpop.f32.mrf.mxu3 }
 0x366   : > { %1893 = vpow2.f32 %v985_v55  ;;  %v978_v42 = vadd.f32 %v971_v41, %v921_v36  ;;  %v934_v43 = vpop.f32.mrf.mxu0  ;;  %v947_v47 = vpop.f32.mrf.mxu1  ;;  %v977_v54 = vadd.f32 %v958_v40, %v920_v0 }
 0x367   : > { %v1109_v40 = vpop.permute.xlu2 %1108 }
 0x368   : > { %v990_v53 = vsub.f32 0.0, %v978_v42  ;;  %vm1110_vm14 = vcmp.eq.s32.totalorder %v1109_v40, 1 }
 0x36a   : > { %v991_v59 = vmul.f32 1.442695, %v990_v53 }
 0x36b   : > { %v1892_v60 = vpop.eup %1891 }
 0x36c   : > { %v1894_v22 = vpop.eup %1893  ;;  %v982_v61 = vadd.f32 1.0, %v1892_v60  ;;  %1895 = vpow2.f32 %v991_v59 }
 0x36d   : > { %v987_v26 = vadd.f32 1.0, %v1894_v22  ;;  %1897 = vtanh.f32 %v977_v54  ;;  %v960_v1 = vpop.f32.mrf.mxu2  ;;  %v973_v6 = vpop.f32.mrf.mxu3 }
 0x36e   : > { %1899 = vrcp.f32 %v982_v61  ;;  %v1123_v61 = vld [vmem:[%s1122_s7] sm:$0xff] }
 0x36f   : > { %1901 = vrcp.f32 %v987_v26  ;;  %v1125_v26 = vunpack.c.l.bf16 %v1123_v61  ;;  %v1126_v1 = vunpack.c.h.bf16 %v1123_v61 }
 0x372   : > { %v1896_v15 = vpop.eup %1895 }
 0x373   : > { %v1898_v4 = vpop.eup %1897  ;;  %v993_v14 = vadd.f32 1.0, %v1896_v15 }
 0x374   : > { %v1900_v23 = vpop.eup %1899 }
 0x375   : > { %v1902_v9 = vpop.eup %1901  ;;  %v996_v13 = vmul.f32 %v1900_v23, %v1898_v4  ;;  %1903 = vrcp.f32 %v993_v14  ;;  %v1128_v14 = vunpack.c.h.bf16 %v1124_v35 }
 0x376   : > { %v995_v19 = vmul.f32 %v1902_v9, %v2663_v63 }
 0x378   : > { %v997_v20 = vadd.f32 %v996_v13, %v995_v19 }
 0x37a   : > { %1905 = vtanh.f32 %v997_v20  ;;  %v2708_v24 = vsel %vm1006_vm13, %v997_v20, %v2663_v63 }
 0x37b   : > { %v1904_v28 = vpop.eup %1903 }
 0x380   : > { %v1906_v32 = vpop.eup %1905 }
 0x381   : > { %v999_v36 = vmul.f32 %v1906_v32, %v1904_v28 }
 0x383   : > { %v2713_v37 = vsel %vm1006_vm13, %v999_v36, %v2668_v2  ;;  %v1009_v55 = vsel %vm1006_vm13, %v999_v36, 0.0 }
 0x384   : > { %1012 = vst [vmem:[%s1011_s24] sm:$0xff] %v1009_v55  ;;  %v1026_v0 = vpack.c.bf16 %v2713_v37, %v2713_v37  ;;  %s1691_s24 = smul.u32 56, %s2347_s21 }
 0x386   : > { %1035 = vmatmul.bf16.vlgmr.msrb.gmra.mxu0 %v1026_v0  ;;  %1048 = vmatmul.bf16.vlgmr.msrb.gmra.mxu1 %v1026_v0  ;;  %s1320_s29 = scalar_lea.vmem %s2500_s11, %s1691_s24 [#allocation9] }
 0x387   : > { %1061 = vmatmul.bf16.vlgmr.msrb.gmra.mxu2 %v1026_v0  ;;  %1074 = vmatmul.bf16.vlgmr.msrb.gmra.mxu3 %v1026_v0 }
 0x388   : > { %1232 = vmatpush.bf16.msrb.mxu0 %v2243_v3  ;;  %1245 = vmatpush.bf16.msrb.mxu1 %v2248_v7  ;;  %v1020_v3 = vld [vmem:[%s1019_s23] sm:$0xff] }
 0x389   : > { %1258 = vmatpush.bf16.msrb.mxu2 %v2250_v8  ;;  %1271 = vmatpush.bf16.msrb.mxu3 %v2256_v12  ;;  %v1022_v7 = vunpack.c.l.bf16 %v1020_v3  ;;  %v1023_v8 = vunpack.c.h.bf16 %v1020_v3 }
 0x38c   : > { %1233 = vmatpush.bf16.msrb.mxu0 %v2263_v16  ;;  %1246 = vmatpush.bf16.msrb.mxu1 %v2265_v17 }
 0x38d   : > { %1259 = vmatpush.bf16.msrb.mxu2 %v2271_v21  ;;  %1272 = vmatpush.bf16.msrb.mxu3 %v2276_v25  ;;  %v1021_v25 = vld [vmem:[%s1019_s23 + $0x8] sm:$0xff]  ;;  %s1346_s23 = sshll.u32 %s1343_s18, 4  ;;  %s1347_s23 = int_to_ptr.hbm [resolvable:$true] %s1346_s23 }
 0x390   : > { %1234 = vmatpush.bf16.msrb.mxu0 %v2282_v29  ;;  %1247 = vmatpush.bf16.msrb.mxu1 %v2289_v33 }
 0x391   : > { %1260 = vmatpush.bf16.msrb.mxu2 %v2291_v34  ;;  %1273 = vmatpush.bf16.msrb.mxu3 %v2297_v38  ;;  %v1025_v34 = vunpack.c.h.bf16 %v1021_v25 }
 0x394   : > { %1235 = vmatpush.bf16.msrb.mxu0 %v2305_v44  ;;  %1248 = vmatpush.bf16.msrb.mxu1 %v2309_v45  ;;  %v1024_v45 = vunpack.c.l.bf16 %v1021_v25 }
 0x395   : > { %1261 = vmatpush.bf16.msrb.mxu2 %v2311_v46  ;;  %1274 = vmatpush.bf16.msrb.mxu3 %v2317_v50 }
 0x398   : > { %1236 = vmatpush.bf16.msrb.mxu0 %v2326_v56  ;;  %1249 = vmatpush.bf16.msrb.mxu1 %v2331_v57 }
 0x399   : > { %1262 = vmatpush.bf16.msrb.mxu2 %v2333_v58  ;;  %1275 = vmatpush.bf16.msrb.mxu3 %v2339_v62 }
 0x39c   : > { %1237 = vmatpush.bf16.msrb.mxu0 %v2350_v5  ;;  %1250 = vmatpush.bf16.msrb.mxu1 %v2355_v10 }
 0x39d   : > { %1263 = vmatpush.bf16.msrb.mxu2 %v2357_v11  ;;  %1276 = vmatpush.bf16.msrb.mxu3 %v2363_v18 }
 0x3a0   : > { %1238 = vmatpush.bf16.msrb.mxu0 %v2382_v27  ;;  %1251 = vmatpush.bf16.msrb.mxu1 %v2389_v30 }
 0x3a1   : > { %1264 = vmatpush.bf16.msrb.mxu2 %v2391_v31  ;;  %1277 = vmatpush.bf16.msrb.mxu3 %v2398_v39 }
 0x3a4   : > { %1239 = vmatpush.bf16.msrb.mxu0 %v2407_v48  ;;  %1252 = vmatpush.bf16.msrb.mxu1 %v2412_v49 }
 0x3a5   : > { %1265 = vmatpush.bf16.msrb.mxu2 %v2414_v51  ;;  %1278 = vmatpush.bf16.msrb.mxu3 %v2417_v52 }
 0x403   : > { %v1036_v12 = vpop.f32.mrf.mxu0  ;;  %v1049_v16 = vpop.f32.mrf.mxu1 }
 0x404   : > { %v1079_v17 = vadd.f32 %v1036_v12, %v1022_v7  ;;  %v1080_v21 = vadd.f32 %v1049_v16, %v1023_v8 }
 0x406   : > { %v1083_v29 = vsub.f32 0.0, %v1079_v17  ;;  %v1088_v33 = vsub.f32 0.0, %v1080_v21 }
 0x408   : > { %v1084_v38 = vmul.f32 1.442695, %v1083_v29  ;;  %v1089_v44 = vmul.f32 1.442695, %v1088_v33 }
 0x40a   : > { %1907 = vpow2.f32 %v1084_v38  ;;  %v1062_v46 = vpop.f32.mrf.mxu2  ;;  %v1075_v50 = vpop.f32.mrf.mxu3 }
 0x40b   : > { %1909 = vpow2.f32 %v1089_v44  ;;  %v1082_v56 = vadd.f32 %v1075_v50, %v1025_v34  ;;  %v1038_v57 = vpop.f32.mrf.mxu0  ;;  %v1051_v58 = vpop.f32.mrf.mxu1  ;;  %v1081_v5 = vadd.f32 %v1062_v46, %v1024_v45 }
 0x40c   : > { %v1212_v46 = vpop.permute.xlu0 %1211 }
 0x40d   : > { %v1094_v62 = vsub.f32 0.0, %v1082_v56  ;;  %vm1213_vm15 = vcmp.eq.s32.totalorder %v1212_v46, 1 }
 0x40f   : > { %v1095_v10 = vmul.f32 1.442695, %v1094_v62 }
 0x410   : > { %v1908_v11 = vpop.eup %1907 }
 0x411   : > { %v1910_v18 = vpop.eup %1909  ;;  %v1086_v27 = vadd.f32 1.0, %v1908_v11  ;;  %1911 = vpow2.f32 %v1095_v10 }
 0x412   : > { %v1091_v30 = vadd.f32 1.0, %v1910_v18  ;;  %1913 = vtanh.f32 %v1081_v5  ;;  %v1064_v31 = vpop.f32.mrf.mxu2  ;;  %v1077_v39 = vpop.f32.mrf.mxu3 }
 0x413   : > { %1915 = vrcp.f32 %v1086_v27  ;;  %v1225_v27 = vld [vmem:[%s1224_s5] sm:$0xff] }
 0x414   : > { %1917 = vrcp.f32 %v1091_v30  ;;  %v1227_v30 = vunpack.c.l.bf16 %v1225_v27  ;;  %v1228_v31 = vunpack.c.h.bf16 %v1225_v27 }
 0x417   : > { %v1912_v48 = vpop.eup %1911 }
 0x418   : > { %v1914_v49 = vpop.eup %1913  ;;  %v1097_v2 = vadd.f32 1.0, %v1912_v48 }
 0x419   : > { %v1916_v51 = vpop.eup %1915 }
 0x41a   : > { %v1918_v52 = vpop.eup %1917  ;;  %v1100_v63 = vmul.f32 %v1916_v51, %v1914_v49  ;;  %1919 = vrcp.f32 %v1097_v2 }
 0x41b   : > { %v1099_v41 = vmul.f32 %v1918_v52, %v2708_v24  ;;  %v1226_v52 = vld [vmem:[%s1224_s5 + $0x8] sm:$0xff] }
 0x41c   : > { %v1230_v40 = vunpack.c.h.bf16 %v1226_v52 }
 0x41d   : > { %v1101_v42 = vadd.f32 %v1100_v63, %v1099_v41 }
 0x41f   : > { %1921 = vtanh.f32 %v1101_v42  ;;  %v2753_v43 = vsel %vm1110_vm14, %v1101_v42, %v2708_v24  ;;  %v1127_v24 = vunpack.c.l.bf16 %v1124_v35 }
 0x420   : > { %v1920_v47 = vpop.eup %1919 }
 0x425   : > { %v1922_v53 = vpop.eup %1921 }
 0x426   : > { %v1103_v54 = vmul.f32 %v1922_v53, %v1920_v47 }
 0x428   : > { %v1113_v59 = vsel %vm1110_vm14, %v1103_v54, 0.0  ;;  %v2758_v60 = vsel %vm1110_vm14, %v1103_v54, %v2713_v37 }
 0x429   : > { %1116 = vst [vmem:[%s1115_s22] sm:$0xff] %v1113_v59  ;;  %v1129_v22 = vpack.c.bf16 %v2758_v60, %v2758_v60  ;;  %s2029_s22 = sshra.s32 %s1347_s23, 4  ;;  %s2030_s22 = int_to_ptr.hbm [resolvable:$true] %s2029_s22 }
 0x42a   : > { %s2031_s6 = scalar_lea.hbm %s2030_s22, 64  ;;  %p2036_p7 = scmp.lt.s32.totalorder %s2030_s22, %s2818_s3 }
 0x42b   : > { %1138 = vmatmul.bf16.vlgmr.msra.gmra.mxu0 %v1129_v22  ;;  %1151 = vmatmul.bf16.vlgmr.msra.gmra.mxu1 %v1129_v22  ;;  %p2032_p4 = scmp.ne.s32.totalorder %s2030_s22, %s2031_s6  ;;  %p2037_p8 = scmp.lt.s32.totalorder %s2035_s9, %s2031_s6 }
 0x42c   : > { %1164 = vmatmul.bf16.vlgmr.msra.gmra.mxu2 %v1129_v22  ;;  %1177 = vmatmul.bf16.vlgmr.msra.gmra.mxu3 %v1129_v22 }
 0x42d   : > { %p2033_p5 = pnand %p2032_p4, %p2181_p9  ;;  %p2038_p10 = por %p2037_p8, %p2036_p7 }
 0x42f   : > { %p2034_p6 = pneg %p2033_p5 }
 0x431   : > { %p2039_p13 = pnand %p2038_p10, %p2034_p6 }
 0x4a8   : > { %v1139_v6 = vpop.f32.mrf.mxu0  ;;  %v1152_v15 = vpop.f32.mrf.mxu1 }
 0x4a9   : > { %v1182_v4 = vadd.f32 %v1139_v6, %v1125_v26  ;;  %v1183_v23 = vadd.f32 %v1152_v15, %v1126_v1 }
 0x4ab   : > { %v1186_v9 = vsub.f32 0.0, %v1182_v4  ;;  %v1191_v13 = vsub.f32 0.0, %v1183_v23 }
 0x4ad   : > { %v1187_v19 = vmul.f32 1.442695, %v1186_v9  ;;  %v1192_v20 = vmul.f32 1.442695, %v1191_v13 }
 0x4af   : > { %1923 = vpow2.f32 %v1187_v19  ;;  %v1165_v28 = vpop.f32.mrf.mxu2  ;;  %v1178_v32 = vpop.f32.mrf.mxu3 }
 0x4b0   : > { %1925 = vpow2.f32 %v1192_v20  ;;  %v1185_v36 = vadd.f32 %v1178_v32, %v1128_v14  ;;  %v1141_v37 = vpop.f32.mrf.mxu0  ;;  %v1154_v55 = vpop.f32.mrf.mxu1  ;;  %v1184_v3 = vadd.f32 %v1165_v28, %v1127_v24 }
 0x4b1   : > { %v1314_v37 = vpop.permute.xlu1 %1313 }
 0x4b2   : > { %v1197_v0 = vsub.f32 0.0, %v1185_v36  ;;  %vm1315_vm0 = vcmp.eq.s32.totalorder %v1314_v37, 1 }
 0x4b4   : > { %v1198_v7 = vmul.f32 1.442695, %v1197_v0 }
 0x4b5   : > { %v1924_v8 = vpop.eup %1923 }
 0x4b6   : > { %v1926_v12 = vpop.eup %1925  ;;  %v1189_v16 = vadd.f32 1.0, %v1924_v8  ;;  %1927 = vpow2.f32 %v1198_v7 }
 0x4b7   : > { %v1194_v17 = vadd.f32 1.0, %v1926_v12  ;;  %1929 = vtanh.f32 %v1184_v3  ;;  %v1167_v21 = vpop.f32.mrf.mxu2  ;;  %v1180_v25 = vpop.f32.mrf.mxu3 }
 0x4b8   : > { %1931 = vrcp.f32 %v1189_v16 }
 0x4b9   : > { %1933 = vrcp.f32 %v1194_v17 }
 0x4bc   : > { %v1928_v29 = vpop.eup %1927 }
 0x4bd   : > { %v1930_v33 = vpop.eup %1929  ;;  %v1200_v45 = vadd.f32 1.0, %v1928_v29 }
 0x4be   : > { %v1932_v34 = vpop.eup %1931 }
 0x4bf   : > { %v1934_v38 = vpop.eup %1933  ;;  %v1203_v44 = vmul.f32 %v1932_v34, %v1930_v33  ;;  %1935 = vrcp.f32 %v1200_v45 }
 0x4c0   : > { %v1202_v50 = vmul.f32 %v1934_v38, %v2753_v43 }
 0x4c2   : > { %v1204_v56 = vadd.f32 %v1203_v44, %v1202_v50 }
 0x4c4   : > { %1937 = vtanh.f32 %v1204_v56  ;;  %v1214_v57 = vsel %vm1213_vm15, %v1204_v56, %v2753_v43  ;;  %v1229_v43 = vunpack.c.l.bf16 %v1226_v52 }
 0x4c5   : > { %v1936_v58 = vpop.eup %1935 }
 0x4ca   : > { %v1938_v62 = vpop.eup %1937 }
 0x4cb   : > { %v1206_v5 = vmul.f32 %v1938_v62, %v1936_v58 }
 0x4cd   : > { %v1216_v10 = vsel %vm1213_vm15, %v1206_v5, 0.0  ;;  %v1215_v11 = vsel %vm1213_vm15, %v1206_v5, %v2758_v60 }
 0x4ce   : > { %1219 = vst [vmem:[%s1218_s30] sm:$0xff] %v1216_v10  ;;  %v1231_v18 = vpack.c.bf16 %v1215_v11, %v1215_v11 }
 0x4d0   : > { %1240 = vmatmul.bf16.vlgmr.msrb.gmra.mxu0 %v1231_v18  ;;  %1253 = vmatmul.bf16.vlgmr.msrb.gmra.mxu1 %v1231_v18 }
 0x4d1   : > { %1266 = vmatmul.bf16.vlgmr.msrb.gmra.mxu2 %v1231_v18  ;;  %1279 = vmatmul.bf16.vlgmr.msrb.gmra.mxu3 %v1231_v18 }
 0x54d   : > { %v1241_v39 = vpop.f32.mrf.mxu0  ;;  %v1254_v48 = vpop.f32.mrf.mxu1 }
 0x54e   : > { %v1284_v49 = vadd.f32 %v1241_v39, %v1227_v30  ;;  %v1285_v51 = vadd.f32 %v1254_v48, %v1228_v31 }
 0x550   : > { %v1288_v63 = vsub.f32 0.0, %v1284_v49  ;;  %v1293_v2 = vsub.f32 0.0, %v1285_v51 }
 0x552   : > { %v1289_v41 = vmul.f32 1.442695, %v1288_v63  ;;  %v1294_v42 = vmul.f32 1.442695, %v1293_v2 }
 0x554   : > { %1939 = vpow2.f32 %v1289_v41  ;;  %v1267_v47 = vpop.f32.mrf.mxu2  ;;  %v1280_v53 = vpop.f32.mrf.mxu3 }
 0x555   : > { %1941 = vpow2.f32 %v1294_v42  ;;  %v1287_v54 = vadd.f32 %v1280_v53, %v1230_v40  ;;  %v1243_v59 = vpop.f32.mrf.mxu0  ;;  %v1256_v60 = vpop.f32.mrf.mxu1  ;;  %v1286_v61 = vadd.f32 %v1267_v47, %v1229_v43 }
 0x557   : > { %v1299_v22 = vsub.f32 0.0, %v1287_v54 }
 0x559   : > { %v1300_v26 = vmul.f32 1.442695, %v1299_v22 }
 0x55a   : > { %v1940_v1 = vpop.eup %1939 }
 0x55b   : > { %v1942_v6 = vpop.eup %1941  ;;  %v1291_v15 = vadd.f32 1.0, %v1940_v1  ;;  %1943 = vpow2.f32 %v1300_v26 }
 0x55c   : > { %v1296_v4 = vadd.f32 1.0, %v1942_v6  ;;  %1945 = vtanh.f32 %v1286_v61  ;;  %v1269_v23 = vpop.f32.mrf.mxu2  ;;  %v1282_v35 = vpop.f32.mrf.mxu3 }
 0x55d   : > { %1947 = vrcp.f32 %v1291_v15 }
 0x55e   : > { %1949 = vrcp.f32 %v1296_v4 }
 0x561   : > { %v1944_v9 = vpop.eup %1943 }
 0x562   : > { %v1946_v13 = vpop.eup %1945  ;;  %v1302_v24 = vadd.f32 1.0, %v1944_v9 }
 0x563   : > { %v1948_v14 = vpop.eup %1947 }
 0x564   : > { %v1950_v19 = vpop.eup %1949  ;;  %v1305_v20 = vmul.f32 %v1948_v14, %v1946_v13  ;;  %1951 = vrcp.f32 %v1302_v24 }
 0x565   : > { %v1304_v28 = vmul.f32 %v1950_v19, %v1214_v57 }
 0x567   : > { %v1306_v32 = vadd.f32 %v1305_v20, %v1304_v28 }
 0x569   : > { %1953 = vtanh.f32 %v1306_v32 }
 0x56a   : > { %v1952_v36 = vpop.eup %1951 }
 0x56f   : > { %v1954_v55 = vpop.eup %1953 }
 0x570   : > { %v1308_v0 = vmul.f32 %v1954_v55, %v1952_v36 }
 0x572   : > { %v1318_v3 = vsel %vm1315_vm0, %v1308_v0, 0.0 }
 0x573   : > { %1321 = vst [vmem:[%s1320_s29] sm:$0xff] %v1318_v3 }
 0x574   : > { %2042 = shalt.err (!%p2039_p13)
}
 0x575   : > { %s2107_s8 = smov 128   ;;  %s2108_s11 = smov 256  }
 0x576   : > { %s2109_s5 = smov 8  }
 0x577   : > { %1754 = dma.vmem_to_hbm [thread:$0]  (%p2181_p9), %s2777_s19, 1024, %s1347_s23, %s1325_s15, %s2107_s8, %s2108_s11, %s2109_s5  }
 0x578 PF: > { %s1361_s1 = sand.u32 1, %s2081_s12   ;;  %p1764_p0 = pnand %p1525_p12, %p2188_p11 }
 0x579   : > { %s1362_s4 = scalar_lea.sflag [#allocation6], %s1361_s1 }
 0x57a   : > { %p1765_p1 = pneg %p1764_p0 }
 0x57c   : > { %2076 = dma.done.wait (%p1765_p1), %s1362_s4, 1024  }
 0x57d   : > { %2078 = vsyncadd (%p1765_p1), %s1362_s4, 4294966272  ;;  %s22_s17 = sadd.s32 1, %s2101_s17   ;;  %s2826_s12 = smov %s2085_s13 }
 0x57e   : > { %p19_p2 = scmp.ge.s32.totalorder %s22_s17, 4   ;;  %s2827_s13 = smov %s2089_s14 }
 0x57f   : > { %s2828_s14 = smov %s2186_s26  ;;  %s2829_s15 = smov %s2097_s16 }
 0x580   : > { %s2830_s16 = smov %s2832_s20  ;;  %21 = sbr.rel (!%p19_p2) target bundleno = 10 (0xa), region = 110 }
 0x585   :  { %1368 = vsyncpa [#allocation5], 1 }
 0x586   :  { %1370 = vsyncpa [#allocation5 + $0x1], 1 }
 0x587   :  { %1371 = vsyncpa [#allocation8], 1 }
 0x588   :  { %1373 = vsyncpa [#allocation8 + $0x1], 1 }
 0x589   :  { %1374 = vsyncpa [#allocation6], 1 }
 0x58a   :  { %1376 = vsyncpa [#allocation6 + $0x1], 1 }

</bundles_post_ra>
